<compile_context>
chip_gen: v7x
topology: tpu7x:2x2x1
jax: 0.10.0
libtpu: 0.0.40
codegen_flags: <defaults>
</compile_context>

<pallas_src>
import functools

import jax
import jax.numpy as jnp
from jax.experimental import pallas as pl
from jax.experimental.pallas import tpu as pltpu

LANE = 128
# 48 MiB is safe on every generation (v5e/v6e: 128 MiB physical, v7x: 64 MiB/TC).
# TODO(synk): derive per-generation (raise toward ~96 MiB on v5e/v6e).
_VMEM_LIMIT = 48 * 1024 * 1024


def _round_up(x, m):
    return ((x + m - 1) // m) * m


def _pad_last(x, target):
    pad = target - x.shape[-1]
    if pad == 0:
        return x
    return jnp.pad(x, [(0, 0)] * (x.ndim - 1) + [(0, pad)])


def _pick_tm(m):
    # Largest row tile that divides M with >= 8 grid steps (double-buffering
    # and megacore balance); fall back to >= 4 / >= 2 steps, then full extent.
    for min_steps in (8, 4, 2):
        for tm in (2048, 1024, 512, 256, 128, 64, 32, 16, 8):
            if m % tm == 0 and m // tm >= min_steps:
                return tm
    return m


# ---------------------------------------------------------------------------
# K1 / K3: (optional fused BN-apply + ReLU6 on the input) -> 1x1 conv as an
# MXU matmul (bf16 inputs, f32 accumulate) -> per-tile BN partial stats.
# ---------------------------------------------------------------------------
def _conv1x1_bn_stats_kernel(x_ref, a_ref, c_ref, w_ref, y_ref, stats_ref, *,
                             apply_in_act):
    x = x_ref[...].astype(jnp.float32)                            # (TM, Kp)
    if apply_in_act:
        # BN-apply (single FMA) + ReLU6 of the previous stage, fused here.
        x = jnp.clip(x * a_ref[...] + c_ref[...], 0.0, 6.0)
    y = jnp.dot(x.astype(jnp.bfloat16), w_ref[...],
                preferred_element_type=jnp.float32)               # (TM, Cp) f32
    y_ref[...] = y.astype(y_ref.dtype)
    # Per-tile partial BN statistics on the f32 accumulator, single store.
    stats_ref[0, :, :] = jnp.concatenate(
        [jnp.sum(y, axis=0, keepdims=True),
         jnp.sum(y * y, axis=0, keepdims=True)], axis=0)


def _conv1x1_bn_stats(x, a_in, c_in, w, *, apply_in_act, out_dtype):
    m, kp = x.shape
    cp = w.shape[1]
    tm = _pick_tm(m)
    mt = m // tm
    if a_in is None:
        a_in = jnp.ones((1, kp), jnp.float32)
        c_in = jnp.zeros((1, kp), jnp.float32)
    cost = pl.CostEstimate(
        flops=2 * m * kp * cp, transcendentals=0,
        bytes_accessed=(m * kp * x.dtype.itemsize
                        + m * cp * jnp.dtype(out_dtype).itemsize
                        + mt * 2 * cp * 4 + kp * cp * 2))
    y, stats = pl.pallas_call(
        functools.partial(_conv1x1_bn_stats_kernel, apply_in_act=apply_in_act),
        out_shape=(jax.ShapeDtypeStruct((m, cp), out_dtype),
                   jax.ShapeDtypeStruct((mt, 2, cp), jnp.float32)),
        grid=(mt,),
        in_specs=[
            pl.BlockSpec((tm, kp), lambda i: (i, 0)),
            pl.BlockSpec((1, kp), lambda i: (0, 0)),
            pl.BlockSpec((1, kp), lambda i: (0, 0)),
            pl.BlockSpec((kp, cp), lambda i: (0, 0)),
        ],
        out_specs=(
            pl.BlockSpec((tm, cp), lambda i: (i, 0)),
            pl.BlockSpec((1, 2, cp), lambda i: (i, 0, 0)),
        ),
        compiler_params=pltpu.CompilerParams(
            dimension_semantics=("parallel",),
            vmem_limit_bytes=_VMEM_LIMIT),
        cost_estimate=cost,
    )(x, a_in, c_in, w)
    return y, stats


# ---------------------------------------------------------------------------
# K2: fused [BN1-apply + ReLU6] -> 3x3 grouped conv as ONE fused-tap MXU
# contraction (VMEM-only im2col) -> per-image BN2 partial stats.
# ---------------------------------------------------------------------------
def _dwconv_bn_stats_kernel(y1_ref, a_ref, c_ref, w_ref, y2_ref, stats_ref,
                            pad_scr, im2col_scr, *, H, W, left):
    HW = H * W
    cp = y1_ref.shape[-1]

    # Zero ONLY the halo rows (top `left`, bottom W+1); the interior is fully
    # overwritten below.  Zeroed every step (not just step 0) so the kernel
    # stays correct if the "parallel" grid axis is sharded across TensorCores,
    # each with its own scratch instance.
    pad_scr[0:left, :] = jnp.zeros((left, cp), pad_scr.dtype)
    pad_scr[left + HW:, :] = jnp.zeros((pad_scr.shape[0] - left - HW, cp),
                                       pad_scr.dtype)

    # Fused BN1-apply (FMA) + ReLU6, single f32 -> bf16 cast into the scratch.
    h = jnp.clip(y1_ref[0].astype(jnp.float32) * a_ref[...] + c_ref[...],
                 0.0, 6.0)                                        # (HW, Cp) f32
    pad_scr[left:left + HW, :] = h.astype(pad_scr.dtype)

    # VMEM-only im2col: spatial shift (di, dj) == flat shift di*W + dj on the
    # zero-padded flat image (halo absorbs the H overflow, column masks absorb
    # the W wrap).  The 9 bf16 taps are concatenated along K so the grouped
    # conv is a single (HW, 9*Cp) @ (9*Cp, Cp) contraction: fills the 256-deep
    # MXU passes on v6e/v7x and keeps all accumulation inside the MXU (no 9x
    # f32 (HW, Cp) VMEM read-modify-write chain, which saturates v5e's single
    # vector-store slot).
    col = jax.lax.broadcasted_iota(jnp.int32, (HW, 1), 0) % W      # output w
    mask_l = col != 0            # tap reads w-1: invalid where w == 0
    mask_r = col != (W - 1)      # tap reads w+1: invalid where w == W-1
    for kh in range(3):
        for kw in range(3):
            off = left + (kh - 1) * W + (kw - 1)
            t = pad_scr[off:off + HW, :]
            if kw == 0:
                t = jnp.where(mask_l, t, jnp.zeros_like(t))
            elif kw == 2:
                t = jnp.where(mask_r, t, jnp.zeros_like(t))
            tap = kh * 3 + kw
            im2col_scr[:, tap * cp:(tap + 1) * cp] = t

    acc = jnp.dot(im2col_scr[...], w_ref[...],
                  preferred_element_type=jnp.float32)             # (HW, Cp) f32
    y2_ref[0] = acc.astype(y2_ref.dtype)
    stats_ref[0, :, :] = jnp.concatenate(
        [jnp.sum(acc, axis=0, keepdims=True),
         jnp.sum(acc * acc, axis=0, keepdims=True)], axis=0)


def _dwconv_bn_stats(y1_img, a1, c1, w2_taps, *, H, W):
    n, hw, cp = y1_img.shape
    left = _round_up(W + 1, 16)          # bf16 sublane-pack aligned interior
    scr_len = left + hw + (W + 1)
    cost = pl.CostEstimate(
        flops=2 * 9 * n * hw * cp * cp, transcendentals=0,
        bytes_accessed=2 * n * hw * cp * 2 + n * 2 * cp * 4 + 9 * cp * cp * 2)
    y2, stats = pl.pallas_call(
        functools.partial(_dwconv_bn_stats_kernel, H=H, W=W, left=left),
        out_shape=(jax.ShapeDtypeStruct((n, hw, cp), jnp.bfloat16),
                   jax.ShapeDtypeStruct((n, 2, cp), jnp.float32)),
        grid=(n,),
        in_specs=[
            pl.BlockSpec((1, hw, cp), lambda i: (i, 0, 0)),
            pl.BlockSpec((1, cp), lambda i: (0, 0)),
            pl.BlockSpec((1, cp), lambda i: (0, 0)),
            pl.BlockSpec((9 * cp, cp), lambda i: (0, 0)),
        ],
        out_specs=(
            pl.BlockSpec((1, hw, cp), lambda i: (i, 0, 0)),
            pl.BlockSpec((1, 2, cp), lambda i: (i, 0, 0)),
        ),
        scratch_shapes=[pltpu.VMEM((scr_len, cp), jnp.bfloat16),
                        pltpu.VMEM((hw, 9 * cp), jnp.bfloat16)],
        compiler_params=pltpu.CompilerParams(
            dimension_semantics=("parallel",),
            vmem_limit_bytes=_VMEM_LIMIT),
        cost_estimate=cost,
    )(y1_img, a1, c1, w2_taps)
    return y2, stats


# ---------------------------------------------------------------------------
# K4: final BN3-apply (FMA) + ReLU6 + optional residual add.
# ---------------------------------------------------------------------------
def _bn_act_res_kernel(y_ref, a_ref, c_ref, *rest, add_residual):
    if add_residual:
        x_ref, o_ref = rest
    else:
        (o_ref,) = rest
    out = jnp.clip(y_ref[...].astype(jnp.float32) * a_ref[...] + c_ref[...],
                   0.0, 6.0)
    if add_residual:
        out = out + x_ref[...]
    o_ref[...] = out


def _bn_act_residual(y, a, c, x_res):
    m, cp = y.shape
    tm = _pick_tm(m)
    mt = m // tm
    add_residual = x_res is not None
    in_specs = [
        pl.BlockSpec((tm, cp), lambda i: (i, 0)),
        pl.BlockSpec((1, cp), lambda i: (0, 0)),
        pl.BlockSpec((1, cp), lambda i: (0, 0)),
    ]
    args = [y, a, c]
    if add_residual:
        in_specs.append(pl.BlockSpec((tm, cp), lambda i: (i, 0)))
        args.append(x_res)
    return pl.pallas_call(
        functools.partial(_bn_act_res_kernel, add_residual=add_residual),
        out_shape=jax.ShapeDtypeStruct((m, cp), jnp.float32),
        grid=(mt,),
        in_specs=in_specs,
        out_specs=pl.BlockSpec((tm, cp), lambda i: (i, 0)),
        compiler_params=pltpu.CompilerParams(
            dimension_semantics=("parallel",),
            vmem_limit_bytes=_VMEM_LIMIT),
    )(*args)


def _bn_coeffs(stats, gamma_p, beta_p, count, eps):
    # stats: (tiles, 2, Cp) partial (sum, sumsq).  Tiny O(C) math kept in JAX.
    s = jnp.sum(stats, axis=0)
    mean = s[0] / count
    var = jnp.maximum(s[1] / count - mean * mean, 0.0)   # biased var (train BN)
    a = gamma_p * jax.lax.rsqrt(var + eps)               # gamma==0 on padded ch
    c = beta_p - mean * a
    return a.reshape(1, -1), c.reshape(1, -1)


@functools.partial(jax.jit,
                   static_argnames=("in_channels", "out_channels", "expansion", "eps"))
def block_for_stride_one(x, w1, g1, b1, w2, g2, b2, w3, g3, b3, *,
                         in_channels, out_channels, expansion, eps=1e-5):
    """Forward pass of BlockForStrideOne (training-mode BatchNorm). x is NCHW f32."""
    n, cin, hh, ww = x.shape
    assert cin == in_channels
    cexp = expansion * in_channels
    m = n * hh * ww

    cin_p = _round_up(cin, LANE)
    cexp_p = _round_up(cexp, LANE)
    cout_p = _round_up(out_channels, LANE)

    # NCHW -> channels-last (M, C), channels zero-padded to a lane multiple.
    # TODO(synk): accept/emit channels-last directly to avoid the two
    # full-tensor transposes for memory-bound deployments.
    x_cl = jnp.transpose(x, (0, 2, 3, 1)).reshape(m, cin)
    x_p = _pad_last(x_cl, cin_p).astype(jnp.float32)

    # ---- stage 1: 1x1 expansion conv + BN1 partial stats (y1 stored bf16) ----
    w1_mat = _pad_last(
        jnp.pad(jnp.transpose(w1.reshape(cexp, cin), (1, 0)),
                ((0, cin_p - cin), (0, 0))), cexp_p).astype(jnp.bfloat16)
    y1, stats1 = _conv1x1_bn_stats(x_p, None, None, w1_mat,
                                   apply_in_act=False, out_dtype=jnp.bfloat16)
    a1, c1 = _bn_coeffs(stats1, _pad_last(g1, cexp_p), _pad_last(b1, cexp_p), m, eps)

    # ---- stage 2: 3x3 grouped conv (fused taps) + BN2 partial stats ----
    # Grouped conv == 9 taps of a block-diagonal (Cexp, Cexp) matmul; weights
    # are materialized densely and stacked along K to match the in-kernel
    # im2col tap order (fine while Cp <= 128; see TODO at top for large groups).
    groups = in_channels
    gsz = cexp // groups
    wg = jnp.transpose(w2.reshape(groups, gsz, gsz, 3, 3), (3, 4, 0, 2, 1))
    blocks = wg.reshape(9, groups, gsz, gsz)             # (tap, g, cin_g, cout_g)
    eye = jnp.eye(groups, dtype=w2.dtype)
    w2_dense = (blocks[:, :, :, None, :] *
                eye[None, :, None, :, None]).reshape(9, cexp, cexp)
    w2_taps = jnp.pad(w2_dense, ((0, 0), (0, cexp_p - cexp),
                                 (0, cexp_p - cexp))).astype(jnp.bfloat16)
    w2_taps = w2_taps.reshape(9 * cexp_p, cexp_p)
    y1_img = y1.reshape(n, hh * ww, cexp_p)
    y2, stats2 = _dwconv_bn_stats(y1_img, a1, c1, w2_taps, H=hh, W=ww)
    a2, c2 = _bn_coeffs(stats2, _pad_last(g2, cexp_p), _pad_last(b2, cexp_p), m, eps)

    # ---- stage 3: 1x1 projection conv (BN2-apply + ReLU6 fused) + BN3 stats ----
    w3_mat = _pad_last(
        jnp.pad(jnp.transpose(w3.reshape(out_channels, cexp), (1, 0)),
                ((0, cexp_p - cexp), (0, 0))), cout_p).astype(jnp.bfloat16)
    y3, stats3 = _conv1x1_bn_stats(y2.reshape(m, cexp_p), a2, c2, w3_mat,
                                   apply_in_act=True, out_dtype=jnp.float32)
    a3, c3 = _bn_coeffs(stats3, _pad_last(g3, cout_p), _pad_last(b3, cout_p), m, eps)

    # ---- stage 4: BN3-apply + ReLU6 + residual ----
    add_res = in_channels == out_channels
    out_p = _bn_act_residual(y3, a3, c3, x_p if add_res else None)

    out = out_p[:, :out_channels].reshape(n, hh, ww, out_channels)
    return jnp.transpose(out, (0, 3, 1, 2))


# ---------------------------------------------------------------------------
# Plain-JAX reference (mirrors the intentional bf16 rounding of conv inputs so
# the correctness check validates kernel structure with a meaningful tolerance).
# ---------------------------------------------------------------------------
def _q_bf16(v):
    return v.astype(jnp.bfloat16).astype(jnp.float32)


def _conv_ref(x, w, padding, groups):
    return jax.lax.conv_general_dilated(
        _q_bf16(x), _q_bf16(w), (1, 1), [(padding, padding), (padding, padding)],
        dimension_numbers=("NCHW", "OIHW", "NCHW"), feature_group_count=groups)


def _bn_relu6_ref(y, gamma, beta, eps):
    mean = jnp.mean(y, axis=(0, 2, 3), keepdims=True)
    var = jnp.mean(jnp.square(y - mean), axis=(0, 2, 3), keepdims=True)
    xhat = (y - mean) * jax.lax.rsqrt(var + eps)
    return jnp.clip(gamma[None, :, None, None] * xhat + beta[None, :, None, None],
                    0.0, 6.0)


def _reference(x, w1, g1, b1, w2, g2, b2, w3, g3, b3, *,
               in_channels, out_channels, eps=1e-5):
    h = _bn_relu6_ref(_conv_ref(x, w1, 0, 1), g1, b1, eps)
    h = _bn_relu6_ref(_conv_ref(h, w2, 1, in_channels), g2, b2, eps)
    h = _bn_relu6_ref(_conv_ref(h, w3, 0, 1), g3, b3, eps)
    if in_channels == out_channels:
        h = h + x
    return h


def _make_params(key, in_channels, out_channels, expansion):
    cexp = expansion * in_channels
    ks = jax.random.split(key, 9)
    w1 = jax.random.normal(ks[0], (cexp, in_channels, 1, 1), jnp.float32) * 0.3
    g1 = 1.0 + 0.1 * jax.random.normal(ks[1], (cexp,), jnp.float32)
    b1 = 0.1 * jax.random.normal(ks[2], (cexp,), jnp.float32)
    w2 = jax.random.normal(ks[3], (cexp, cexp // in_channels, 3, 3), jnp.float32) * 0.1
    g2 = 1.0 + 0.1 * jax.random.normal(ks[4], (cexp,), jnp.float32)
    b2 = 0.1 * jax.random.normal(ks[5], (cexp,), jnp.float32)
    w3 = jax.random.normal(ks[6], (out_channels, cexp, 1, 1), jnp.float32) * 0.1
    g3 = 1.0 + 0.1 * jax.random.normal(ks[7], (out_channels,), jnp.float32)
    b3 = 0.1 * jax.random.normal(ks[8], (out_channels,), jnp.float32)
    return (w1, g1, b1, w2, g2, b2, w3, g3, b3)


def _run_config(key, *, n, in_channels, out_channels, expansion, hw):
    kx, kp = jax.random.split(key)
    x = jax.random.normal(kx, (n, in_channels, hw, hw), jnp.float32)
    params = _make_params(kp, in_channels, out_channels, expansion)
    out = block_for_stride_one(x, *params, in_channels=in_channels,
                               out_channels=out_channels, expansion=expansion)
    out = jax.block_until_ready(out)
    ref = _reference(x, *params, in_channels=in_channels, out_channels=out_channels)
    # Tolerance covers the intentional bf16 quantization of conv inputs and of
    # the y1/y2 HBM intermediates (BN applied to bf16-rounded activations).
    if not bool(jnp.allclose(out, ref, atol=6e-2, rtol=6e-2)):
        raise AssertionError(
            "Pallas output does not match reference; max abs diff "
            f"{float(jnp.max(jnp.abs(out - ref)))}")
    return out


if __name__ == "__main__":
    key = jax.random.PRNGKey(0)
    k1, k2 = jax.random.split(key)

    # Config 1: in_channels == out_channels -> residual path exercised.
    _run_config(k1, n=2, in_channels=4, out_channels=4, expansion=6, hw=16)

    # Config 2: in_channels != out_channels -> no residual.
    _run_config(k2, n=2, in_channels=4, out_channels=8, expansion=3, hw=16)

    print("KERNEL_OK")
</pallas_src>

<mosaic_0001>
module attributes {stable_mosaic.version = 11 : i64} {
  func.func @_conv1x1_bn_stats_kernel(%arg0: i32, %arg1: memref<64x128xf32, #tpu.memory_space<vmem>>, %arg2: memref<1x128xf32, #tpu.memory_space<vmem>>, %arg3: memref<1x128xf32, #tpu.memory_space<vmem>>, %arg4: memref<128x128xbf16, #tpu.memory_space<vmem>>, %arg5: memref<64x128xbf16, #tpu.memory_space<vmem>>, %arg6: memref<1x2x128xf32, #tpu.memory_space<vmem>>) attributes {dimension_semantics = [#tpu.dimension_semantics<parallel>], iteration_bounds = array<i64: 8>, scalar_prefetch = 0 : i64, scratch_operands = 0 : i64, tpu.core_type = #tpu.core_type<tc>, window_params = [{transform_indices = @transform_0, window_bounds = array<i64: 64, 128>}, {pipeline_mode = #tpu.pipeline_mode<synchronous>, transform_indices = @transform_1, window_bounds = array<i64: 1, 128>}, {pipeline_mode = #tpu.pipeline_mode<synchronous>, transform_indices = @transform_2, window_bounds = array<i64: 1, 128>}, {pipeline_mode = #tpu.pipeline_mode<synchronous>, transform_indices = @transform_3, window_bounds = array<i64: 128, 128>}, {transform_indices = @transform_4, window_bounds = array<i64: 64, 128>}, {transform_indices = @transform_5, window_bounds = array<i64: 1, 2, 128>}]} {
    %c0 = arith.constant 0 : index
    %c0_0 = arith.constant 0 : index
    %0 = vector.load %arg1[%c0, %c0_0] : memref<64x128xf32, #tpu.memory_space<vmem>>, vector<64x128xf32>
    %1 = arith.truncf %0 : vector<64x128xf32> to vector<64x128xbf16>
    %c0_1 = arith.constant 0 : index
    %c0_2 = arith.constant 0 : index
    %2 = vector.load %arg4[%c0_1, %c0_2] : memref<128x128xbf16, #tpu.memory_space<vmem>>, vector<128x128xbf16>
    %cst = arith.constant dense<0.000000e+00> : vector<64x128xf32>
    %3 = tpu.matmul %1, %2, %cst {dimension_numbers = #tpu.dot_dimension_numbers<[1], [0], [0], [1], [0, 0, 1, 1], [], []>} : vector<64x128xbf16>, vector<128x128xbf16>, vector<64x128xf32> -> vector<64x128xf32>
    %4 = arith.truncf %3 : vector<64x128xf32> to vector<64x128xbf16>
    %c0_3 = arith.constant 0 : index
    %c0_4 = arith.constant 0 : index
    %5 = vector.load %arg5[%c0_3, %c0_4] : memref<64x128xbf16, #tpu.memory_space<vmem>>, vector<64x128xbf16>
    tpu.vector_store %arg5[%c0_3, %c0_4], %4 {strides = array<i32>} : memref<64x128xbf16, #tpu.memory_space<vmem>>, vector<64x128xbf16>,
    %cst_5 = arith.constant dense<0.000000e+00> : vector<128xf32>
    %6 = vector.multi_reduction <add>, %3, %cst_5 [0] : vector<64x128xf32> to vector<128xf32>
    %7 = vector.shape_cast %6 : vector<128xf32> to vector<1x128xf32>
    %8 = arith.mulf %3, %3 : vector<64x128xf32>
    %cst_6 = arith.constant dense<0.000000e+00> : vector<128xf32>
    %9 = vector.multi_reduction <add>, %8, %cst_6 [0] : vector<64x128xf32> to vector<128xf32>
    %10 = vector.shape_cast %9 : vector<128xf32> to vector<1x128xf32>
    %11 = tpu.concatenate %7, %10 in 0 : vector<1x128xf32>, vector<1x128xf32> -> vector<2x128xf32>
    %c0_7 = arith.constant 0 : index
    %c0_8 = arith.constant 0 : index
    %c0_9 = arith.constant 0 : index
    %12 = vector.load %arg6[%c0_7, %c0_8, %c0_9] : memref<1x2x128xf32, #tpu.memory_space<vmem>>, vector<1x2x128xf32>
    %13 = vector.shape_cast %12 : vector<1x2x128xf32> to vector<2x128xf32>
    %14 = vector.shape_cast %11 : vector<2x128xf32> to vector<1x2x128xf32>
    tpu.vector_store %arg6[%c0_7, %c0_8, %c0_9], %14 {strides = array<i32>} : memref<1x2x128xf32, #tpu.memory_space<vmem>>, vector<1x2x128xf32>,
    return
  }
  func.func @transform_0(%arg0: i32) -> (i32, i32) {
    %c0_i32 = arith.constant 0 : i32
    %c0_i32_0 = arith.constant 0 : i32
    return %arg0, %c0_i32 : i32, i32
  }
  func.func @transform_1(%arg0: i32) -> (i32, i32) {
    %c0_i32 = arith.constant 0 : i32
    %c0_i32_0 = arith.constant 0 : i32
    %c0_i32_1 = arith.constant 0 : i32
    return %c0_i32, %c0_i32_0 : i32, i32
  }
  func.func @transform_2(%arg0: i32) -> (i32, i32) {
    %c0_i32 = arith.constant 0 : i32
    %c0_i32_0 = arith.constant 0 : i32
    %c0_i32_1 = arith.constant 0 : i32
    return %c0_i32, %c0_i32_0 : i32, i32
  }
  func.func @transform_3(%arg0: i32) -> (i32, i32) {
    %c0_i32 = arith.constant 0 : i32
    %c0_i32_0 = arith.constant 0 : i32
    %c0_i32_1 = arith.constant 0 : i32
    return %c0_i32, %c0_i32_0 : i32, i32
  }
  func.func @transform_4(%arg0: i32) -> (i32, i32) {
    %c0_i32 = arith.constant 0 : i32
    %c0_i32_0 = arith.constant 0 : i32
    return %arg0, %c0_i32 : i32, i32
  }
  func.func @transform_5(%arg0: i32) -> (i32, i32, i32) {
    %c0_i32 = arith.constant 0 : i32
    %c0_i32_0 = arith.constant 0 : i32
    %c0_i32_1 = arith.constant 0 : i32
    return %arg0, %c0_i32, %c0_i32_0 : i32, i32, i32
  }
}

module attributes {stable_mosaic.version = 11 : i64} {
  func.func @_dwconv_bn_stats_kernel(%arg0: i32, %arg1: memref<1x256x128xbf16, #tpu.memory_space<vmem>>, %arg2: memref<1x128xf32, #tpu.memory_space<vmem>>, %arg3: memref<1x128xf32, #tpu.memory_space<vmem>>, %arg4: memref<1152x128xbf16, #tpu.memory_space<vmem>>, %arg5: memref<1x256x128xbf16, #tpu.memory_space<vmem>>, %arg6: memref<1x2x128xf32, #tpu.memory_space<vmem>>, %arg7: memref<305x128xbf16, #tpu.memory_space<vmem>>, %arg8: memref<256x1152xbf16, #tpu.memory_space<vmem>>) attributes {dimension_semantics = [#tpu.dimension_semantics<parallel>], iteration_bounds = array<i64: 2>, scalar_prefetch = 0 : i64, scratch_operands = 2 : i64, tpu.core_type = #tpu.core_type<tc>, window_params = [{transform_indices = @transform_0, window_bounds = array<i64: 1, 256, 128>}, {pipeline_mode = #tpu.pipeline_mode<synchronous>, transform_indices = @transform_1, window_bounds = array<i64: 1, 128>}, {pipeline_mode = #tpu.pipeline_mode<synchronous>, transform_indices = @transform_2, window_bounds = array<i64: 1, 128>}, {pipeline_mode = #tpu.pipeline_mode<synchronous>, transform_indices = @transform_3, window_bounds = array<i64: 1152, 128>}, {transform_indices = @transform_4, window_bounds = array<i64: 1, 256, 128>}, {transform_indices = @transform_5, window_bounds = array<i64: 1, 2, 128>}]} {
    %cst = arith.constant 0.000000e+00 : bf16
    %0 = vector.broadcast %cst : bf16 to vector<32x128xbf16>
    %c0 = arith.constant 0 : index
    %c0_0 = arith.constant 0 : index
    %1 = vector.load %arg7[%c0, %c0_0] : memref<305x128xbf16, #tpu.memory_space<vmem>>, vector<32x128xbf16>
    tpu.vector_store %arg7[%c0, %c0_0], %0 {strides = array<i32>} : memref<305x128xbf16, #tpu.memory_space<vmem>>, vector<32x128xbf16>,
    %cst_1 = arith.constant 0.000000e+00 : bf16
    %2 = vector.broadcast %cst_1 : bf16 to vector<17x128xbf16>
    %c288 = arith.constant 288 : index
    %c0_2 = arith.constant 0 : index
    %3 = vector.load %arg7[%c288, %c0_2] : memref<305x128xbf16, #tpu.memory_space<vmem>>, vector<17x128xbf16>
    tpu.vector_store %arg7[%c288, %c0_2], %2 {strides = array<i32>} : memref<305x128xbf16, #tpu.memory_space<vmem>>, vector<17x128xbf16>,
    %c0_3 = arith.constant 0 : index
    %c0_4 = arith.constant 0 : index
    %c0_5 = arith.constant 0 : index
    %4 = vector.load %arg1[%c0_3, %c0_4, %c0_5] : memref<1x256x128xbf16, #tpu.memory_space<vmem>>, vector<1x256x128xbf16>
    %5 = vector.shape_cast %4 : vector<1x256x128xbf16> to vector<256x128xbf16>
    %6 = arith.extf %5 : vector<256x128xbf16> to vector<256x128xf32>
    %c0_6 = arith.constant 0 : index
    %c0_7 = arith.constant 0 : index
    %7 = vector.load %arg2[%c0_6, %c0_7] : memref<1x128xf32, #tpu.memory_space<vmem>>, vector<1x128xf32>
    %8 = vector.broadcast %7 : vector<1x128xf32> to vector<256x128xf32>
    %9 = arith.mulf %6, %8 : vector<256x128xf32>
    %c0_8 = arith.constant 0 : index
    %c0_9 = arith.constant 0 : index
    %10 = vector.load %arg3[%c0_8, %c0_9] : memref<1x128xf32, #tpu.memory_space<vmem>>, vector<1x128xf32>
    %11 = vector.broadcast %10 : vector<1x128xf32> to vector<256x128xf32>
    %12 = arith.addf %9, %11 : vector<256x128xf32>
    %cst_10 = arith.constant 0.000000e+00 : f32
    %cst_11 = arith.constant 6.000000e+00 : f32
    %13 = vector.broadcast %cst_10 : f32 to vector<256x128xf32>
    %14 = arith.maximumf %13, %12 : vector<256x128xf32>
    %15 = vector.broadcast %cst_11 : f32 to vector<256x128xf32>
    %16 = arith.minimumf %15, %14 : vector<256x128xf32>
    %17 = arith.truncf %16 : vector<256x128xf32> to vector<256x128xbf16>
    %c32 = arith.constant 32 : index
    %c0_12 = arith.constant 0 : index
    %18 = vector.load %arg7[%c32, %c0_12] : memref<305x128xbf16, #tpu.memory_space<vmem>>, vector<256x128xbf16>
    tpu.vector_store %arg7[%c32, %c0_12], %17 {strides = array<i32>} : memref<305x128xbf16, #tpu.memory_space<vmem>>, vector<256x128xbf16>,
    %19 = tpu.iota {dimensions = array<i32: 0>} : vector<256x1xi32>
    %c16_i32 = arith.constant 16 : i32
    %c0_i32 = arith.constant 0 : i32
    %20 = arith.cmpi eq, %c16_i32, %c0_i32 : i32
    %c1_i32 = arith.constant 1 : i32
    %21 = arith.select %20, %c1_i32, %c16_i32 : i32
    %22 = vector.broadcast %21 : i32 to vector<256x1xi32>
    %23 = arith.remsi %19, %22 : vector<256x1xi32>
    %c0_i32_13 = arith.constant 0 : i32
    %24 = vector.broadcast %c0_i32_13 : i32 to vector<256x1xi32>
    %25 = arith.cmpi ne, %23, %24 : vector<256x1xi32>
    %c0_i32_14 = arith.constant 0 : i32
    %26 = vector.broadcast %c0_i32_14 : i32 to vector<256x1xi32>
    %27 = arith.cmpi slt, %23, %26 : vector<256x1xi32>
    %c0_i32_15 = arith.constant 0 : i32
    %28 = arith.cmpi slt, %21, %c0_i32_15 : i32
    %29 = vector.broadcast %28 : i1 to vector<256x1xi1>
    %30 = vector.broadcast %29 : vector<256x1xi1> to vector<256x1xi1>
    %31 = arith.xori %27, %30 : vector<256x1xi1>
    %32 = arith.andi %31, %25 : vector<256x1xi1>
    %33 = vector.broadcast %21 : i32 to vector<256x1xi32>
    %34 = arith.addi %23, %33 : vector<256x1xi32>
    %35 = arith.select %32, %34, %23 : vector<256x1xi1>, vector<256x1xi32>
    %c0_i32_16 = arith.constant 0 : i32
    %36 = vector.broadcast %c0_i32_16 : i32 to vector<256x1xi32>
    %37 = arith.cmpi ne, %35, %36 : vector<256x1xi32>
    %c15_i32 = arith.constant 15 : i32
    %38 = vector.broadcast %c15_i32 : i32 to vector<256x1xi32>
    %39 = arith.cmpi ne, %35, %38 : vector<256x1xi32>
    %c15 = arith.constant 15 : index
    %c0_17 = arith.constant 0 : index
    %40 = vector.load %arg7[%c15, %c0_17] : memref<305x128xbf16, #tpu.memory_space<vmem>>, vector<256x128xbf16>
    %cst_18 = arith.constant 0.000000e+00 : bf16
    %41 = vector.broadcast %cst_18 : bf16 to vector<256x128xbf16>
    %42 = vector.shape_cast %37 : vector<256x1xi1> to vector<256x1xi1>
    %43 = vector.broadcast %42 : vector<256x1xi1> to vector<256x128xi1>
    %44 = arith.select %43, %40, %41 : vector<256x128xi1>, vector<256x128xbf16>
    %c0_19 = arith.constant 0 : index
    %c0_20 = arith.constant 0 : index
    %45 = vector.load %arg8[%c0_19, %c0_20] : memref<256x1152xbf16, #tpu.memory_space<vmem>>, vector<256x128xbf16>
    tpu.vector_store %arg8[%c0_19, %c0_20], %44 {strides = array<i32>} : memref<256x1152xbf16, #tpu.memory_space<vmem>>, vector<256x128xbf16>,
    %c16 = arith.constant 16 : index
    %c0_21 = arith.constant 0 : index
    %46 = vector.load %arg7[%c16, %c0_21] : memref<305x128xbf16, #tpu.memory_space<vmem>>, vector<256x128xbf16>
    %c0_22 = arith.constant 0 : index
    %c128 = arith.constant 128 : index
    %47 = vector.load %arg8[%c0_22, %c128] : memref<256x1152xbf16, #tpu.memory_space<vmem>>, vector<256x128xbf16>
    tpu.vector_store %arg8[%c0_22, %c128], %46 {strides = array<i32>} : memref<256x1152xbf16, #tpu.memory_space<vmem>>, vector<256x128xbf16>,
    %c17 = arith.constant 17 : index
    %c0_23 = arith.constant 0 : index
    %48 = vector.load %arg7[%c17, %c0_23] : memref<305x128xbf16, #tpu.memory_space<vmem>>, vector<256x128xbf16>
    %cst_24 = arith.constant 0.000000e+00 : bf16
    %49 = vector.broadcast %cst_24 : bf16 to vector<256x128xbf16>
    %50 = vector.shape_cast %39 : vector<256x1xi1> to vector<256x1xi1>
    %51 = vector.broadcast %50 : vector<256x1xi1> to vector<256x128xi1>
    %52 = arith.select %51, %48, %49 : vector<256x128xi1>, vector<256x128xbf16>
    %c0_25 = arith.constant 0 : index
    %c256 = arith.constant 256 : index
    %53 = vector.load %arg8[%c0_25, %c256] : memref<256x1152xbf16, #tpu.memory_space<vmem>>, vector<256x128xbf16>
    tpu.vector_store %arg8[%c0_25, %c256], %52 {strides = array<i32>} : memref<256x1152xbf16, #tpu.memory_space<vmem>>, vector<256x128xbf16>,
    %c31 = arith.constant 31 : index
    %c0_26 = arith.constant 0 : index
    %54 = vector.load %arg7[%c31, %c0_26] : memref<305x128xbf16, #tpu.memory_space<vmem>>, vector<256x128xbf16>
    %cst_27 = arith.constant 0.000000e+00 : bf16
    %55 = vector.broadcast %cst_27 : bf16 to vector<256x128xbf16>
    %56 = vector.shape_cast %37 : vector<256x1xi1> to vector<256x1xi1>
    %57 = vector.broadcast %56 : vector<256x1xi1> to vector<256x128xi1>
    %58 = arith.select %57, %54, %55 : vector<256x128xi1>, vector<256x128xbf16>
    %c0_28 = arith.constant 0 : index
    %c384 = arith.constant 384 : index
    %59 = vector.load %arg8[%c0_28, %c384] : memref<256x1152xbf16, #tpu.memory_space<vmem>>, vector<256x128xbf16>
    tpu.vector_store %arg8[%c0_28, %c384], %58 {strides = array<i32>} : memref<256x1152xbf16, #tpu.memory_space<vmem>>, vector<256x128xbf16>,
    %c32_29 = arith.constant 32 : index
    %c0_30 = arith.constant 0 : index
    %60 = vector.load %arg7[%c32_29, %c0_30] : memref<305x128xbf16, #tpu.memory_space<vmem>>, vector<256x128xbf16>
    %c0_31 = arith.constant 0 : index
    %c512 = arith.constant 512 : index
    %61 = vector.load %arg8[%c0_31, %c512] : memref<256x1152xbf16, #tpu.memory_space<vmem>>, vector<256x128xbf16>
    tpu.vector_store %arg8[%c0_31, %c512], %60 {strides = array<i32>} : memref<256x1152xbf16, #tpu.memory_space<vmem>>, vector<256x128xbf16>,
    %c33 = arith.constant 33 : index
    %c0_32 = arith.constant 0 : index
    %62 = vector.load %arg7[%c33, %c0_32] : memref<305x128xbf16, #tpu.memory_space<vmem>>, vector<256x128xbf16>
    %cst_33 = arith.constant 0.000000e+00 : bf16
    %63 = vector.broadcast %cst_33 : bf16 to vector<256x128xbf16>
    %64 = vector.shape_cast %39 : vector<256x1xi1> to vector<256x1xi1>
    %65 = vector.broadcast %64 : vector<256x1xi1> to vector<256x128xi1>
    %66 = arith.select %65, %62, %63 : vector<256x128xi1>, vector<256x128xbf16>
    %c0_34 = arith.constant 0 : index
    %c640 = arith.constant 640 : index
    %67 = vector.load %arg8[%c0_34, %c640] : memref<256x1152xbf16, #tpu.memory_space<vmem>>, vector<256x128xbf16>
    tpu.vector_store %arg8[%c0_34, %c640], %66 {strides = array<i32>} : memref<256x1152xbf16, #tpu.memory_space<vmem>>, vector<256x128xbf16>,
    %c47 = arith.constant 47 : index
    %c0_35 = arith.constant 0 : index
    %68 = vector.load %arg7[%c47, %c0_35] : memref<305x128xbf16, #tpu.memory_space<vmem>>, vector<256x128xbf16>
    %cst_36 = arith.constant 0.000000e+00 : bf16
    %69 = vector.broadcast %cst_36 : bf16 to vector<256x128xbf16>
    %70 = vector.shape_cast %37 : vector<256x1xi1> to vector<256x1xi1>
    %71 = vector.broadcast %70 : vector<256x1xi1> to vector<256x128xi1>
    %72 = arith.select %71, %68, %69 : vector<256x128xi1>, vector<256x128xbf16>
    %c0_37 = arith.constant 0 : index
    %c768 = arith.constant 768 : index
    %73 = vector.load %arg8[%c0_37, %c768] : memref<256x1152xbf16, #tpu.memory_space<vmem>>, vector<256x128xbf16>
    tpu.vector_store %arg8[%c0_37, %c768], %72 {strides = array<i32>} : memref<256x1152xbf16, #tpu.memory_space<vmem>>, vector<256x128xbf16>,
    %c48 = arith.constant 48 : index
    %c0_38 = arith.constant 0 : index
    %74 = vector.load %arg7[%c48, %c0_38] : memref<305x128xbf16, #tpu.memory_space<vmem>>, vector<256x128xbf16>
    %c0_39 = arith.constant 0 : index
    %c896 = arith.constant 896 : index
    %75 = vector.load %arg8[%c0_39, %c896] : memref<256x1152xbf16, #tpu.memory_space<vmem>>, vector<256x128xbf16>
    tpu.vector_store %arg8[%c0_39, %c896], %74 {strides = array<i32>} : memref<256x1152xbf16, #tpu.memory_space<vmem>>, vector<256x128xbf16>,
    %c49 = arith.constant 49 : index
    %c0_40 = arith.constant 0 : index
    %76 = vector.load %arg7[%c49, %c0_40] : memref<305x128xbf16, #tpu.memory_space<vmem>>, vector<256x128xbf16>
    %cst_41 = arith.constant 0.000000e+00 : bf16
    %77 = vector.broadcast %cst_41 : bf16 to vector<256x128xbf16>
    %78 = vector.shape_cast %39 : vector<256x1xi1> to vector<256x1xi1>
    %79 = vector.broadcast %78 : vector<256x1xi1> to vector<256x128xi1>
    %80 = arith.select %79, %76, %77 : vector<256x128xi1>, vector<256x128xbf16>
    %c0_42 = arith.constant 0 : index
    %c1024 = arith.constant 1024 : index
    %81 = vector.load %arg8[%c0_42, %c1024] : memref<256x1152xbf16, #tpu.memory_space<vmem>>, vector<256x128xbf16>
    tpu.vector_store %arg8[%c0_42, %c1024], %80 {strides = array<i32>} : memref<256x1152xbf16, #tpu.memory_space<vmem>>, vector<256x128xbf16>,
    %c0_43 = arith.constant 0 : index
    %c0_44 = arith.constant 0 : index
    %82 = vector.load %arg8[%c0_43, %c0_44] : memref<256x1152xbf16, #tpu.memory_space<vmem>>, vector<256x1152xbf16>
    %c0_45 = arith.constant 0 : index
    %c0_46 = arith.constant 0 : index
    %83 = vector.load %arg4[%c0_45, %c0_46] : memref<1152x128xbf16, #tpu.memory_space<vmem>>, vector<1152x128xbf16>
    %cst_47 = arith.constant dense<0.000000e+00> : vector<256x128xf32>
    %84 = tpu.matmul %82, %83, %cst_47 {dimension_numbers = #tpu.dot_dimension_numbers<[1], [0], [0], [1], [0, 0, 1, 1], [], []>} : vector<256x1152xbf16>, vector<1152x128xbf16>, vector<256x128xf32> -> vector<256x128xf32>
    %85 = arith.truncf %84 : vector<256x128xf32> to vector<256x128xbf16>
    %c0_48 = arith.constant 0 : index
    %c0_49 = arith.constant 0 : index
    %c0_50 = arith.constant 0 : index
    %86 = vector.load %arg5[%c0_48, %c0_49, %c0_50] : memref<1x256x128xbf16, #tpu.memory_space<vmem>>, vector<1x256x128xbf16>
    %87 = vector.shape_cast %86 : vector<1x256x128xbf16> to vector<256x128xbf16>
    %88 = vector.shape_cast %85 : vector<256x128xbf16> to vector<1x256x128xbf16>
    tpu.vector_store %arg5[%c0_48, %c0_49, %c0_50], %88 {strides = array<i32>} : memref<1x256x128xbf16, #tpu.memory_space<vmem>>, vector<1x256x128xbf16>,
    %cst_51 = arith.constant dense<0.000000e+00> : vector<128xf32>
    %89 = vector.multi_reduction <add>, %84, %cst_51 [0] : vector<256x128xf32> to vector<128xf32>
    %90 = vector.shape_cast %89 : vector<128xf32> to vector<1x128xf32>
    %91 = arith.mulf %84, %84 : vector<256x128xf32>
    %cst_52 = arith.constant dense<0.000000e+00> : vector<128xf32>
    %92 = vector.multi_reduction <add>, %91, %cst_52 [0] : vector<256x128xf32> to vector<128xf32>
    %93 = vector.shape_cast %92 : vector<128xf32> to vector<1x128xf32>
    %94 = tpu.concatenate %90, %93 in 0 : vector<1x128xf32>, vector<1x128xf32> -> vector<2x128xf32>
    %c0_53 = arith.constant 0 : index
    %c0_54 = arith.constant 0 : index
    %c0_55 = arith.constant 0 : index
    %95 = vector.load %arg6[%c0_53, %c0_54, %c0_55] : memref<1x2x128xf32, #tpu.memory_space<vmem>>, vector<1x2x128xf32>
    %96 = vector.shape_cast %95 : vector<1x2x128xf32> to vector<2x128xf32>
    %97 = vector.shape_cast %94 : vector<2x128xf32> to vector<1x2x128xf32>
    tpu.vector_store %arg6[%c0_53, %c0_54, %c0_55], %97 {strides = array<i32>} : memref<1x2x128xf32, #tpu.memory_space<vmem>>, vector<1x2x128xf32>,
    return
  }
  func.func @transform_0(%arg0: i32) -> (i32, i32, i32) {
    %c0_i32 = arith.constant 0 : i32
    %c0_i32_0 = arith.constant 0 : i32
    %c0_i32_1 = arith.constant 0 : i32
    return %arg0, %c0_i32, %c0_i32_0 : i32, i32, i32
  }
  func.func @transform_1(%arg0: i32) -> (i32, i32) {
    %c0_i32 = arith.constant 0 : i32
    %c0_i32_0 = arith.constant 0 : i32
    %c0_i32_1 = arith.constant 0 : i32
    return %c0_i32, %c0_i32_0 : i32, i32
  }
  func.func @transform_2(%arg0: i32) -> (i32, i32) {
    %c0_i32 = arith.constant 0 : i32
    %c0_i32_0 = arith.constant 0 : i32
    %c0_i32_1 = arith.constant 0 : i32
    return %c0_i32, %c0_i32_0 : i32, i32
  }
  func.func @transform_3(%arg0: i32) -> (i32, i32) {
    %c0_i32 = arith.constant 0 : i32
    %c0_i32_0 = arith.constant 0 : i32
    %c0_i32_1 = arith.constant 0 : i32
    return %c0_i32, %c0_i32_0 : i32, i32
  }
  func.func @transform_4(%arg0: i32) -> (i32, i32, i32) {
    %c0_i32 = arith.constant 0 : i32
    %c0_i32_0 = arith.constant 0 : i32
    %c0_i32_1 = arith.constant 0 : i32
    return %arg0, %c0_i32, %c0_i32_0 : i32, i32, i32
  }
  func.func @transform_5(%arg0: i32) -> (i32, i32, i32) {
    %c0_i32 = arith.constant 0 : i32
    %c0_i32_0 = arith.constant 0 : i32
    %c0_i32_1 = arith.constant 0 : i32
    return %arg0, %c0_i32, %c0_i32_0 : i32, i32, i32
  }
}

module attributes {stable_mosaic.version = 11 : i64} {
  func.func @_bn_act_res_kernel(%arg0: i32, %arg1: memref<64x128xf32, #tpu.memory_space<vmem>>, %arg2: memref<1x128xf32, #tpu.memory_space<vmem>>, %arg3: memref<1x128xf32, #tpu.memory_space<vmem>>, %arg4: memref<64x128xf32, #tpu.memory_space<vmem>>, %arg5: memref<64x128xf32, #tpu.memory_space<vmem>>) attributes {dimension_semantics = [#tpu.dimension_semantics<parallel>], iteration_bounds = array<i64: 8>, scalar_prefetch = 0 : i64, scratch_operands = 0 : i64, tpu.core_type = #tpu.core_type<tc>, window_params = [{transform_indices = @transform_0, window_bounds = array<i64: 64, 128>}, {pipeline_mode = #tpu.pipeline_mode<synchronous>, transform_indices = @transform_1, window_bounds = array<i64: 1, 128>}, {pipeline_mode = #tpu.pipeline_mode<synchronous>, transform_indices = @transform_2, window_bounds = array<i64: 1, 128>}, {transform_indices = @transform_3, window_bounds = array<i64: 64, 128>}, {transform_indices = @transform_4, window_bounds = array<i64: 64, 128>}]} {
    %c0 = arith.constant 0 : index
    %c0_0 = arith.constant 0 : index
    %0 = vector.load %arg1[%c0, %c0_0] : memref<64x128xf32, #tpu.memory_space<vmem>>, vector<64x128xf32>
    %c0_1 = arith.constant 0 : index
    %c0_2 = arith.constant 0 : index
    %1 = vector.load %arg2[%c0_1, %c0_2] : memref<1x128xf32, #tpu.memory_space<vmem>>, vector<1x128xf32>
    %2 = vector.broadcast %1 : vector<1x128xf32> to vector<64x128xf32>
    %3 = arith.mulf %0, %2 : vector<64x128xf32>
    %c0_3 = arith.constant 0 : index
    %c0_4 = arith.constant 0 : index
    %4 = vector.load %arg3[%c0_3, %c0_4] : memref<1x128xf32, #tpu.memory_space<vmem>>, vector<1x128xf32>
    %5 = vector.broadcast %4 : vector<1x128xf32> to vector<64x128xf32>
    %6 = arith.addf %3, %5 : vector<64x128xf32>
    %cst = arith.constant 0.000000e+00 : f32
    %cst_5 = arith.constant 6.000000e+00 : f32
    %7 = vector.broadcast %cst : f32 to vector<64x128xf32>
    %8 = arith.maximumf %7, %6 : vector<64x128xf32>
    %9 = vector.broadcast %cst_5 : f32 to vector<64x128xf32>
    %10 = arith.minimumf %9, %8 : vector<64x128xf32>
    %c0_6 = arith.constant 0 : index
    %c0_7 = arith.constant 0 : index
    %11 = vector.load %arg4[%c0_6, %c0_7] : memref<64x128xf32, #tpu.memory_space<vmem>>, vector<64x128xf32>
    %12 = arith.addf %10, %11 : vector<64x128xf32>
    %c0_8 = arith.constant 0 : index
    %c0_9 = arith.constant 0 : index
    %13 = vector.load %arg5[%c0_8, %c0_9] : memref<64x128xf32, #tpu.memory_space<vmem>>, vector<64x128xf32>
    tpu.vector_store %arg5[%c0_8, %c0_9], %12 {strides = array<i32>} : memref<64x128xf32, #tpu.memory_space<vmem>>, vector<64x128xf32>,
    return
  }
  func.func @transform_0(%arg0: i32) -> (i32, i32) {
    %c0_i32 = arith.constant 0 : i32
    %c0_i32_0 = arith.constant 0 : i32
    return %arg0, %c0_i32 : i32, i32
  }
  func.func @transform_1(%arg0: i32) -> (i32, i32) {
    %c0_i32 = arith.constant 0 : i32
    %c0_i32_0 = arith.constant 0 : i32
    %c0_i32_1 = arith.constant 0 : i32
    return %c0_i32, %c0_i32_0 : i32, i32
  }
  func.func @transform_2(%arg0: i32) -> (i32, i32) {
    %c0_i32 = arith.constant 0 : i32
    %c0_i32_0 = arith.constant 0 : i32
    %c0_i32_1 = arith.constant 0 : i32
    return %c0_i32, %c0_i32_0 : i32, i32
  }
  func.func @transform_3(%arg0: i32) -> (i32, i32) {
    %c0_i32 = arith.constant 0 : i32
    %c0_i32_0 = arith.constant 0 : i32
    return %arg0, %c0_i32 : i32, i32
  }
  func.func @transform_4(%arg0: i32) -> (i32, i32) {
    %c0_i32 = arith.constant 0 : i32
    %c0_i32_0 = arith.constant 0 : i32
    return %arg0, %c0_i32 : i32, i32
  }
}

module attributes {stable_mosaic.version = 11 : i64} {
  func.func @_conv1x1_bn_stats_kernel(%arg0: i32, %arg1: memref<64x128xbf16, #tpu.memory_space<vmem>>, %arg2: memref<1x128xf32, #tpu.memory_space<vmem>>, %arg3: memref<1x128xf32, #tpu.memory_space<vmem>>, %arg4: memref<128x128xbf16, #tpu.memory_space<vmem>>, %arg5: memref<64x128xf32, #tpu.memory_space<vmem>>, %arg6: memref<1x2x128xf32, #tpu.memory_space<vmem>>) attributes {dimension_semantics = [#tpu.dimension_semantics<parallel>], iteration_bounds = array<i64: 8>, scalar_prefetch = 0 : i64, scratch_operands = 0 : i64, tpu.core_type = #tpu.core_type<tc>, window_params = [{transform_indices = @transform_0, window_bounds = array<i64: 64, 128>}, {pipeline_mode = #tpu.pipeline_mode<synchronous>, transform_indices = @transform_1, window_bounds = array<i64: 1, 128>}, {pipeline_mode = #tpu.pipeline_mode<synchronous>, transform_indices = @transform_2, window_bounds = array<i64: 1, 128>}, {pipeline_mode = #tpu.pipeline_mode<synchronous>, transform_indices = @transform_3, window_bounds = array<i64: 128, 128>}, {transform_indices = @transform_4, window_bounds = array<i64: 64, 128>}, {transform_indices = @transform_5, window_bounds = array<i64: 1, 2, 128>}]} {
    %c0 = arith.constant 0 : index
    %c0_0 = arith.constant 0 : index
    %0 = vector.load %arg1[%c0, %c0_0] : memref<64x128xbf16, #tpu.memory_space<vmem>>, vector<64x128xbf16>
    %1 = arith.extf %0 : vector<64x128xbf16> to vector<64x128xf32>
    %c0_1 = arith.constant 0 : index
    %c0_2 = arith.constant 0 : index
    %2 = vector.load %arg2[%c0_1, %c0_2] : memref<1x128xf32, #tpu.memory_space<vmem>>, vector<1x128xf32>
    %3 = vector.broadcast %2 : vector<1x128xf32> to vector<64x128xf32>
    %4 = arith.mulf %1, %3 : vector<64x128xf32>
    %c0_3 = arith.constant 0 : index
    %c0_4 = arith.constant 0 : index
    %5 = vector.load %arg3[%c0_3, %c0_4] : memref<1x128xf32, #tpu.memory_space<vmem>>, vector<1x128xf32>
    %6 = vector.broadcast %5 : vector<1x128xf32> to vector<64x128xf32>
    %7 = arith.addf %4, %6 : vector<64x128xf32>
    %cst = arith.constant 0.000000e+00 : f32
    %cst_5 = arith.constant 6.000000e+00 : f32
    %8 = vector.broadcast %cst : f32 to vector<64x128xf32>
    %9 = arith.maximumf %8, %7 : vector<64x128xf32>
    %10 = vector.broadcast %cst_5 : f32 to vector<64x128xf32>
    %11 = arith.minimumf %10, %9 : vector<64x128xf32>
    %12 = arith.truncf %11 : vector<64x128xf32> to vector<64x128xbf16>
    %c0_6 = arith.constant 0 : index
    %c0_7 = arith.constant 0 : index
    %13 = vector.load %arg4[%c0_6, %c0_7] : memref<128x128xbf16, #tpu.memory_space<vmem>>, vector<128x128xbf16>
    %cst_8 = arith.constant dense<0.000000e+00> : vector<64x128xf32>
    %14 = tpu.matmul %12, %13, %cst_8 {dimension_numbers = #tpu.dot_dimension_numbers<[1], [0], [0], [1], [0, 0, 1, 1], [], []>} : vector<64x128xbf16>, vector<128x128xbf16>, vector<64x128xf32> -> vector<64x128xf32>
    %c0_9 = arith.constant 0 : index
    %c0_10 = arith.constant 0 : index
    %15 = vector.load %arg5[%c0_9, %c0_10] : memref<64x128xf32, #tpu.memory_space<vmem>>, vector<64x128xf32>
    tpu.vector_store %arg5[%c0_9, %c0_10], %14 {strides = array<i32>} : memref<64x128xf32, #tpu.memory_space<vmem>>, vector<64x128xf32>,
    %cst_11 = arith.constant dense<0.000000e+00> : vector<128xf32>
    %16 = vector.multi_reduction <add>, %14, %cst_11 [0] : vector<64x128xf32> to vector<128xf32>
    %17 = vector.shape_cast %16 : vector<128xf32> to vector<1x128xf32>
    %18 = arith.mulf %14, %14 : vector<64x128xf32>
    %cst_12 = arith.constant dense<0.000000e+00> : vector<128xf32>
    %19 = vector.multi_reduction <add>, %18, %cst_12 [0] : vector<64x128xf32> to vector<128xf32>
    %20 = vector.shape_cast %19 : vector<128xf32> to vector<1x128xf32>
    %21 = tpu.concatenate %17, %20 in 0 : vector<1x128xf32>, vector<1x128xf32> -> vector<2x128xf32>
    %c0_13 = arith.constant 0 : index
    %c0_14 = arith.constant 0 : index
    %c0_15 = arith.constant 0 : index
    %22 = vector.load %arg6[%c0_13, %c0_14, %c0_15] : memref<1x2x128xf32, #tpu.memory_space<vmem>>, vector<1x2x128xf32>
    %23 = vector.shape_cast %22 : vector<1x2x128xf32> to vector<2x128xf32>
    %24 = vector.shape_cast %21 : vector<2x128xf32> to vector<1x2x128xf32>
    tpu.vector_store %arg6[%c0_13, %c0_14, %c0_15], %24 {strides = array<i32>} : memref<1x2x128xf32, #tpu.memory_space<vmem>>, vector<1x2x128xf32>,
    return
  }
  func.func @transform_0(%arg0: i32) -> (i32, i32) {
    %c0_i32 = arith.constant 0 : i32
    %c0_i32_0 = arith.constant 0 : i32
    return %arg0, %c0_i32 : i32, i32
  }
  func.func @transform_1(%arg0: i32) -> (i32, i32) {
    %c0_i32 = arith.constant 0 : i32
    %c0_i32_0 = arith.constant 0 : i32
    %c0_i32_1 = arith.constant 0 : i32
    return %c0_i32, %c0_i32_0 : i32, i32
  }
  func.func @transform_2(%arg0: i32) -> (i32, i32) {
    %c0_i32 = arith.constant 0 : i32
    %c0_i32_0 = arith.constant 0 : i32
    %c0_i32_1 = arith.constant 0 : i32
    return %c0_i32, %c0_i32_0 : i32, i32
  }
  func.func @transform_3(%arg0: i32) -> (i32, i32) {
    %c0_i32 = arith.constant 0 : i32
    %c0_i32_0 = arith.constant 0 : i32
    %c0_i32_1 = arith.constant 0 : i32
    return %c0_i32, %c0_i32_0 : i32, i32
  }
  func.func @transform_4(%arg0: i32) -> (i32, i32) {
    %c0_i32 = arith.constant 0 : i32
    %c0_i32_0 = arith.constant 0 : i32
    return %arg0, %c0_i32 : i32, i32
  }
  func.func @transform_5(%arg0: i32) -> (i32, i32, i32) {
    %c0_i32 = arith.constant 0 : i32
    %c0_i32_0 = arith.constant 0 : i32
    %c0_i32_1 = arith.constant 0 : i32
    return %arg0, %c0_i32, %c0_i32_0 : i32, i32, i32
  }
}

</mosaic_0001>

<bundles_post_ra>
// kernel: block_for_stride_one.4
= control target key start
LH: loop header
LB: loop body
LE: loop exit
PB: predicated region body
PF: predicated region fallthrough
CT: control target
= control target key end

     0   :  { %s710_s18 = smov 0   ;;  %s773_s0 = inlined_call_operand.vmem [shape: f32[512,128], index: 0, kind: input, shape index: {}]   ;;  %s774_s1 = inlined_call_operand.vmem [shape: f32[1,128], index: 1, kind: input, shape index: {}]   ;;  %s775_s2 = inlined_call_operand.vmem [shape: f32[1,128], index: 2, kind: input, shape index: {}]   ;;  %s776_s3 = inlined_call_operand.vmem [shape: bf16[128,128], index: 3, kind: input, shape index: {}]   ;;  %s777_s4 = inlined_call_operand.vmem [shape: bf16[512,128], index: 4, kind: output, shape index: {0}]   ;;  %s778_s5 = inlined_call_operand.vmem [shape: f32[8,2,128], index: 5, kind: output, shape index: {1}]  }
   0x1 LB: > { %s716_s1 = sadd.s32 4294967295, %s678_s18   ;;  %p549_p0 = scmp.ge.s32.totalorder %s678_s18, 1  ;;  %s678_s18 = sphi %s710_s18, %s16_s18  }
   0x2   : > { %p191_p1 = scmp.lt.s32.totalorder %s678_s18, 9 }
   0x4   : > { %p192_p2 = pnand %p549_p0, %p191_p1 }
   0x5   : > { %v664_v0 = vld [vmem:[%s776_s3] sm:$0xff] (!%p192_p2)   ;;  %s550_s20 = sshll.u32 (!%p192_p2), %s716_s1, 3  ;;  %v665_v1 = vld [vmem:[%s776_s3 + $0x8] sm:$0xff] (!%p192_p2)   ;;  %v666_v2 = vld [vmem:[%s776_s3 + $0x10] sm:$0xff] (!%p192_p2)   ;;  %p235_p4 = scmp.lt.s32.totalorder (!%p192_p2), %s716_s1, 7  ;;  %vm455_vm0 = vcmask (!%p192_p2), 1040384  }
   0x6   : > { %195 = sbr.rel (%p192_p2) target bundleno = 283 (0x11b), region = 36  ;;  %p224_p3 = scmp.lt.s32.totalorder (!%p192_p2), %s550_s20, 63  ;;  %616 = vmatprep.subr.bf16.mxu0 (!%p192_p2), %v664_v0  ;;  %640 = vmatprep.subr.bf16.mxu1 (!%p192_p2), %v664_v0  ;;  %v667_v3 = vld [vmem:[%s776_s3 + $0x18] sm:$0xff] (!%p192_p2)   ;;  %v668_v10 = vld [vmem:[%s776_s3 + $0x20] sm:$0xff] (!%p192_p2)   ;;  %v669_v11 = vld [vmem:[%s776_s3 + $0x28] sm:$0xff] (!%p192_p2)  }
   0x7   : > { %617 = vmatpush3.bf16.msra.mxu0 (!%p192_p2), %v664_v0  ;;  %648 = vmatpush3.bf16.msra.mxu1 (!%p192_p2), %v664_v0  ;;  %v670_v12 = vld [vmem:[%s776_s3 + $0x30] sm:$0xff] (!%p192_p2)   ;;  %v671_v13 = vld [vmem:[%s776_s3 + $0x38] sm:$0xff] (!%p192_p2)  }
   0x8   : > { %618 = vmatprep.subr.bf16.mxu0 (!%p192_p2), %v665_v1  ;;  %641 = vmatprep.subr.bf16.mxu1 (!%p192_p2), %v665_v1 }
   0xb   : > { %619 = vmatpush3.bf16.msra.mxu0 (!%p192_p2), %v665_v1  ;;  %649 = vmatpush3.bf16.msra.mxu1 (!%p192_p2), %v665_v1 }
   0xc   : > { %620 = vmatprep.subr.bf16.mxu0 (!%p192_p2), %v666_v2  ;;  %642 = vmatprep.subr.bf16.mxu1 (!%p192_p2), %v666_v2 }
   0xd   : > { %s780_s20 = smov (!%p224_p3, %s550_s20), 63  ;;  %s782_s1 = smov (!%p235_p4, %s716_s1), 7 }
   0xe   : > { %s551_s25 = sshll.u32 %s780_s20, 3  ;;  %s553_s14 = sshll.u32 %s780_s20, 2 }
   0xf   : > { %s736_s28 = scalar_lea.vmem %s773_s0, %s551_s25  ;;  %621 = vmatpush3.bf16.msra.mxu0 %v666_v2  ;;  %650 = vmatpush3.bf16.msra.mxu1 %v666_v2  ;;  %s233_s17 = scalar_lea.vmem %s777_s4, %s553_s14 }
  0x10   : > { %v240_v4 = vld [vmem:[%s736_s28] sm:$0xff]  ;;  %v241_v5 = vld [vmem:[%s736_s28 + $0x8] sm:$0xff]  ;;  %622 = vmatprep.subr.bf16.mxu0 %v667_v3  ;;  %643 = vmatprep.subr.bf16.mxu1 %v667_v3  ;;  %v242_v14 = vld [vmem:[%s736_s28 + $0x10] sm:$0xff]  ;;  %s554_s2 = sshll.u32 %s782_s1, 1 }
  0x11   : > { %v248_v6 = vpack.c.bf16 %v241_v5, %v240_v4  ;;  %v244_v7 = vld [vmem:[%s736_s28 + $0x20] sm:$0xff]  ;;  %v245_v8 = vld [vmem:[%s736_s28 + $0x28] sm:$0xff]  ;;  %v243_v15 = vld [vmem:[%s736_s28 + $0x18] sm:$0xff]  ;;  %s238_s21 = scalar_lea.vmem %s778_s5, %s554_s2 }
  0x12   : > { %v250_v9 = vpack.c.bf16 %v245_v8, %v244_v7  ;;  %v246_v16 = vld [vmem:[%s736_s28 + $0x30] sm:$0xff]  ;;  %v247_v17 = vld [vmem:[%s736_s28 + $0x38] sm:$0xff]  ;;  %v249_v18 = vpack.c.bf16 %v243_v15, %v242_v14 }
  0x13   : > { %632 = vmatprep.mubr.bf16.mxu0 %v248_v6  ;;  %623 = vmatpush3.bf16.msra.mxu0 %v667_v3  ;;  %v251_v19 = vpack.c.bf16 %v247_v17, %v246_v16 }
  0x14   : > { %636 = vmatprep.mubr.bf16.mxu1 %v250_v9  ;;  %651 = vmatpush3.bf16.msra.mxu1 %v667_v3 }
  0x15   : > { %624 = vmatprep.subr.bf16.mxu0 %v668_v10  ;;  %644 = vmatprep.subr.bf16.mxu1 %v668_v10 }
  0x17   : > { %625 = vmatpush3.bf16.msra.mxu0 %v668_v10 }
  0x18   : > { %652 = vmatpush3.bf16.msra.mxu1 %v668_v10  ;;  %626 = vmatprep.subr.bf16.mxu0 %v669_v11 }
  0x19   : > { %645 = vmatprep.subr.bf16.mxu1 %v669_v11 }
  0x1b   : > { %627 = vmatpush3.bf16.msra.mxu0 %v669_v11 }
  0x1c   : > { %653 = vmatpush3.bf16.msra.mxu1 %v669_v11  ;;  %628 = vmatprep.subr.bf16.mxu0 %v670_v12 }
  0x1d   : > { %646 = vmatprep.subr.bf16.mxu1 %v670_v12 }
  0x1f   : > { %629 = vmatpush3.bf16.msra.mxu0 %v670_v12 }
  0x20   : > { %654 = vmatpush3.bf16.msra.mxu1 %v670_v12  ;;  %630 = vmatprep.subr.bf16.mxu0 %v671_v13 }
  0x21   : > { %647 = vmatprep.subr.bf16.mxu1 %v671_v13 }
  0x23   : > { %631 = vmatpush3.bf16.msra.mxu0 %v671_v13 }
  0x24   : > { %655 = vmatpush3.bf16.msra.mxu1 %v671_v13 }
  0x26   : > { %633 = vmatmul.mubr.bf16.vlgmr.msra.gmra.mrb[0].mxu0 %v249_v18 }
  0x27   : > { %637 = vmatmul.mubr.bf16.vlgmr.msra.gmra.mrb[0].mxu1 %v251_v19 }
  0xf9   : > { %v634_v20 = vpop.f32.mrb[0].mxu0 }
  0xfa   : > { %v638_v21 = vpop.f32.mrb[0].mxu1  ;;  %v350_v22 = vpop.f32.mrb[1].mxu0  ;;  %v436_v35 = vmul.f32 %v634_v20, %v634_v20 }
  0xfb   : > { %v366_v23 = vpop.f32.mrb[1].mxu1  ;;  %v635_v24 = vpop.f32.mrb[2].mxu0  ;;  %v434_v26 = vmul.f32 %v350_v22, %v350_v22  ;;  %v440_v47 = vmul.f32 %v638_v21, %v638_v21 }
  0xfc   : > { %v639_v25 = vpop.f32.mrb[2].mxu1  ;;  %v589_v27 = vpack.c.bf16 %v635_v24, %v634_v20  ;;  %v353_v28 = vpop.f32.mrb[3].mxu0  ;;  %v437_v38 = vmul.f32 %v635_v24, %v635_v24  ;;  %v438_v41 = vmul.f32 %v366_v23, %v366_v23 }
  0xfd   : > { %v599_v29 = vpack.c.bf16 %v639_v25, %v638_v21  ;;  %v369_v30 = vpop.f32.mrb[3].mxu1  ;;  %v584_v31 = vpack.c.bf16 %v353_v28, %v350_v22  ;;  %v421_v32 = vadd.f32 %v353_v28, %v350_v22  ;;  %v435_v33 = vmul.f32 %v353_v28, %v353_v28 }
  0xfe   : > { %v594_v34 = vpack.c.bf16 %v369_v30, %v366_v23  ;;  %601 = vst [vmem:[%s233_s17 + $0x8] sm:$0xff] %v589_v27   ;;  %v439_v46 = vmul.f32 %v369_v30, %v369_v30  ;;  %v441_v50 = vmul.f32 %v639_v25, %v639_v25 }
  0xff   : > { %603 = vst [vmem:[%s233_s17 + $0x18] sm:$0xff] %v599_v29   ;;  %585 = vst [vmem:[%s233_s17] sm:$0xff] %v584_v31   ;;  %v422_v36 = vadd.f32 %v634_v20, %v421_v32  ;;  %v442_v37 = vadd.f32 %v435_v33, %v434_v26 }
 0x100   : > { %602 = vst [vmem:[%s233_s17 + $0x10] sm:$0xff] %v594_v34  }
 0x101   : > { %v443_v39 = vadd.f32 %v442_v37, %v436_v35  ;;  %v423_v40 = vadd.f32 %v635_v24, %v422_v36 }
 0x103   : > { %v424_v42 = vadd.f32 %v423_v40, %v366_v23  ;;  %v444_v43 = vadd.f32 %v443_v39, %v437_v38 }
 0x105   : > { %v445_v44 = vadd.f32 %v444_v43, %v438_v41  ;;  %v425_v45 = vadd.f32 %v424_v42, %v369_v30 }
 0x107   : > { %v426_v48 = vadd.f32 %v638_v21, %v425_v45  ;;  %v446_v49 = vadd.f32 %v445_v44, %v439_v46 }
 0x109   : > { %v427_v51 = vadd.f32 %v639_v25, %v426_v48  ;;  %v447_v52 = vadd.f32 %v446_v49, %v440_v47 }
 0x10b   : > { %v428_v53 = vrot.slane %v427_v51, 4  ;;  %v448_v54 = vadd.f32 %v447_v52, %v441_v50 }
 0x10d   : > { %v429_v55 = vadd.f32 %v428_v53, %v427_v51  ;;  %v449_v56 = vrot.slane %v448_v54, 4 }
 0x10f   : > { %v430_v57 = vrot.slane %v429_v55, 2  ;;  %v450_v58 = vadd.f32 %v449_v56, %v448_v54 }
 0x111   : > { %v431_v59 = vadd.f32 %v430_v57, %v429_v55  ;;  %v451_v60 = vrot.slane %v450_v58, 2 }
 0x113   : > { %v432_v61 = vrot.slane %v431_v59, 1  ;;  %v452_v62 = vadd.f32 %v451_v60, %v450_v58 }
 0x115   : > { %v453_v63 = vrot.slane %v452_v62, 1  ;;  %v433_v0 = vadd.f32 %v432_v61, %v431_v59 }
 0x117   : > { %v454_v1 = vadd.f32 %v453_v63, %v452_v62 }
 0x119   : > { %v456_v2 = vsel %vm455_vm0, %v433_v0, %v454_v1 }
 0x11a   : > { %457 = vst [vmem:[%s238_s21] sm:$0x3] %v456_v2 }
 0x11b PF: > { %s16_s18 = sadd.s32 1, %s678_s18  }
 0x11c   : > { %p13_p5 = scmp.ge.s32.totalorder %s16_s18, 10  }
 0x11e   :  { %15 = sbr.rel (!%p13_p5) target bundleno = 1 (0x1), region = 78 }

// kernel: block_for_stride_one.7
= control target key start
LH: loop header
LB: loop body
LE: loop exit
PB: predicated region body
PF: predicated region fallthrough
CT: control target
= control target key end

     0   :  { %s425_s15 = smov 0   ;;  %s476_s0 = inlined_call_operand.vmem [shape: f32[512,128], index: 0, kind: input, shape index: {}]   ;;  %s477_s1 = inlined_call_operand.vmem [shape: f32[1,128], index: 1, kind: input, shape index: {}]   ;;  %s478_s2 = inlined_call_operand.vmem [shape: f32[1,128], index: 2, kind: input, shape index: {}]   ;;  %s479_s3 = inlined_call_operand.vmem [shape: f32[512,128], index: 3, kind: input, shape index: {}]   ;;  %s480_s4 = inlined_call_operand.vmem [shape: f32[512,128], index: 4, kind: output, shape index: {}]  }
   0x1 LB: > { %s369_s16 = sadd.s32 4294967295, %s398_s15   ;;  %p373_p0 = scmp.ge.s32.totalorder %s398_s15, 1  ;;  %s398_s15 = sphi %s425_s15, %s14_s15  }
   0x2   : > { %p174_p1 = scmp.lt.s32.totalorder %s398_s15, 9 }
   0x4   : > { %p175_p2 = pnand %p373_p0, %p174_p1 }
   0x5   : > { %s374_s17 = sshll.u32 (!%p175_p2), %s369_s16, 3  ;;  %v380_v0 = vld [vmem:[%s477_s1] ss:$0 sm:$0xff] (!%p175_p2) }
   0x6   : > { %178 = sbr.rel (%p175_p2) target bundleno = 31 (0x1f), region = 36  ;;  %p206_p3 = scmp.lt.s32.totalorder (!%p175_p2), %s374_s17, 63  ;;  %v381_v2 = vld [vmem:[%s478_s2] ss:$0 sm:$0xff] (!%p175_p2) }
   0xd   : > { %s482_s17 = smov (!%p206_p3, %s374_s17), 63 }
   0xe   : > { %s433_s18 = sshll.u32 %s482_s17, 3 }
   0xf   : > { %s209_s23 = scalar_lea.vmem %s476_s0, %s433_s18  ;;  %s449_s28 = scalar_lea.vmem %s479_s3, %s433_s18 }
  0x10   : > { %v223_v1 = vld [vmem:[%s209_s23] sm:$0xff]  ;;  %v224_v3 = vld [vmem:[%s209_s23 + $0x8] sm:$0xff]  ;;  %v225_v6 = vld [vmem:[%s209_s23 + $0x10] sm:$0xff]  ;;  %s458_s5 = scalar_lea.vmem %s480_s4, %s433_s18 }
  0x11   : > { %v238_v4 = vmul.f32 %v380_v0, %v223_v1  ;;  %v239_v5 = vmul.f32 %v380_v0, %v224_v3  ;;  %v240_v7 = vmul.f32 %v380_v0, %v225_v6  ;;  %v226_v8 = vld [vmem:[%s209_s23 + $0x18] sm:$0xff]  ;;  %v227_v9 = vld [vmem:[%s209_s23 + $0x20] sm:$0xff]  ;;  %v228_v14 = vld [vmem:[%s209_s23 + $0x28] sm:$0xff] }
  0x12   : > { %v241_v12 = vmul.f32 %v380_v0, %v226_v8  ;;  %v242_v13 = vmul.f32 %v380_v0, %v227_v9  ;;  %v243_v16 = vmul.f32 %v380_v0, %v228_v14  ;;  %v229_v17 = vld [vmem:[%s209_s23 + $0x30] sm:$0xff]  ;;  %v230_v18 = vld [vmem:[%s209_s23 + $0x38] sm:$0xff]  ;;  %v277_v23 = vld [vmem:[%s449_s28] sm:$0xff] }
  0x13   : > { %v253_v10 = vadd.f32 %v381_v2, %v238_v4  ;;  %v254_v11 = vadd.f32 %v381_v2, %v239_v5  ;;  %v255_v15 = vadd.f32 %v381_v2, %v240_v7  ;;  %v278_v24 = vld [vmem:[%s449_s28 + $0x8] sm:$0xff]  ;;  %v244_v27 = vmul.f32 %v380_v0, %v229_v17  ;;  %v279_v31 = vld [vmem:[%s449_s28 + $0x10] sm:$0xff]  ;;  %v280_v35 = vld [vmem:[%s449_s28 + $0x18] sm:$0xff] }
  0x14   : > { %v256_v21 = vadd.f32 %v381_v2, %v241_v12  ;;  %v257_v22 = vadd.f32 %v381_v2, %v242_v13  ;;  %v258_v26 = vadd.f32 %v381_v2, %v243_v16  ;;  %v245_v28 = vmul.f32 %v380_v0, %v230_v18  ;;  %v281_v36 = vld [vmem:[%s449_s28 + $0x20] sm:$0xff]  ;;  %v282_v44 = vld [vmem:[%s449_s28 + $0x28] sm:$0xff]  ;;  %v283_v51 = vld [vmem:[%s449_s28 + $0x30] sm:$0xff] }
  0x15   : > { %v261_v19 = vmax.f32 %v253_v10, 0.0  ;;  %v262_v20 = vmax.f32 %v254_v11, 0.0  ;;  %v263_v25 = vmax.f32 %v255_v15, 0.0  ;;  %v259_v38 = vadd.f32 %v381_v2, %v244_v27  ;;  %v284_v52 = vld [vmem:[%s449_s28 + $0x38] sm:$0xff] }
  0x16   : > { %v264_v32 = vmax.f32 %v256_v21, 0.0  ;;  %v265_v33 = vmax.f32 %v257_v22, 0.0  ;;  %v266_v37 = vmax.f32 %v258_v26, 0.0  ;;  %v260_v39 = vadd.f32 %v381_v2, %v245_v28 }
  0x17   : > { %v269_v29 = vmin.f32 %v261_v19, 6.0  ;;  %v270_v30 = vmin.f32 %v262_v20, 6.0  ;;  %v271_v34 = vmin.f32 %v263_v25, 6.0  ;;  %v267_v47 = vmax.f32 %v259_v38, 0.0 }
  0x18   : > { %v272_v42 = vmin.f32 %v264_v32, 6.0  ;;  %v273_v43 = vmin.f32 %v265_v33, 6.0  ;;  %v274_v46 = vmin.f32 %v266_v37, 6.0  ;;  %v268_v48 = vmax.f32 %v260_v39, 0.0 }
  0x19   : > { %v285_v40 = vadd.f32 %v277_v23, %v269_v29  ;;  %v286_v41 = vadd.f32 %v278_v24, %v270_v30  ;;  %v287_v45 = vadd.f32 %v279_v31, %v271_v34  ;;  %v275_v54 = vmin.f32 %v267_v47, 6.0 }
  0x1a   : > { %v288_v49 = vadd.f32 %v280_v35, %v272_v42  ;;  %v289_v50 = vadd.f32 %v281_v36, %v273_v43  ;;  %v290_v53 = vadd.f32 %v282_v44, %v274_v46  ;;  %v276_v55 = vmin.f32 %v268_v48, 6.0 }
  0x1b   : > { %293 = vst [vmem:[%s458_s5] sm:$0xff] %v285_v40  ;;  %294 = vst [vmem:[%s458_s5 + $0x8] sm:$0xff] %v286_v41  ;;  %v291_v56 = vadd.f32 %v283_v51, %v275_v54 }
  0x1c   : > { %295 = vst [vmem:[%s458_s5 + $0x10] sm:$0xff] %v287_v45  ;;  %296 = vst [vmem:[%s458_s5 + $0x18] sm:$0xff] %v288_v49  ;;  %v292_v57 = vadd.f32 %v284_v52, %v276_v55 }
  0x1d   : > { %297 = vst [vmem:[%s458_s5 + $0x20] sm:$0xff] %v289_v50  ;;  %298 = vst [vmem:[%s458_s5 + $0x28] sm:$0xff] %v290_v53 }
  0x1e   : > { %299 = vst [vmem:[%s458_s5 + $0x30] sm:$0xff] %v291_v56  ;;  %300 = vst [vmem:[%s458_s5 + $0x38] sm:$0xff] %v292_v57 }
  0x1f PF: > { %s14_s15 = sadd.s32 1, %s398_s15  }
  0x20   : > { %p11_p4 = scmp.ge.s32.totalorder %s14_s15, 10  }
  0x22   :  { %13 = sbr.rel (!%p11_p4) target bundleno = 1 (0x1), region = 69 }

// kernel: block_for_stride_one.6
= control target key start
LH: loop header
LB: loop body
LE: loop exit
PB: predicated region body
PF: predicated region fallthrough
CT: control target
= control target key end

     0   :  { %s714_s18 = smov 0   ;;  %s773_s0 = inlined_call_operand.vmem [shape: bf16[512,128], index: 0, kind: input, shape index: {}]   ;;  %s774_s1 = inlined_call_operand.vmem [shape: f32[1,128], index: 1, kind: input, shape index: {}]   ;;  %s775_s2 = inlined_call_operand.vmem [shape: f32[1,128], index: 2, kind: input, shape index: {}]   ;;  %s776_s3 = inlined_call_operand.vmem [shape: bf16[128,128], index: 3, kind: input, shape index: {}]   ;;  %s777_s4 = inlined_call_operand.vmem [shape: f32[512,128], index: 4, kind: output, shape index: {0}]   ;;  %s778_s5 = inlined_call_operand.vmem [shape: f32[8,2,128], index: 5, kind: output, shape index: {1}]  }
   0x1 LB: > { %s720_s19 = sadd.s32 4294967295, %s682_s18   ;;  %p571_p0 = scmp.ge.s32.totalorder %s682_s18, 1  ;;  %s682_s18 = sphi %s714_s18, %s16_s18  }
   0x2   : > { %p191_p1 = scmp.lt.s32.totalorder %s682_s18, 9 }
   0x4   : > { %p192_p2 = pnand %p571_p0, %p191_p1 }
   0x5   : > { %v668_v0 = vld [vmem:[%s776_s3] sm:$0xff] (!%p192_p2)   ;;  %s572_s22 = sshll.u32 (!%p192_p2), %s720_s19, 3  ;;  %v669_v1 = vld [vmem:[%s776_s3 + $0x8] sm:$0xff] (!%p192_p2)   ;;  %v670_v2 = vld [vmem:[%s776_s3 + $0x10] sm:$0xff] (!%p192_p2)   ;;  %p235_p4 = scmp.lt.s32.totalorder (!%p192_p2), %s720_s19, 7  ;;  %vm477_vm0 = vcmask (!%p192_p2), 1040384  }
   0x6   : > { %195 = sbr.rel (%p192_p2) target bundleno = 283 (0x11b), region = 36  ;;  %p224_p3 = scmp.lt.s32.totalorder (!%p192_p2), %s572_s22, 63  ;;  %620 = vmatprep.subr.bf16.mxu0 (!%p192_p2), %v668_v0  ;;  %644 = vmatprep.subr.bf16.mxu1 (!%p192_p2), %v668_v0  ;;  %v671_v3 = vld [vmem:[%s776_s3 + $0x18] sm:$0xff] (!%p192_p2)   ;;  %v577_v5 = vld [vmem:[%s774_s1] ss:$0 sm:$0xff] (!%p192_p2)  ;;  %v673_v33 = vld [vmem:[%s776_s3 + $0x28] sm:$0xff] (!%p192_p2)  }
   0x7   : > { %621 = vmatpush3.bf16.msra.mxu0 (!%p192_p2), %v668_v0  ;;  %652 = vmatpush3.bf16.msra.mxu1 (!%p192_p2), %v668_v0  ;;  %v578_v11 = vld [vmem:[%s775_s2] ss:$0 sm:$0xff] (!%p192_p2)  ;;  %v674_v45 = vld [vmem:[%s776_s3 + $0x30] sm:$0xff] (!%p192_p2)   ;;  %v675_v51 = vld [vmem:[%s776_s3 + $0x38] sm:$0xff] (!%p192_p2)  }
   0x8   : > { %622 = vmatprep.subr.bf16.mxu0 (!%p192_p2), %v669_v1  ;;  %645 = vmatprep.subr.bf16.mxu1 (!%p192_p2), %v669_v1  ;;  %v672_v20 = vld [vmem:[%s776_s3 + $0x20] sm:$0xff] (!%p192_p2)  }
   0xb   : > { %623 = vmatpush3.bf16.msra.mxu0 (!%p192_p2), %v669_v1  ;;  %653 = vmatpush3.bf16.msra.mxu1 (!%p192_p2), %v669_v1 }
   0xc   : > { %624 = vmatprep.subr.bf16.mxu0 (!%p192_p2), %v670_v2  ;;  %646 = vmatprep.subr.bf16.mxu1 (!%p192_p2), %v670_v2 }
   0xd   : > { %s780_s22 = smov (!%p224_p3, %s572_s22), 63  ;;  %s782_s19 = smov (!%p235_p4, %s720_s19), 7 }
   0xe   : > { %s573_s27 = sshll.u32 %s780_s22, 2  ;;  %s575_s23 = sshll.u32 %s780_s22, 3 }
   0xf   : > { %s227_s30 = scalar_lea.vmem %s773_s0, %s573_s27  ;;  %625 = vmatpush3.bf16.msra.mxu0 %v670_v2  ;;  %654 = vmatpush3.bf16.msra.mxu1 %v670_v2  ;;  %s233_s26 = scalar_lea.vmem %s777_s4, %s575_s23 }
  0x10   : > { %v590_v4 = vld [vmem:[%s227_s30] sm:$0xff]   ;;  %v605_v8 = vld [vmem:[%s227_s30 + $0x8] sm:$0xff]   ;;  %v606_v9 = vld [vmem:[%s227_s30 + $0x10] sm:$0xff]   ;;  %626 = vmatprep.subr.bf16.mxu0 %v671_v3  ;;  %647 = vmatprep.subr.bf16.mxu1 %v671_v3  ;;  %s576_s22 = sshll.u32 %s782_s19, 1 }
  0x11   : > { %v591_v6 = vunpack.c.l.bf16 %v590_v4  ;;  %v592_v7 = vunpack.c.h.bf16 %v590_v4  ;;  %v607_v10 = vld [vmem:[%s227_s30 + $0x18] sm:$0xff]   ;;  %v595_v12 = vunpack.c.l.bf16 %v605_v8  ;;  %v596_v13 = vunpack.c.h.bf16 %v605_v8  ;;  %s238_s29 = scalar_lea.vmem %s778_s5, %s576_s22 }
  0x12   : > { %v599_v14 = vunpack.c.l.bf16 %v606_v9  ;;  %v600_v15 = vunpack.c.h.bf16 %v606_v9  ;;  %v603_v18 = vunpack.c.l.bf16 %v607_v10  ;;  %v604_v19 = vunpack.c.h.bf16 %v607_v10 }
  0x13   : > { %v263_v16 = vmul.f32 %v591_v6, %v577_v5  ;;  %v264_v17 = vmul.f32 %v592_v7, %v577_v5  ;;  %v265_v24 = vmul.f32 %v595_v12, %v577_v5  ;;  %v266_v26 = vmul.f32 %v596_v13, %v577_v5  ;;  %627 = vmatpush3.bf16.msra.mxu0 %v671_v3 }
  0x14   : > { %v267_v21 = vmul.f32 %v599_v14, %v577_v5  ;;  %v268_v25 = vmul.f32 %v600_v15, %v577_v5  ;;  %v269_v28 = vmul.f32 %v603_v18, %v577_v5  ;;  %v270_v29 = vmul.f32 %v604_v19, %v577_v5  ;;  %655 = vmatpush3.bf16.msra.mxu1 %v671_v3 }
  0x15   : > { %v278_v22 = vadd.f32 %v578_v11, %v263_v16  ;;  %v279_v23 = vadd.f32 %v578_v11, %v264_v17  ;;  %628 = vmatprep.subr.bf16.mxu0 %v672_v20  ;;  %648 = vmatprep.subr.bf16.mxu1 %v672_v20  ;;  %v280_v37 = vadd.f32 %v578_v11, %v265_v24 }
  0x16   : > { %v282_v27 = vadd.f32 %v578_v11, %v267_v21  ;;  %v283_v32 = vadd.f32 %v578_v11, %v268_v25  ;;  %v281_v39 = vadd.f32 %v578_v11, %v266_v26  ;;  %v284_v41 = vadd.f32 %v578_v11, %v269_v28 }
  0x17   : > { %v286_v30 = vmax.f32 %v278_v22, 0.0  ;;  %v287_v31 = vmax.f32 %v279_v23, 0.0  ;;  %v285_v42 = vadd.f32 %v578_v11, %v270_v29  ;;  %629 = vmatpush3.bf16.msra.mxu0 %v672_v20  ;;  %v288_v47 = vmax.f32 %v280_v37, 0.0 }
  0x18   : > { %v290_v34 = vmax.f32 %v282_v27, 0.0  ;;  %v291_v38 = vmax.f32 %v283_v32, 0.0  ;;  %656 = vmatpush3.bf16.msra.mxu1 %v672_v20  ;;  %630 = vmatprep.subr.bf16.mxu0 %v673_v33  ;;  %v289_v48 = vmax.f32 %v281_v39, 0.0  ;;  %v292_v49 = vmax.f32 %v284_v41, 0.0 }
  0x19   : > { %v294_v35 = vmin.f32 %v286_v30, 6.0  ;;  %v295_v36 = vmin.f32 %v287_v31, 6.0  ;;  %649 = vmatprep.subr.bf16.mxu1 %v673_v33  ;;  %v293_v50 = vmax.f32 %v285_v42, 0.0  ;;  %v296_v52 = vmin.f32 %v288_v47, 6.0 }
  0x1a   : > { %v298_v40 = vmin.f32 %v290_v34, 6.0  ;;  %v299_v44 = vmin.f32 %v291_v38, 6.0  ;;  %v297_v53 = vmin.f32 %v289_v48, 6.0  ;;  %v300_v54 = vmin.f32 %v292_v49, 6.0 }
  0x1b   : > { %v302_v43 = vpack.c.bf16 %v295_v36, %v294_v35  ;;  %631 = vmatpush3.bf16.msra.mxu0 %v673_v33  ;;  %v301_v55 = vmin.f32 %v293_v50, 6.0 }
  0x1c   : > { %v304_v46 = vpack.c.bf16 %v299_v44, %v298_v40  ;;  %657 = vmatpush3.bf16.msra.mxu1 %v673_v33  ;;  %632 = vmatprep.subr.bf16.mxu0 %v674_v45  ;;  %v303_v56 = vpack.c.bf16 %v297_v53, %v296_v52 }
  0x1d   : > { %636 = vmatprep.mubr.bf16.mxu0 %v302_v43  ;;  %650 = vmatprep.subr.bf16.mxu1 %v674_v45  ;;  %v305_v57 = vpack.c.bf16 %v301_v55, %v300_v54 }
  0x1e   : > { %640 = vmatprep.mubr.bf16.mxu1 %v304_v46 }
  0x1f   : > { %633 = vmatpush3.bf16.msra.mxu0 %v674_v45 }
  0x20   : > { %658 = vmatpush3.bf16.msra.mxu1 %v674_v45  ;;  %634 = vmatprep.subr.bf16.mxu0 %v675_v51 }
  0x21   : > { %651 = vmatprep.subr.bf16.mxu1 %v675_v51 }
  0x23   : > { %635 = vmatpush3.bf16.msra.mxu0 %v675_v51 }
  0x24   : > { %659 = vmatpush3.bf16.msra.mxu1 %v675_v51 }
  0x26   : > { %637 = vmatmul.mubr.bf16.vlgmr.msra.gmra.mrb[0].mxu0 %v303_v56 }
  0x27   : > { %641 = vmatmul.mubr.bf16.vlgmr.msra.gmra.mrb[0].mxu1 %v305_v57 }
  0xf9   : > { %v638_v58 = vpop.f32.mrb[0].mxu0 }
  0xfa   : > { %v642_v59 = vpop.f32.mrb[0].mxu1  ;;  %437 = vst [vmem:[%s233_s26 + $0x10] sm:$0xff] %v638_v58  ;;  %v404_v60 = vpop.f32.mrb[1].mxu0  ;;  %v458_v5 = vmul.f32 %v638_v58, %v638_v58 }
  0xfb   : > { %441 = vst [vmem:[%s233_s26 + $0x30] sm:$0xff] %v642_v59  ;;  %v420_v61 = vpop.f32.mrb[1].mxu1  ;;  %435 = vst [vmem:[%s233_s26] sm:$0xff] %v404_v60  ;;  %v639_v62 = vpop.f32.mrb[2].mxu0  ;;  %v456_v2 = vmul.f32 %v404_v60, %v404_v60  ;;  %v462_v17 = vmul.f32 %v642_v59, %v642_v59 }
  0xfc   : > { %439 = vst [vmem:[%s233_s26 + $0x20] sm:$0xff] %v420_v61  ;;  %v643_v63 = vpop.f32.mrb[2].mxu1  ;;  %438 = vst [vmem:[%s233_s26 + $0x18] sm:$0xff] %v639_v62  ;;  %v407_v0 = vpop.f32.mrb[3].mxu0  ;;  %v459_v8 = vmul.f32 %v639_v62, %v639_v62  ;;  %v460_v11 = vmul.f32 %v420_v61, %v420_v61 }
  0xfd   : > { %442 = vst [vmem:[%s233_s26 + $0x38] sm:$0xff] %v643_v63  ;;  %v423_v1 = vpop.f32.mrb[3].mxu1  ;;  %436 = vst [vmem:[%s233_s26 + $0x8] sm:$0xff] %v407_v0  ;;  %v443_v3 = vadd.f32 %v407_v0, %v404_v60  ;;  %v457_v4 = vmul.f32 %v407_v0, %v407_v0  ;;  %v463_v20 = vmul.f32 %v643_v63, %v643_v63 }
  0xfe   : > { %440 = vst [vmem:[%s233_s26 + $0x28] sm:$0xff] %v423_v1  ;;  %v461_v16 = vmul.f32 %v423_v1, %v423_v1 }
  0xff   : > { %v444_v6 = vadd.f32 %v638_v58, %v443_v3  ;;  %v464_v7 = vadd.f32 %v457_v4, %v456_v2 }
 0x101   : > { %v465_v9 = vadd.f32 %v464_v7, %v458_v5  ;;  %v445_v10 = vadd.f32 %v639_v62, %v444_v6 }
 0x103   : > { %v446_v12 = vadd.f32 %v445_v10, %v420_v61  ;;  %v466_v13 = vadd.f32 %v465_v9, %v459_v8 }
 0x105   : > { %v467_v14 = vadd.f32 %v466_v13, %v460_v11  ;;  %v447_v15 = vadd.f32 %v446_v12, %v423_v1 }
 0x107   : > { %v448_v18 = vadd.f32 %v642_v59, %v447_v15  ;;  %v468_v19 = vadd.f32 %v467_v14, %v461_v16 }
 0x109   : > { %v449_v21 = vadd.f32 %v643_v63, %v448_v18  ;;  %v469_v22 = vadd.f32 %v468_v19, %v462_v17 }
 0x10b   : > { %v450_v23 = vrot.slane %v449_v21, 4  ;;  %v470_v24 = vadd.f32 %v469_v22, %v463_v20 }
 0x10d   : > { %v451_v25 = vadd.f32 %v450_v23, %v449_v21  ;;  %v471_v26 = vrot.slane %v470_v24, 4 }
 0x10f   : > { %v452_v27 = vrot.slane %v451_v25, 2  ;;  %v472_v28 = vadd.f32 %v471_v26, %v470_v24 }
 0x111   : > { %v453_v29 = vadd.f32 %v452_v27, %v451_v25  ;;  %v473_v30 = vrot.slane %v472_v28, 2 }
 0x113   : > { %v454_v31 = vrot.slane %v453_v29, 1  ;;  %v474_v32 = vadd.f32 %v473_v30, %v472_v28 }
 0x115   : > { %v475_v33 = vrot.slane %v474_v32, 1  ;;  %v455_v34 = vadd.f32 %v454_v31, %v453_v29 }
 0x117   : > { %v476_v35 = vadd.f32 %v475_v33, %v474_v32 }
 0x119   : > { %v478_v36 = vsel %vm477_vm0, %v455_v34, %v476_v35 }
 0x11a   : > { %479 = vst [vmem:[%s238_s29] sm:$0x3] %v478_v36 }
 0x11b PF: > { %s16_s18 = sadd.s32 1, %s682_s18  }
 0x11c   : > { %p13_p5 = scmp.ge.s32.totalorder %s16_s18, 10  }
 0x11e   :  { %15 = sbr.rel (!%p13_p5) target bundleno = 1 (0x1), region = 78 }

// kernel: block_for_stride_one.5
= control target key start
LH: loop header
LB: loop body
LE: loop exit
PB: predicated region body
PF: predicated region fallthrough
CT: control target
= control target key end

     0   :  { %s7631_s18 = smov 0   ;;  %s9871_s0 = inlined_call_operand.vmem [shape: bf16[2,256,128], index: 0, kind: input, shape index: {}]   ;;  %s9872_s1 = inlined_call_operand.vmem [shape: f32[1,128], index: 1, kind: input, shape index: {}]   ;;  %s9873_s2 = inlined_call_operand.vmem [shape: f32[1,128], index: 2, kind: input, shape index: {}]   ;;  %s9874_s3 = inlined_call_operand.vmem [shape: bf16[1152,128], index: 3, kind: input, shape index: {}]   ;;  %s9875_s4 = inlined_call_operand.vmem [shape: bf16[2,256,128], index: 4, kind: output, shape index: {0}]   ;;  %s9876_s5 = inlined_call_operand.vmem [shape: f32[2,2,128], index: 5, kind: output, shape index: {1}]  }
   0x1 LB: > { %s6283_s19 = sadd.s32 4294967295, %s7597_s18   ;;  %p6287_p0 = scmp.ge.s32.totalorder %s7597_s18, 1  ;;  %s7597_s18 = sphi %s7631_s18, %s16_s18  }
   0x2   : > { %p190_p1 = scmp.lt.s32.totalorder %s7597_s18, 3 }
   0x4   : > { %p191_p2 = pnand %p6287_p0, %p190_p1 }
   0x6   : > { %194 = sbr.rel (%p191_p2) target bundleno = 717 (0x2cd), region = 36 }
   0xd   : > { %v7465_v0 = vld [vmem:[%s9874_s3 + $0x40] sm:$0xff]   ;;  %v617_v1 = vlaneseq  ;;  %v9900_v3 = vmov 0   ;;  %v7467_v4 = vld [vmem:[%s9874_s3 + $0x48] sm:$0xff]   ;;  %p222_p3 = scmp.lt.s32.totalorder %s6283_s19, 1  ;;  %v7469_v7 = vld [vmem:[%s9874_s3 + $0x50] sm:$0xff]   ;;  %vm7600_vm4 = vmmov 1  }
   0xe   : > { %v7466_v2 = vld [vmem:[%s9874_s3] sm:$0xff]   ;;  %241 = vst [vmem:[#allocation2 + $0x8] sm:$0xf] %v9900_v3  ;;  %242 = vst [vmem:[#allocation2 + $0xc] sm:$0xf] %v9900_v3  ;;  %6919 = vmatprep.subr.bf16.mxu0 %v7465_v0  ;;  %7439 = vmatprep.subr.bf16.mxu1 %v7465_v0  ;;  %v7468_v5 = vld [vmem:[%s9874_s3 + $0x8] sm:$0xff]  }
   0xf   : > { %240 = vst [vmem:[#allocation2 + $0x4] sm:$0xf] %v9900_v3  ;;  %243 = vst [vmem:[#allocation2 + $0x90] sm:$0xf] %v9900_v3  ;;  %6920 = vmatpush3.bf16.msra.mxu0 %v7466_v2  ;;  %7447 = vmatpush3.bf16.msra.mxu1 %v7466_v2  ;;  %v7656_v6 = vshrl.u32 %v617_v1, 7  ;;  %s10420_s19 = smov (!%p222_p3, %s6283_s19), 1 }
  0x10   : > { %244 = vst [vmem:[#allocation2 + $0x94] sm:$0xf] %v9900_v3  ;;  %6921 = vmatprep.subr.bf16.mxu0 %v7467_v4  ;;  %7440 = vmatprep.subr.bf16.mxu1 %v7467_v4  ;;  %v7470_v8 = vld [vmem:[%s9874_s3 + $0x10] sm:$0xff]   ;;  %v7471_v10 = vld [vmem:[%s9874_s3 + $0x58] sm:$0xff]   ;;  %s6583_s9 = sshll.u32 %s10420_s19, 7  ;;  %v7473_v14 = vld [vmem:[%s9874_s3 + $0x60] sm:$0xff]  }
  0x11   : > { %v620_v9 = vadd.s32 16, %v7656_v6  ;;  %v654_v11 = vand.u32 15, %v7656_v6  ;;  %v7472_v12 = vld [vmem:[%s9874_s3 + $0x18] sm:$0xff]   ;;  %v7474_v16 = vld [vmem:[%s9874_s3 + $0x20] sm:$0xff]   ;;  %s7690_s20 = scalar_lea.vmem %s9871_s0, %s6583_s9  ;;  %v642_v17 = vadd.s32 192, %v7656_v6  ;;  %v7475_v18 = vld [vmem:[%s9874_s3 + $0x68] sm:$0xff]  }
  0x12   : > { %v644_v21 = vadd.s32 208, %v7656_v6  ;;  %v7476_v22 = vld [vmem:[%s9874_s3 + $0x28] sm:$0xff]   ;;  %v6883_v23 = vld [vmem:[%s7690_s20 + $0x58] sm:$0xff]   ;;  %v7708_v24 = vld [vmem:[%s9872_s1] ss:$0 sm:$0xff]  ;;  %v7711_v25 = vadd.s32 32, %v7656_v6 }
  0x13   : > { %6922 = vmatpush3.bf16.msra.mxu0 %v7468_v5  ;;  %7448 = vmatpush3.bf16.msra.mxu1 %v7468_v5  ;;  %v668_v13 = vand.u32 15, %v620_v9  ;;  %vm7678_vm0 = vcmp.ne.s32.totalorder %v654_v11, 0  ;;  %v6695_v26 = vunpack.c.l.bf16 %v6883_v23  ;;  %v6696_v27 = vunpack.c.h.bf16 %v6883_v23  ;;  %v7719_v30 = vld [vmem:[%s9873_s2] ss:$0 sm:$0xff]  ;;  %v7477_v31 = vld [vmem:[%s9874_s3 + $0x70] sm:$0xff]   ;;  %vm1196_vm5 = vmpackc.low %vm7600_vm4, %vm7600_vm4 }
  0x14   : > { %6923 = vmatprep.subr.bf16.mxu0 %v7469_v7  ;;  %7441 = vmatprep.subr.bf16.mxu1 %v7469_v7  ;;  %v822_v28 = vand.u32 15, %v642_v17  ;;  %v7714_v29 = vadd.s32 224, %v7656_v6  ;;  %v6650_v34 = vld [vmem:[%s7690_s20] sm:$0xff]   ;;  %v836_v35 = vand.u32 15, %v644_v21  ;;  %v682_v36 = vand.u32 15, %v7711_v25  ;;  %vm1195_vm2 = vmpackc.low %vm7678_vm0, %vm7678_vm0  ;;  %v7478_v40 = vld [vmem:[%s9874_s3 + $0x30] sm:$0xff]  }
  0x15   : > { %vm7696_vm1 = vcmp.ne.s32.totalorder %v668_v13, 0  ;;  %v7481_v20 = vld [vmem:[#allocation2 + $0x8] sm:$0xff]   ;;  %v344_v32 = vmul.f32 %v6695_v26, %v7708_v24  ;;  %v345_v33 = vmul.f32 %v6696_v27, %v7708_v24  ;;  %v6651_v37 = vunpack.c.l.bf16 %v6650_v34  ;;  %v7479_v48 = vld [vmem:[%s9874_s3 + $0x78] sm:$0xff]   ;;  %v7483_v63 = vld [vmem:[%s9874_s3 + $0xc0] sm:$0xff]  }
  0x16   : > { %5155 = vmatprep.mubr.bf16.mxu0 %v7481_v20  ;;  %v6652_v38 = vunpack.c.h.bf16 %v6650_v34  ;;  %vm1259_vm3 = vsmask.f32 3328  ;;  %v850_v39 = vand.u32 15, %v7714_v29  ;;  %v1227_v43 = vsel %vm1195_vm2, 65537, %v9900_v3  ;;  %vm1197_vm7 = vmpackc.low %vm7696_vm1, %vm7696_vm1  ;;  %v7480_v54 = vld [vmem:[%s9874_s3 + $0x38] sm:$0xff]   ;;  %v7484_v0 = vld [vmem:[%s9874_s3 + $0x140] sm:$0xff]  }
  0x17   : > { %6924 = vmatpush3.bf16.msra.mxu0 %v7470_v8  ;;  %7449 = vmatpush3.bf16.msra.mxu1 %v7470_v8  ;;  %v383_v41 = vadd.f32 %v7719_v30, %v344_v32  ;;  %v384_v42 = vadd.f32 %v7719_v30, %v345_v33  ;;  %vm1260_vm6 = vsmask.f32 7440  ;;  %v322_v44 = vmul.f32 %v6651_v37, %v7708_v24  ;;  %v1098_v57 = vld [vmem:[#allocation2 + $0x4] sm:$0x8]  ;;  %v6882_v13 = vld [vmem:[%s7690_s20 + $0x50] sm:$0xff]  }
  0x18   : > { %6925 = vmatprep.subr.bf16.mxu0 %v7471_v10  ;;  %7442 = vmatprep.subr.bf16.mxu1 %v7471_v10  ;;  %v323_v45 = vmul.f32 %v6652_v38, %v7708_v24  ;;  %v7744_v46 = vsel %vm1196_vm5, 65537, %v9900_v3  ;;  %v1263_v47 = vshll.u32 %v1227_v43, 16  ;;  %v1229_v51 = vsel %vm1197_vm7, 65537, %v9900_v3  ;;  %vm7784_vm10 = vmor %vm1259_vm3, %vm1260_vm6  ;;  %v1099_v26 = vld [vmem:[#allocation2 + $0x8] sm:$0xf]  ;;  %v7508_v29 = vld [vmem:[%s9874_s3 + $0x110] sm:$0xff]  }
  0x19   : > { %v415_v49 = vmax.f32 %v383_v41, 0.0  ;;  %v416_v50 = vmax.f32 %v384_v42, 0.0  ;;  %v1266_v52 = vshrl.u32 %v1227_v43, 16  ;;  %vm7750_vm8 = vcmp.ne.s32.totalorder %v822_v28, 0  ;;  %v1100_v27 = vld [vmem:[#allocation2 + $0xc] sm:$0xf] }
  0x1a   : > { %v361_v55 = vadd.f32 %v7719_v30, %v322_v44  ;;  %v362_v56 = vadd.f32 %v7719_v30, %v323_v45  ;;  %v7759_v58 = vrot.slane %v1263_v47, 5  ;;  %v1272_v59 = vshll.u32 %v7744_v46, 16  ;;  %v7798_v38 = vld [vmem:[%s7690_s20 + $0x8] sm:$0xff]   ;;  %vm1219_vm14 = vmpackc.low %vm7750_vm8, %vm7750_vm8 }
  0x1b   : > { %6926 = vmatpush3.bf16.msra.mxu0 %v7472_v12  ;;  %7450 = vmatpush3.bf16.msra.mxu1 %v7472_v12  ;;  %vm7762_vm9 = vcmp.ne.s32.totalorder %v836_v35, 0  ;;  %v447_v61 = vmin.f32 %v415_v49, 6.0  ;;  %v448_v62 = vmin.f32 %v416_v50, 6.0  ;;  %v1268_v1 = vrot.slane %v1266_v52, 4  ;;  %v7808_v44 = vld [vmem:[%s7690_s20 + $0x68] sm:$0xff]  }
  0x1c   : > { %6927 = vmatprep.subr.bf16.mxu0 %v7473_v14  ;;  %7443 = vmatprep.subr.bf16.mxu1 %v7473_v14  ;;  %10010 = vst [vmem:[#allocation4_spill] sm:$0xff] %v7759_v58  ;;  %v1276_v2 = vshrl.u32 %v7744_v46, 16  ;;  %v393_v4 = vmax.f32 %v361_v55, 0.0  ;;  %v394_v5 = vmax.f32 %v362_v56, 0.0  ;;  %v7775_v7 = vrot.slane %v1272_v59, 5  ;;  %v6884_v14 = vld [vmem:[%s7690_s20 + $0x60] sm:$0xff]   ;;  %vm1221_vm15 = vmpackc.low %vm7762_vm9, %vm7762_vm9 }
  0x1d   : > { %v1282_v8 = vshll.u32 %v1229_v51, 16  ;;  %v6771_v9 = vpack.c.bf16 %v448_v62, %v447_v61  ;;  %v1269_v10 = vor.u32 %v1268_v1, %v7759_v58  ;;  %v1286_v12 = vshrl.u32 %v1229_v51, 16  ;;  %v7530_v46 = vld [vmem:[%s9874_s3 + $0x130] sm:$0xff]  }
  0x1e   : > { %v1278_v11 = vrot.slane %v1276_v2, 4  ;;  %v425_v15 = vmin.f32 %v393_v4, 6.0  ;;  %vm9877_vm11 = vcmp.ne.s16.totalorder %v7759_v58, 0  ;;  %v6691_v28 = vunpack.c.l.bf16 %v6882_v13 }
  0x1f   : > { %6928 = vmatpush3.bf16.msra.mxu0 %v7474_v16  ;;  %7451 = vmatpush3.bf16.msra.mxu1 %v7474_v16  ;;  %v426_v16 = vmin.f32 %v394_v5, 6.0  ;;  %6899 = vst [vmem:[#allocation2 + $0x68] sm:$0xff] %v6771_v9   ;;  %v1270_v19 = vrot.slane %v1269_v10, 4  ;;  %v1288_v21 = vrot.slane %v1286_v12, 4  ;;  %v6699_v32 = vunpack.c.l.bf16 %v6884_v14 }
  0x20   : > { %6929 = vmatprep.subr.bf16.mxu0 %v7475_v18  ;;  %7444 = vmatprep.subr.bf16.mxu1 %v7475_v18  ;;  %v1284_v18 = vrot.slane %v1282_v8, 5  ;;  %v1279_v20 = vor.u32 %v1278_v11, %v7775_v7  ;;  %v6700_v37 = vunpack.c.h.bf16 %v6884_v14  ;;  %v342_v41 = vmul.f32 %v6691_v28, %v7708_v24 }
  0x21   : > { %v6716_v23 = vpack.c.bf16 %v426_v16, %v425_v15  ;;  %v1275_v33 = vsel %vm7784_vm10, %v1270_v19, %v7775_v7  ;;  %v346_v43 = vmul.f32 %v6699_v32, %v7708_v24  ;;  %v10019_v50 = vmov 0 }
  0x22   : > { %v7795_v34 = vrot.slane %v1279_v20, 4  ;;  %v1289_v35 = vor.u32 %v1288_v21, %v1284_v18  ;;  %vm7800_vm12 = vcmp.ne.s16.totalorder %v1275_v33, 0  ;;  %v347_v49 = vmul.f32 %v6700_v37, %v7708_v24 }
  0x23   : > { %6930 = vmatpush3.bf16.msra.mxu0 %v7476_v22  ;;  %7452 = vmatpush3.bf16.msra.mxu1 %v7476_v22  ;;  %v1614_v22 = vsel %vm9877_vm11, %v1098_v57, 0  ;;  %6888 = vst [vmem:[#allocation2 + $0x10] sm:$0xff] %v6716_v23   ;;  %v381_v52 = vadd.f32 %v7719_v30, %v342_v41  ;;  %v385_v57 = vadd.f32 %v7719_v30, %v346_v43  ;;  %v6656_v1 = vunpack.c.h.bf16 %v7798_v38 }
  0x24   : > { %6931 = vmatprep.subr.bf16.mxu0 %v7477_v31  ;;  %7445 = vmatprep.subr.bf16.mxu1 %v7477_v31  ;;  %v6692_v31 = vunpack.c.h.bf16 %v6882_v13  ;;  %10015 = vst [vmem:[#allocation5_spill] sm:$0xff] %v7795_v34  ;;  %v1285_v45 = vsel %vm7784_vm10, %v7795_v34, %v1284_v18  ;;  %v1290_v47 = vrot.slane %v1289_v35, 4  ;;  %v386_v61 = vadd.f32 %v7719_v30, %v347_v49 }
  0x25   : > { %vm7816_vm13 = vcmp.ne.s16.totalorder %v1285_v45, 0  ;;  %v6703_v4 = vunpack.c.l.bf16 %v7808_v44  ;;  %v413_v9 = vmax.f32 %v381_v52, 0.0  ;;  %vm9878_vm1 = vsmask.f32 4352 }
  0x26   : > { %v343_v42 = vmul.f32 %v6692_v31, %v7708_v24  ;;  %v10020_v50 = vsel %vm7816_vm13, 4294967295, %v10019_v50  ;;  %v1295_v55 = vsel %vm7784_vm10, %v1290_v47, %v7775_v7  ;;  %v1616_v56 = vsel %vm7816_vm13, %v1100_v27, 0  ;;  %v7482_v62 = vld [vmem:[#allocation2 + $0x68] sm:$0xff]  }
  0x27   : > { %6932 = vmatpush3.bf16.msra.mxu0 %v7478_v40  ;;  %7453 = vmatpush3.bf16.msra.mxu1 %v7478_v40  ;;  %v10016_v40 = vmov 0  ;;  %10021 = vst [vmem:[#allocation7_spill] sm:$0xff] %v10020_v50  ;;  %vm7835_vm0 = vcmp.ne.s16.totalorder %v1295_v55, 0  ;;  %v417_v60 = vmax.f32 %v385_v57, 0.0  ;;  %v418_v11 = vmax.f32 %v386_v61, 0.0 }
  0x28   : > { %6933 = vmatprep.subr.bf16.mxu0 %v7479_v48  ;;  %7446 = vmatprep.subr.bf16.mxu1 %v7479_v48  ;;  %v10017_v40 = vsel %vm7800_vm12, 4294967295, %v10016_v40  ;;  %v1615_v48 = vsel %vm7800_vm12, %v1099_v26, 0  ;;  %v1251_v12 = vsel %vm1219_vm14, 65537, %v9900_v3  ;;  %v1253_v13 = vsel %vm1221_vm15, 65537, %v9900_v3  ;;  %v1124_v43 = vld [vmem:[#allocation2 + $0x6c] sm:$0xf] }
  0x29   : > { %10018 = vst [vmem:[#allocation6_spill] sm:$0xff] %v10017_v40  ;;  %v6327_v51 = vcombine.low %v1614_v22, %v1615_v48  ;;  %5251 = vmatprep.mubr.bf16.mxu1 %v7482_v62  ;;  %v445_v18 = vmin.f32 %v413_v9, 6.0  ;;  %v449_v21 = vmin.f32 %v417_v60, 6.0  ;;  %v450_v22 = vmin.f32 %v418_v11, 6.0  ;;  %v1123_v57 = vld [vmem:[#allocation2 + $0x68] sm:$0xf] }
  0x2a   : > { %v1101_v14 = vld [vmem:[#allocation2 + $0x10] sm:$0xf]  ;;  %v1502_v23 = vshll.u32 %v1251_v12, 16  ;;  %v1506_v31 = vshrl.u32 %v1251_v12, 16  ;;  %v1522_v33 = vshll.u32 %v1253_v13, 16  ;;  %v1526_v35 = vshrl.u32 %v1253_v13, 16 }
  0x2b   : > { %6934 = vmatpush3.bf16.msra.mxu0 %v7480_v54  ;;  %7454 = vmatpush3.bf16.msra.mxu1 %v7480_v54  ;;  %v382_v54 = vadd.f32 %v7719_v30, %v343_v42  ;;  %v1732_v5 = vshrl.u32 %v6327_v51, 16  ;;  %v1735_v8 = vshll.u32 %v6327_v51, 16  ;;  %v1617_v20 = vsel %vm7835_vm0, %v1101_v14, 0  ;;  %v7489_v60 = vld [vmem:[#allocation2 + $0x10] sm:$0xff]  }
  0x2c   : > { %7031 = vmatprep.subr.bf16.mxu1 %v7483_v63  ;;  %7143 = vmatprep.subr.bf16.mxu0 %v7484_v0  ;;  %v10022_v63 = vmov 0  ;;  %v6655_v0 = vunpack.c.l.bf16 %v7798_v38  ;;  %v6328_v26 = vcombine.low %v1616_v56, %v1617_v20  ;;  %v6776_v53 = vpack.c.bf16 %v450_v22, %v449_v21  ;;  %v7486_v56 = vld [vmem:[%s9874_s3 + $0x100] sm:$0xff]  }
  0x2d   : > { %v10023_v63 = vsel %vm7835_vm0, 4294967295, %v10022_v63  ;;  %v414_v10 = vmax.f32 %v382_v54, 0.0  ;;  %v1734_v15 = vrot.slane %v1732_v5, 3  ;;  %v1737_v16 = vrot.slane %v1735_v8, 4  ;;  %v7494_v5 = vld [vmem:[%s9874_s3 + $0x148] sm:$0xff]  }
  0x2e   : > { %10024 = vst [vmem:[#allocation8_spill] sm:$0xff] %v10023_v63  ;;  %v1504_v32 = vrot.slane %v1502_v23, 5  ;;  %v1740_v37 = vshrl.u32 %v6328_v26, 16  ;;  %v1743_v38 = vshll.u32 %v6328_v26, 16  ;;  %v1508_v41 = vrot.slane %v1506_v31, 4  ;;  %6900 = vst [vmem:[#allocation2 + $0x70] sm:$0xff] %v6776_v53  }
  0x2f   : > { %v446_v19 = vmin.f32 %v414_v10, 6.0  ;;  %v1738_v27 = vor.u32 %v1737_v16, %v1734_v15  ;;  %v324_v42 = vmul.f32 %v6655_v0, %v7708_v24  ;;  %v1524_v47 = vrot.slane %v1522_v33, 5  ;;  %v7496_v23 = vld [vmem:[%s9874_s3 + $0x108] sm:$0xff]  }
  0x30   : > { %v1505_v45 = vsel %vm7784_vm10, %v7795_v34, %v1504_v32  ;;  %v1528_v48 = vrot.slane %v1526_v35, 4  ;;  %v325_v49 = vmul.f32 %v6656_v1, %v7708_v24  ;;  %v1742_v51 = vrot.slane %v1740_v37, 3 }
  0x31   : > { %v6766_v28 = vpack.c.bf16 %v446_v19, %v445_v18  ;;  %v1745_v52 = vrot.slane %v1743_v38, 4  ;;  %v1509_v54 = vor.u32 %v1508_v41, %v1504_v32  ;;  %vm7856_vm2 = vcmp.ne.s16.totalorder %v1505_v45, 0  ;;  %v7506_v32 = vld [vmem:[%s9874_s3 + $0x150] sm:$0xff]  }
  0x32   : > { %v10025_v55 = vmov 0  ;;  %v1525_v61 = vsel %vm7784_vm10, %v7795_v34, %v1524_v47  ;;  %v1529_v62 = vor.u32 %v1528_v48, %v1524_v47  ;;  %v363_v0 = vadd.f32 %v7719_v30, %v324_v42  ;;  %v7914_v42 = vld [vmem:[#allocation2 + $0x14] sm:$0xf] }
  0x33   : > { %6898 = vst [vmem:[#allocation2 + $0x60] sm:$0xff] %v6766_v28   ;;  %v10026_v55 = vsel %vm7856_vm2, 4294967295, %v10025_v55  ;;  %v364_v1 = vadd.f32 %v7719_v30, %v325_v49  ;;  %v7871_v8 = vor.u32 %v1745_v52, %v1742_v51  ;;  %v1510_v9 = vrot.slane %v1509_v54, 4 }
  0x34   : > { %10027 = vst [vmem:[#allocation9_spill] sm:$0xff] %v10026_v55  ;;  %vm7873_vm3 = vcmp.ne.s16.totalorder %v1525_v61, 0  ;;  %v10028_v10 = vmov 0  ;;  %vm1038_vm4 = vcmp.ne.s32.totalorder %v682_v36, 0  ;;  %v1530_v11 = vrot.slane %v1529_v62, 4 }
  0x35   : > { %v10029_v10 = vsel %vm7873_vm3, 4294967295, %v10028_v10  ;;  %v1640_v12 = vsel %vm7873_vm3, %v1124_v43, 0  ;;  %v395_v13 = vmax.f32 %v363_v0, 0.0  ;;  %v396_v14 = vmax.f32 %v364_v1, 0.0  ;;  %vm1199_vm5 = vmpackc.low %vm1038_vm4, %vm1038_vm4  ;;  %v1125_v26 = vld [vmem:[#allocation2 + $0x70] sm:$0xf] }
  0x36   : > { %10030 = vst [vmem:[#allocation10_spill] sm:$0xff] %v10029_v10  ;;  %v1747_v15 = vsel %vm9878_vm1, %v1738_v27, %v7871_v8  ;;  %v1515_v16 = vsel %vm7784_vm10, %v1510_v9, %v7775_v7  ;;  %v1231_v18 = vsel %vm1199_vm5, 65537, %v9900_v3  ;;  %v6704_v19 = vunpack.c.h.bf16 %v7808_v44  ;;  %v7485_v9 = vld [vmem:[%s9874_s3 + $0x80] sm:$0xff]  }
  0x37   : > { %5156 = vmatmul.mubr.bf16.vlgmr.msra.gmra.mrb[0].mxu0 %v1747_v15  ;;  %v1535_v36 = vsel %vm7784_vm10, %v1530_v11, %v7775_v7  ;;  %vm7891_vm6 = vcmp.ne.s16.totalorder %v1515_v16, 0  ;;  %v10031_v20 = vmov 0  ;;  %v427_v21 = vmin.f32 %v395_v13, 6.0 }
  0x38   : > { %v10032_v20 = vsel %vm7891_vm6, 4294967295, %v10031_v20  ;;  %v428_v22 = vmin.f32 %v396_v14, 6.0  ;;  %vm7898_vm7 = vcmp.ne.s16.totalorder %v1535_v36, 0  ;;  %v10034_v27 = vmov 0  ;;  %7144 = vmatpush3.bf16.msra.mxu0 %v7486_v56  ;;  %5163 = vmatprep.mubr.bf16.mxu0 %v7489_v60  ;;  %v7490_v14 = vld [vmem:[#allocation2 + $0x70] sm:$0xff]  }
  0x39   : > { %10033 = vst [vmem:[#allocation11_spill] sm:$0xff] %v10032_v20  ;;  %v10035_v27 = vsel %vm7898_vm7, 4294967295, %v10034_v27  ;;  %v1639_v31 = vsel %vm7891_vm6, %v1123_v57, 0  ;;  %v348_v53 = vmul.f32 %v6703_v4, %v7708_v24  ;;  %v1641_v33 = vsel %vm7898_vm7, %v1125_v26, 0  ;;  %7145 = vmatprep.subr.bf16.mxu0 %v7494_v5  ;;  %v6874_v57 = vld [vmem:[%s7690_s20 + $0x10] sm:$0xff]  }
  0x3a   : > { %v1122_v25 = vld [vmem:[#allocation2 + $0x64] sm:$0xf]  ;;  %10036 = vst [vmem:[#allocation12_spill] sm:$0xff] %v10035_v27  ;;  %v6721_v37 = vpack.c.bf16 %v428_v22, %v427_v21  ;;  %v1302_v38 = vshll.u32 %v1231_v18, 16  ;;  %v6340_v41 = vcombine.low %v1640_v12, %v1641_v33  ;;  %v1306_v43 = vshrl.u32 %v1231_v18, 16  ;;  %v6886_v12 = vld [vmem:[%s7690_s20 + $0x70] sm:$0xff]  }
  0x3b   : > { %v1638_v28 = vsel %vm7856_vm2, %v1122_v25, 0  ;;  %v349_v45 = vmul.f32 %v6704_v19, %v7708_v24  ;;  %v387_v44 = vadd.f32 %v7719_v30, %v348_v53  ;;  %vm7920_vm8 = vcmp.ne.s32.totalorder %v850_v39, 0  ;;  %v7487_v22 = vld [vmem:[%s9874_s3 + $0xc8] sm:$0xff]  }
  0x3c   : > { %v6339_v35 = vcombine.low %v1638_v28, %v1639_v31  ;;  %6889 = vst [vmem:[#allocation2 + $0x18] sm:$0xff] %v6721_v37   ;;  %v1304_v48 = vrot.slane %v1302_v38, 5  ;;  %v1848_v51 = vshrl.u32 %v6340_v41, 16  ;;  %v1851_v52 = vshll.u32 %v6340_v41, 16  ;;  %7146 = vmatpush3.bf16.msra.mxu0 %v7496_v23  ;;  %vm1223_vm9 = vmpackc.low %vm7920_vm8, %vm7920_vm8  ;;  %v7488_v38 = vld [vmem:[%s9874_s3 + $0x88] sm:$0xff]  }
  0x3d   : > { %v1308_v54 = vrot.slane %v1306_v43, 4  ;;  %v388_v56 = vadd.f32 %v7719_v30, %v349_v45  ;;  %v419_v1 = vmax.f32 %v387_v44, 0.0  ;;  %7147 = vmatprep.subr.bf16.mxu0 %v7506_v32  ;;  %v10039_v11 = vmov 0 }
  0x3e   : > { %v1839_v4 = vshrl.u32 %v6339_v35, 16  ;;  %v1842_v47 = vshll.u32 %v6339_v35, 16  ;;  %v1305_v0 = vsel %vm7784_vm10, %v7795_v34, %v1304_v48  ;;  %v1850_v39 = vrot.slane %v1848_v51, 3  ;;  %v7491_v51 = vld [vmem:[%s9874_s3 + $0xd0] sm:$0xff]  }
  0x3f   : > { %v1853_v5 = vrot.slane %v1851_v52, 4  ;;  %v1309_v60 = vor.u32 %v1308_v54, %v1304_v48  ;;  %vm7938_vm14 = vcmp.ne.s16.totalorder %v1305_v0, 0  ;;  %v420_v16 = vmax.f32 %v388_v56, 0.0 }
  0x40   : > { %v1841_v61 = vrot.slane %v1839_v4, 3  ;;  %v1844_v62 = vrot.slane %v1842_v47, 4  ;;  %v10040_v11 = vsel %vm7938_vm14, 4294967295, %v10039_v11  ;;  %v1618_v15 = vsel %vm7938_vm14, %v7914_v42, 0  ;;  %7148 = vmatpush3.bf16.msra.mxu0 %v7508_v29  ;;  %v1126_v4 = vld [vmem:[#allocation2 + $0x74] sm:$0xf] }
  0x41   : > { %10041 = vst [vmem:[#allocation13_spill] sm:$0xff] %v10040_v11  ;;  %v451_v18 = vmin.f32 %v419_v1, 6.0  ;;  %v7948_v19 = vor.u32 %v1853_v5, %v1850_v39  ;;  %v1310_v25 = vrot.slane %v1309_v60, 4  ;;  %v1255_v36 = vsel %vm1223_vm9, 65537, %v9900_v3  ;;  %v7492_v60 = vld [vmem:[%s9874_s3 + $0x90] sm:$0xff]  }
  0x42   : > { %v7943_v13 = vor.u32 %v1844_v62, %v1841_v61  ;;  %v6659_v21 = vunpack.c.l.bf16 %v6874_v57  ;;  %v452_v23 = vmin.f32 %v420_v16, 6.0  ;;  %v1542_v26 = vshll.u32 %v1255_v36, 16 }
  0x43   : > { %v1546_v28 = vshrl.u32 %v1255_v36, 16  ;;  %v6660_v31 = vunpack.c.h.bf16 %v6874_v57  ;;  %v1103_v32 = vld [vmem:[#allocation2 + $0x18] sm:$0xf]  ;;  %v1315_v33 = vsel %vm7784_vm10, %v1310_v25, %v7775_v7  ;;  %v6707_v37 = vunpack.c.l.bf16 %v6886_v12 }
  0x44   : > { %v1855_v53 = vsel %vm9878_vm1, %v7943_v13, %v7948_v19  ;;  %v326_v35 = vmul.f32 %v6659_v21, %v7708_v24  ;;  %vm7969_vm15 = vcmp.ne.s16.totalorder %v1315_v33, 0  ;;  %v10042_v41 = vmov 0 }
  0x45   : > { %5252 = vmatmul.mubr.bf16.vlgmr.msra.gmra.mrb[0].mxu1 %v1855_v53  ;;  %v10043_v41 = vsel %vm7969_vm15, 4294967295, %v10042_v41  ;;  %v6781_v42 = vpack.c.bf16 %v452_v23, %v451_v18  ;;  %v1544_v43 = vrot.slane %v1542_v26, 5  ;;  %v1548_v45 = vrot.slane %v1546_v28, 4  ;;  %v8004_v23 = vld [vmem:[%s7690_s20 + $0x20] sm:$0xff]   ;;  %v7495_v28 = vld [vmem:[%s9874_s3 + $0x98] sm:$0xff]  }
  0x46   : > { %10044 = vst [vmem:[#allocation14_spill] sm:$0xff] %v10043_v41  ;;  %7032 = vmatpush3.bf16.msra.mxu1 %v7485_v9  ;;  %5259 = vmatprep.mubr.bf16.mxu1 %v7490_v14  ;;  %v1619_v44 = vsel %vm7969_vm15, %v1103_v32, 0  ;;  %v327_v47 = vmul.f32 %v6660_v31, %v7708_v24  ;;  %v365_v48 = vadd.f32 %v7719_v30, %v326_v35  ;;  %v624_v49 = vadd.s32 48, %v7656_v6  ;;  %v7497_v31 = vld [vmem:[#allocation2 + $0x18] sm:$0xff]  }
  0x47   : > { %7033 = vmatprep.subr.bf16.mxu1 %v7487_v22  ;;  %v6329_v52 = vcombine.low %v1618_v15, %v1619_v44  ;;  %6901 = vst [vmem:[#allocation2 + $0x78] sm:$0xff] %v6781_v42   ;;  %v1545_v54 = vsel %vm7784_vm10, %v7795_v34, %v1544_v43  ;;  %v1549_v56 = vor.u32 %v1548_v45, %v1544_v43  ;;  %v6708_v57 = vunpack.c.h.bf16 %v6886_v12  ;;  %v7493_v12 = vld [vmem:[%s9874_s3 + $0xd8] sm:$0xff]  }
  0x48   : > { %vm7984_vm4 = vcmp.ne.s16.totalorder %v1545_v54, 0  ;;  %v10045_v61 = vmov 0  ;;  %v366_v62 = vadd.f32 %v7719_v30, %v327_v47  ;;  %v397_v0 = vmax.f32 %v365_v48, 0.0  ;;  %v6875_v22 = vld [vmem:[%s7690_s20 + $0x18] sm:$0xff]  }
  0x49   : > { %v10046_v61 = vsel %vm7984_vm4, 4294967295, %v10045_v61  ;;  %v696_v1 = vand.u32 15, %v624_v49  ;;  %v1749_v29 = vshrl.u32 %v6329_v52, 16  ;;  %v1752_v39 = vshll.u32 %v6329_v52, 16  ;;  %v7514_v35 = vld [vmem:[%s9874_s3 + $0x158] sm:$0xff]   ;;  %v7499_v52 = vld [vmem:[%s9874_s3 + $0xe0] sm:$0xff]  }
  0x4a   : > { %10047 = vst [vmem:[#allocation15_spill] sm:$0xff] %v10046_v61  ;;  %v1550_v5 = vrot.slane %v1549_v56, 4  ;;  %v1642_v9 = vsel %vm7984_vm4, %v1126_v4, 0  ;;  %7034 = vmatpush3.bf16.msra.mxu1 %v7488_v38  ;;  %v398_v14 = vmax.f32 %v366_v62, 0.0  ;;  %v429_v15 = vmin.f32 %v397_v0, 6.0  ;;  %7149 = vmatprep.subr.bf16.mxu0 %v7514_v35 }
  0x4b   : > { %vm1040_vm5 = vcmp.ne.s32.totalorder %v696_v1, 0  ;;  %v350_v16 = vmul.f32 %v6707_v37, %v7708_v24  ;;  %7035 = vmatprep.subr.bf16.mxu1 %v7491_v51  ;;  %v1751_v18 = vrot.slane %v1749_v29, 3  ;;  %v1754_v25 = vrot.slane %v1752_v39, 4  ;;  %v1104_v54 = vld [vmem:[#allocation2 + $0x1c] sm:$0xf] }
  0x4c   : > { %v1555_v36 = vsel %vm7784_vm10, %v1550_v5, %v7775_v7  ;;  %vm1201_vm8 = vmpackc.low %vm1040_vm5, %vm1040_vm5  ;;  %v351_v21 = vmul.f32 %v6708_v57, %v7708_v24  ;;  %v10048_v26 = vmov 0  ;;  %v430_v53 = vmin.f32 %v398_v14, 6.0 }
  0x4d   : > { %vm8006_vm9 = vcmp.ne.s16.totalorder %v1555_v36, 0  ;;  %v1233_v32 = vsel %vm1201_vm8, 65537, %v9900_v3  ;;  %v389_v33 = vadd.f32 %v7719_v30, %v350_v16  ;;  %v8018_v37 = vor.u32 %v1754_v25, %v1751_v18  ;;  %v7500_v18 = vld [vmem:[%s9874_s3 + $0xa0] sm:$0xff]  }
  0x4e   : > { %v10049_v26 = vsel %vm8006_vm9, 4294967295, %v10048_v26  ;;  %v1322_v38 = vshll.u32 %v1233_v32, 16  ;;  %v1326_v42 = vshrl.u32 %v1233_v32, 16  ;;  %v390_v43 = vadd.f32 %v7719_v30, %v351_v21  ;;  %v1127_v45 = vld [vmem:[#allocation2 + $0x78] sm:$0xf]  ;;  %7036 = vmatpush3.bf16.msra.mxu1 %v7492_v60 }
  0x4f   : > { %10050 = vst [vmem:[#allocation16_spill] sm:$0xff] %v10049_v26  ;;  %v6726_v44 = vpack.c.bf16 %v430_v53, %v429_v15  ;;  %v6663_v4 = vunpack.c.l.bf16 %v6875_v22  ;;  %v6664_v47 = vunpack.c.h.bf16 %v6875_v22  ;;  %v6667_v48 = vunpack.c.l.bf16 %v8004_v23  ;;  %7037 = vmatprep.subr.bf16.mxu1 %v7493_v12 }
  0x50   : > { %v1756_v49 = vsel %vm9878_vm1, %v7871_v8, %v8018_v37  ;;  %v1643_v51 = vsel %vm8006_vm9, %v1127_v45, 0  ;;  %v1324_v56 = vrot.slane %v1322_v38, 5  ;;  %v1328_v57 = vrot.slane %v1326_v42, 4  ;;  %v7515_v8 = vld [vmem:[%s9874_s3 + $0x118] sm:$0xff]  }
  0x51   : > { %5164 = vmatmul.mubr.bf16.gmra.mrb[4].mxu0 %v1756_v49  ;;  %v6341_v62 = vcombine.low %v1642_v9, %v1643_v51  ;;  %6890 = vst [vmem:[#allocation2 + $0x20] sm:$0xff] %v6726_v44   ;;  %v421_v0 = vmax.f32 %v389_v33, 0.0  ;;  %v422_v1 = vmax.f32 %v390_v43, 0.0  ;;  %v648_v29 = vadd.s32 240, %v7656_v6  ;;  %v7502_v33 = vld [vmem:[%s9874_s3 + $0xa8] sm:$0xff]  }
  0x52   : > { %5171 = vmatprep.mubr.bf16.mxu0 %v7497_v31  ;;  %v1325_v39 = vsel %vm7784_vm10, %v7795_v34, %v1324_v56  ;;  %v1329_v5 = vor.u32 %v1328_v57, %v1324_v56  ;;  %v328_v60 = vmul.f32 %v6663_v4, %v7708_v24  ;;  %v329_v12 = vmul.f32 %v6664_v47, %v7708_v24  ;;  %v7518_v31 = vld [vmem:[%s9874_s3 + $0x160] sm:$0xff]   ;;  %v2823_v44 = vld [vmem:[#allocation2 + $0xc] sm:$0x8]  ;;  %v7498_v47 = vld [vmem:[#allocation2 + $0x78] sm:$0xff]  }
  0x53   : > { %v1857_v9 = vshrl.u32 %v6341_v62, 16  ;;  %v1860_v14 = vshll.u32 %v6341_v62, 16  ;;  %7038 = vmatpush3.bf16.msra.mxu1 %v7495_v28  ;;  %vm8039_vm5 = vcmp.ne.s16.totalorder %v1325_v39, 0  ;;  %v10051_v15 = vmov 0  ;;  %7150 = vmatpush3.bf16.msra.mxu0 %v7515_v8  ;;  %v7501_v28 = vld [vmem:[%s9874_s3 + $0xe8] sm:$0xff]   ;;  %v7505_v56 = vld [vmem:[%s9874_s3 + $0xf0] sm:$0xff]  }
  0x54   : > { %v10052_v15 = vsel %vm8039_vm5, 4294967295, %v10051_v15  ;;  %v453_v16 = vmin.f32 %v421_v0, 6.0  ;;  %7039 = vmatprep.subr.bf16.mxu1 %v7499_v52  ;;  %v1330_v25 = vrot.slane %v1329_v5, 4  ;;  %v1620_v36 = vsel %vm8039_vm5, %v1104_v54, 0  ;;  %7151 = vmatprep.subr.bf16.mxu0 %v7518_v31  ;;  %v2824_v57 = vld [vmem:[#allocation2 + $0x10] sm:$0xf] }
  0x55   : > { %10053 = vst [vmem:[#allocation17_spill] sm:$0xff] %v10052_v15  ;;  %v454_v21 = vmin.f32 %v422_v1, 6.0  ;;  %v864_v22 = vand.u32 15, %v648_v29  ;;  %v1859_v53 = vrot.slane %v1857_v9, 3  ;;  %v1862_v32 = vrot.slane %v1860_v14, 4 }
  0x56   : > { %v367_v35 = vadd.f32 %v7719_v30, %v328_v60  ;;  %v368_v38 = vadd.f32 %v7719_v30, %v329_v12  ;;  %v1335_v42 = vsel %vm7784_vm10, %v1330_v25, %v7775_v7  ;;  %v626_v45 = vadd.s32 64, %v7656_v6  ;;  %v2825_v14 = vld [vmem:[#allocation2 + $0x14] sm:$0xf] }
  0x57   : > { %v6786_v43 = vpack.c.bf16 %v454_v21, %v453_v16  ;;  %vm1064_vm8 = vcmp.ne.s32.totalorder %v864_v22, 0  ;;  %v8063_v4 = vor.u32 %v1862_v32, %v1859_v53  ;;  %vm8065_vm11 = vcmp.ne.s16.totalorder %v1335_v42, 0  ;;  %7040 = vmatpush3.bf16.msra.mxu1 %v7500_v18  ;;  %v1128_v21 = vld [vmem:[#allocation2 + $0x7c] sm:$0xf]  ;;  %v2826_v32 = vld [vmem:[#allocation2 + $0x18] sm:$0xf] }
  0x58   : > { %v10054_v49 = vmov 0  ;;  %vm1225_vm1 = vmpackc.low %vm1064_vm8, %vm1064_vm8  ;;  %v399_v30 = vmax.f32 %v367_v35, 0.0  ;;  %v400_v51 = vmax.f32 %v368_v38, 0.0  ;;  %v1105_v52 = vld [vmem:[#allocation2 + $0x20] sm:$0xf]  ;;  %7041 = vmatprep.subr.bf16.mxu1 %v7501_v28  ;;  %v6668_v62 = vunpack.c.h.bf16 %v8004_v23  ;;  %v7509_v28 = vld [vmem:[%s9874_s3 + $0xf8] sm:$0xff]  }
  0x59   : > { %v10055_v49 = vsel %vm8065_vm11, 4294967295, %v10054_v49  ;;  %6902 = vst [vmem:[#allocation2 + $0x80] sm:$0xff] %v6786_v43   ;;  %v1257_v54 = vsel %vm1225_vm1, 65537, %v9900_v3  ;;  %v8075_v0 = vmul.f32 %v6667_v48, %v7708_v24  ;;  %vm10057_vm8 = vsmask.f32 4352  ;;  %v7520_v23 = vld [vmem:[%s9874_s3 + $0x120] sm:$0xff]  }
  0x5a   : > { %10056 = vst [vmem:[#allocation18_spill] sm:$0xff] %v10055_v49  ;;  %v1864_v1 = vsel %vm10057_vm8, %v7948_v19, %v8063_v4  ;;  %v1621_v29 = vsel %vm8065_vm11, %v1105_v52, 0  ;;  %v1562_v8 = vshll.u32 %v1257_v54, 16  ;;  %v1566_v39 = vshrl.u32 %v1257_v54, 16  ;;  %v7507_v19 = vld [vmem:[%s9874_s3 + $0xb0] sm:$0xff]   ;;  %7152 = vmatpush3.bf16.msra.mxu0 %v7520_v23  ;;  %v7512_v54 = vld [vmem:[%s9874_s3 + $0x1c0] sm:$0xff]  }
  0x5b   : > { %5260 = vmatmul.mubr.bf16.gmra.mrb[4].mxu1 %v1864_v1  ;;  %v6330_v5 = vcombine.low %v1620_v36, %v1621_v29  ;;  %v431_v60 = vmin.f32 %v399_v30, 6.0  ;;  %v432_v12 = vmin.f32 %v400_v51, 6.0  ;;  %v710_v9 = vand.u32 15, %v626_v45  ;;  %v7503_v1 = vld [vmem:[#allocation2 + $0x20] sm:$0xff]  }
  0x5c   : > { %5267 = vmatprep.mubr.bf16.mxu1 %v7498_v47  ;;  %v1564_v48 = vrot.slane %v1562_v8, 5  ;;  %v1568_v16 = vrot.slane %v1566_v39, 4  ;;  %7042 = vmatpush3.bf16.msra.mxu1 %v7502_v33  ;;  %vm10058_vm8 = vcmp.ne.s16.totalorder %v7759_v58, 0  ;;  %v2857_v33 = vsel %vm7800_vm12, %v2824_v57, 0 }
  0x5d   : > { %v2856_v18 = vsel %vm10058_vm8, %v2823_v44, 0  ;;  %v1758_v25 = vshrl.u32 %v6330_v5, 16  ;;  %v1761_v36 = vshll.u32 %v6330_v5, 16  ;;  %7043 = vmatprep.subr.bf16.mxu1 %v7505_v56  ;;  %v6731_v22 = vpack.c.bf16 %v432_v12, %v431_v60  ;;  %v7510_v44 = vld [vmem:[%s9874_s3 + $0xb8] sm:$0xff]   ;;  %v1106_v60 = vld [vmem:[#allocation2 + $0x24] sm:$0xf] }
  0x5e   : > { %vm1042_vm9 = vcmp.ne.s32.totalorder %v710_v9, 0  ;;  %v1565_v31 = vsel %vm7784_vm10, %v7795_v34, %v1564_v48  ;;  %v1569_v53 = vor.u32 %v1568_v16, %v1564_v48  ;;  %v2858_v35 = vsel %vm7816_vm13, %v2825_v14, 0 }
  0x5f   : > { %vm1203_vm1 = vmpackc.low %vm1042_vm9, %vm1042_vm9  ;;  %v1760_v38 = vrot.slane %v1758_v25, 3  ;;  %v1763_v42 = vrot.slane %v1761_v36, 4  ;;  %vm8101_vm8 = vcmp.ne.s16.totalorder %v1565_v31, 0  ;;  %v10059_v43 = vmov 0  ;;  %6891 = vst [vmem:[#allocation2 + $0x28] sm:$0xff] %v6731_v22  }
  0x60   : > { %v10060_v43 = vsel %vm8101_vm8, 4294967295, %v10059_v43  ;;  %v1235_v45 = vsel %vm1203_vm1, 65537, %v9900_v3  ;;  %v1129_v47 = vld [vmem:[#allocation2 + $0x80] sm:$0xf]  ;;  %v1570_v30 = vrot.slane %v1569_v53, 4  ;;  %v1644_v51 = vsel %vm8101_vm8, %v1128_v21, 0  ;;  %7044 = vmatpush3.bf16.msra.mxu1 %v7507_v19 }
  0x61   : > { %10061 = vst [vmem:[#allocation19_spill] sm:$0xff] %v10060_v43  ;;  %v6377_v52 = vcombine.low %v2856_v18, %v2857_v33  ;;  %v331_v56 = vmul.f32 %v6668_v62, %v7708_v24  ;;  %v8115_v57 = vor.u32 %v1763_v42, %v1760_v38  ;;  %v1342_v29 = vshll.u32 %v1235_v45, 16  ;;  %7045 = vmatprep.subr.bf16.mxu1 %v7509_v28  ;;  %v1130_v12 = vld [vmem:[#allocation2 + $0x84] sm:$0xf] }
  0x62   : > { %v1346_v8 = vshrl.u32 %v1235_v45, 16  ;;  %v2859_v39 = vsel %vm7835_vm0, %v2826_v32, 0  ;;  %v1575_v5 = vsel %vm7784_vm10, %v1570_v30, %v7775_v7  ;;  %vm10062_vm9 = vsmask.f32 4352  ;;  %v8149_v32 = vld [vmem:[%s9873_s2] ss:$0 sm:$0xff] }
  0x63   : > { %v6378_v9 = vcombine.low %v2858_v35, %v2859_v39  ;;  %v2973_v14 = vshrl.u32 %v6377_v52, 16  ;;  %v2976_v23 = vshll.u32 %v6377_v52, 16  ;;  %v1765_v24 = vsel %vm10062_vm9, %v8018_v37, %v8115_v57 }
  0x64   : > { %vm8125_vm1 = vcmp.ne.s16.totalorder %v1575_v5, 0  ;;  %v10063_v62 = vmov 0  ;;  %v1344_v48 = vrot.slane %v1342_v29, 5  ;;  %v1348_v16 = vrot.slane %v1346_v8, 4  ;;  %5172 = vmatmul.mubr.bf16.gmra.mrb[8].mxu0 %v1765_v24  ;;  %7046 = vmatpush3.bf16.msra.mxu1 %v7510_v44 }
  0x65   : > { %v10064_v62 = vsel %vm8125_vm1, 4294967295, %v10063_v62  ;;  %v1645_v19 = vsel %vm8125_vm1, %v1129_v47, 0  ;;  %vm10066_vm0 = vcmp.ne.s16.totalorder %v7795_v34, 0  ;;  %v8133_v25 = vrot.slane %v2973_v14, 3  ;;  %5179 = vmatprep.mubr.bf16.mxu0 %v7503_v1  ;;  %7255 = vmatprep.subr.bf16.mxu1 %v7512_v54 }
  0x66   : > { %10065 = vst [vmem:[#allocation20_spill] sm:$0xff] %v10064_v62  ;;  %v1646_v18 = vsel %vm10066_vm0, %v1130_v12, 0  ;;  %v8135_v36 = vrot.slane %v2976_v23, 4  ;;  %v6342_v21 = vcombine.low %v1644_v51, %v1645_v19  ;;  %v1345_v37 = vsel %vm7784_vm10, %v7795_v34, %v1344_v48  ;;  %v1107_v47 = vld [vmem:[#allocation2 + $0x28] sm:$0xf] }
  0x67   : > { %v1349_v22 = vor.u32 %v1348_v16, %v1344_v48  ;;  %v6343_v28 = vcombine.low %v1646_v18, %v1646_v18  ;;  %vm8140_vm9 = vcmp.ne.s16.totalorder %v1345_v37, 0  ;;  %v10067_v31 = vmov 0  ;;  %v8169_v16 = vld [vmem:[%s7690_s20 + $0x28] sm:$0xff]  }
  0x68   : > { %v10068_v31 = vsel %vm8140_vm9, 4294967295, %v10067_v31  ;;  %v2979_v53 = vor.u32 %v8135_v36, %v8133_v25  ;;  %v369_v33 = vadd.f32 %v8149_v32, %v8075_v0  ;;  %v370_v35 = vadd.f32 %v8149_v32, %v331_v56  ;;  %v7523_v56 = vld [vmem:[%s9874_s3 + $0x168] sm:$0xff]  }
  0x69   : > { %10069 = vst [vmem:[#allocation21_spill] sm:$0xff] %v10068_v31  ;;  %v1866_v38 = vshrl.u32 %v6342_v21, 16  ;;  %v1869_v42 = vshll.u32 %v6342_v21, 16  ;;  %v1350_v45 = vrot.slane %v1349_v22, 4  ;;  %v1622_v44 = vsel %vm8140_vm9, %v1106_v60, 0  ;;  %7153 = vmatprep.subr.bf16.mxu0 %v7523_v56  ;;  %v7524_v19 = vld [vmem:[%s9874_s3 + $0x128] sm:$0xff]  }
  0x6a   : > { %v1875_v30 = vshrl.u32 %v6343_v28, 16  ;;  %v1878_v51 = vshll.u32 %v6343_v28, 16  ;;  %v2981_v52 = vshrl.u32 %v6378_v9, 16  ;;  %v2984_v54 = vshll.u32 %v6378_v9, 16  ;;  %v7504_v9 = vld [vmem:[#allocation2 + $0x80] sm:$0xff]   ;;  %7154 = vmatpush3.bf16.msra.mxu0 %v7524_v19  ;;  %v7529_v56 = vld [vmem:[%s9874_s3 + $0x170] sm:$0xff]  }
  0x6b   : > { %v1868_v1 = vrot.slane %v1866_v38, 3  ;;  %v1871_v29 = vrot.slane %v1869_v42, 4  ;;  %v1355_v0 = vsel %vm7784_vm10, %v1350_v45, %v7775_v7  ;;  %v401_v8 = vmax.f32 %v369_v33, 0.0  ;;  %v2827_v33 = vld [vmem:[#allocation2 + $0x1c] sm:$0xf]  ;;  %7155 = vmatprep.subr.bf16.mxu0 %v7529_v56 }
  0x6c   : > { %vm8162_vm0 = vcmp.ne.s16.totalorder %v1355_v0, 0  ;;  %v10070_v39 = vmov 0  ;;  %v1877_v5 = vrot.slane %v1875_v30, 3  ;;  %v1880_v60 = vrot.slane %v1878_v51, 4  ;;  %v1108_v19 = vld [vmem:[#allocation2 + $0x2c] sm:$0xf] }
  0x6d   : > { %v10071_v39 = vsel %vm8162_vm0, 4294967295, %v10070_v39  ;;  %v2983_v12 = vrot.slane %v2981_v52, 3  ;;  %v1872_v14 = vor.u32 %v1871_v29, %v1868_v1  ;;  %v1623_v23 = vsel %vm8162_vm0, %v1107_v47, 0  ;;  %v2067_v11 = vld [vmem:[#allocation2 + $0x28] sm:$0xf] }
  0x6e   : > { %10072 = vst [vmem:[#allocation22_spill] sm:$0xff] %v10071_v39  ;;  %v2986_v24 = vrot.slane %v2984_v54, 4  ;;  %v402_v48 = vmax.f32 %v370_v35, 0.0  ;;  %v6331_v18 = vcombine.low %v1622_v44, %v1623_v23  ;;  %v1881_v25 = vor.u32 %v1880_v60, %v1877_v5  ;;  %v2828_v35 = vld [vmem:[#allocation2 + $0x20] sm:$0xf]  ;;  %v7511_v60 = vld [vmem:[#allocation2 + $0x28] sm:$0xff]   ;;  %7156 = vmatpush3.bf16.msra.mxu0 %v7530_v46 }
  0x6f   : > { %v433_v36 = vmin.f32 %v401_v8, 6.0  ;;  %v628_v21 = vadd.s32 80, %v7656_v6  ;;  %vm10073_vm1 = vsmask.f32 4352  ;;  %v6671_v44 = vunpack.c.l.bf16 %v8169_v16 }
  0x70   : > { %v1873_v37 = vsel %vm10073_vm1, %v8063_v4, %v1872_v14  ;;  %v8177_v22 = vor.u32 %v2986_v24, %v2983_v12  ;;  %v434_v28 = vmin.f32 %v402_v48, 6.0  ;;  %v1767_v38 = vshrl.u32 %v6331_v18, 16  ;;  %vm10074_vm12 = vmmov %vm10073_vm1  ;;  %v2059_v24 = vld [vmem:[#allocation2 + $0x8] sm:$0xf] }
  0x71   : > { %5268 = vmatmul.mubr.bf16.gmra.mrb[8].mxu1 %v1873_v37  ;;  %v1770_v42 = vshll.u32 %v6331_v18, 16  ;;  %v724_v45 = vand.u32 15, %v628_v21  ;;  %v1882_v47 = vsel %vm10074_vm12, %v1872_v14, %v1881_v25  ;;  %v619_v51 = vadd.s32 8, %v7656_v6 }
  0x72   : > { %5275 = vmatprep.mubr.bf16.mxu1 %v7504_v9  ;;  %v6736_v30 = vpack.c.bf16 %v434_v28, %v433_v36  ;;  %v621_v4 = vadd.s32 24, %v7656_v6  ;;  %v1769_v52 = vrot.slane %v1767_v38, 3  ;;  %v2988_v1 = vsel %vm10073_vm1, %v2979_v53, %v8177_v22 }
  0x73   : > { %v1772_v54 = vrot.slane %v1770_v42, 4  ;;  %vm1044_vm8 = vcmp.ne.s32.totalorder %v724_v45, 0  ;;  %v661_v29 = vand.u32 15, %v619_v51  ;;  %v2225_v8 = vrot.slane %v1276_v2, 7 }
  0x74   : > { %6892 = vst [vmem:[#allocation2 + $0x30] sm:$0xff] %v6736_v30   ;;  %vm1205_vm4 = vmpackc.low %vm1044_vm8, %vm1044_vm8  ;;  %v675_v0 = vand.u32 15, %v621_v4  ;;  %v2860_v53 = vsel %vm7938_vm14, %v2827_v33, 0  ;;  %v2861_v14 = vsel %vm7969_vm15, %v2828_v35, 0  ;;  %v10077_v30 = vmov 0 }
  0x75   : > { %v8190_v5 = vor.u32 %v1772_v54, %v1769_v52  ;;  %v1237_v12 = vsel %vm1205_vm4, 65537, %v9900_v3  ;;  %vm1067_vm12 = vcmp.ne.s32.totalorder %v661_v29, 15  ;;  %v8206_v18 = vor.u32 %v2225_v8, %v1272_v59  ;;  %v8232_v4 = vld [vmem:[%s9872_s1] ss:$0 sm:$0xff] }
  0x76   : > { %v1362_v9 = vshll.u32 %v1237_v12, 16  ;;  %v1366_v23 = vshrl.u32 %v1237_v12, 16  ;;  %vm8197_vm8 = vcmp.ne.s32.totalorder %v675_v0, 15  ;;  %vm2157_vm4 = vmpackc.low %vm1067_vm12, %vm1067_vm12  ;;  %v8208_v25 = vrot.slane %v2225_v8, 4 }
  0x77   : > { %v1774_v48 = vsel %vm10073_vm1, %v8115_v57, %v8190_v5  ;;  %v6379_v36 = vcombine.low %v2860_v53, %v2861_v14  ;;  %vm2159_vm13 = vmpackc.low %vm8197_vm8, %vm8197_vm8  ;;  %v2189_v28 = vsel %vm2157_vm4, 65537, %v9900_v3  ;;  %v6672_v57 = vunpack.c.h.bf16 %v8169_v16 }
  0x78   : > { %5180 = vmatmul.mubr.bf16.gmra.mrb[12].mxu0 %v1774_v48  ;;  %v1364_v21 = vrot.slane %v1362_v9, 5  ;;  %v1368_v37 = vrot.slane %v1366_v23, 4  ;;  %v2191_v59 = vsel %vm2159_vm13, 65537, %v9900_v3  ;;  %v2231_v33 = vshrl.u32 %v2189_v28, 16  ;;  %v2060_v9 = vld [vmem:[#allocation2 + $0xc] sm:$0xf] }
  0x79   : > { %5276 = vmatmul.mubr.bf16.gmra.mrb[12].mxu1 %v1882_v47  ;;  %5187 = vmatprep.mubr.bf16.mxu0 %v7511_v60  ;;  %v2234_v35 = vshll.u32 %v2189_v28, 16  ;;  %vm9890_vm12 = vcmp.ne.s16.totalorder %v8206_v18, 0  ;;  %v2249_v45 = vshrl.u32 %v2191_v59, 16  ;;  %v2252_v16 = vshll.u32 %v2191_v59, 16  ;;  %v2061_v23 = vld [vmem:[#allocation2 + $0x10] sm:$0xf] }
  0x7a   : > { %5316 = vmatprep.mubr.bf16.mxu1 %v2988_v1  ;;  %v1365_v38 = vsel %vm7784_vm10, %v7795_v34, %v1364_v21  ;;  %v1369_v42 = vor.u32 %v1368_v37, %v1364_v21  ;;  %v2233_v47 = vrot.slane %v2231_v33, 7  ;;  %v2542_v51 = vsel %vm9890_vm12, %v2059_v24, 0 }
  0x7b   : > { %vm8223_vm8 = vcmp.ne.s16.totalorder %v1365_v38, 0  ;;  %v332_v52 = vmul.f32 %v8232_v4, %v6671_v44  ;;  %vm10080_vm13 = vsmask.f32 4368  ;;  %vm10081_vm1 = vsmask.f32 256 }
  0x7c   : > { %v10078_v30 = vsel %vm8223_vm8, 4294967295, %v10077_v30  ;;  %v1370_v54 = vrot.slane %v1369_v42, 4  ;;  %v1624_v1 = vsel %vm8223_vm8, %v1108_v19, 0  ;;  %vm8239_vm4 = vmor %vm10081_vm1, %vm10080_vm13  ;;  %v8243_v0 = vrot.slane %v2249_v45, 7  ;;  %v1109_v56 = vld [vmem:[#allocation2 + $0x30] sm:$0xf] }
  0x7d   : > { %10079 = vst [vmem:[#allocation23_spill] sm:$0xff] %v10078_v30  ;;  %v2990_v8 = vshrl.u32 %v6379_v36, 16  ;;  %v2236_v60 = vor.u32 %v2234_v35, %v2233_v47  ;;  %v2238_v12 = vrot.slane %v2233_v47, 4  ;;  %v2993_v53 = vshll.u32 %v6379_v36, 16  ;;  %v7534_v19 = vld [vmem:[%s9874_s3 + $0x178] sm:$0xff]  }
  0x7e   : > { %v333_v14 = vmul.f32 %v8232_v4, %v6672_v57  ;;  %v1375_v44 = vsel %vm7784_vm10, %v1370_v54, %v7775_v7  ;;  %v2254_v2 = vor.u32 %v2252_v16, %v8243_v0  ;;  %v371_v48 = vadd.f32 %v8149_v32, %v332_v52  ;;  %v2062_v36 = vld [vmem:[#allocation2 + $0x14] sm:$0xf]  ;;  %7157 = vmatprep.subr.bf16.mxu0 %v7534_v19  ;;  %v7535_v35 = vld [vmem:[%s9874_s3 + $0x138] sm:$0xff]   ;;  %v2068_v30 = vld [vmem:[#allocation2 + $0x2c] sm:$0xf] }
  0x7f   : > { %v2992_v24 = vrot.slane %v2990_v8, 3  ;;  %vm8254_vm13 = vcmp.ne.s16.totalorder %v1375_v44, 0  ;;  %v10084_v21 = vmov 0  ;;  %v2237_v37 = vsel %vm8239_vm4, %v8208_v25, %v2236_v60  ;;  %7158 = vmatpush3.bf16.msra.mxu0 %v7535_v35 }
  0x80   : > { %v10085_v21 = vsel %vm8254_vm13, 4294967295, %v10084_v21  ;;  %v8264_v28 = vsel %vm8239_vm4, %v2238_v12, %v8206_v18  ;;  %v2995_v57 = vrot.slane %v2993_v53, 4  ;;  %v1625_v46 = vsel %vm8254_vm13, %v1109_v56, 0  ;;  %v7538_v12 = vld [vmem:[%s9874_s3 + $0x200] sm:$0xff]  }
  0x81   : > { %10086 = vst [vmem:[#allocation24_spill] sm:$0xff] %v10085_v21  ;;  %v2255_v59 = vsel %vm8239_vm4, %v8208_v25, %v2254_v2  ;;  %vm8271_vm12 = vcmp.ne.s16.totalorder %v2237_v37, 0  ;;  %vm9892_vm15 = vcmp.ne.s16.totalorder %v8264_v28, 0  ;;  %v6332_v38 = vcombine.low %v1624_v1, %v1625_v46  ;;  %v2829_v2 = vld [vmem:[#allocation2 + $0x24] sm:$0xf]  ;;  %7391 = vmatprep.subr.bf16.mxu0 %v7538_v12 }
  0x82   : > { %vm8279_vm1 = vcmp.ne.s16.totalorder %v2255_v59, 0  ;;  %v2543_v45 = vsel %vm8271_vm12, %v2060_v9, 0  ;;  %v2544_v16 = vsel %vm9892_vm15, %v2061_v23, 0  ;;  %v372_v54 = vadd.f32 %v8149_v32, %v333_v14 }
  0x83   : > { %v2545_v47 = vsel %vm8279_vm1, %v2062_v36, 0  ;;  %v6360_v52 = vcombine.low %v2542_v51, %v2543_v45  ;;  %v1776_v8 = vshrl.u32 %v6332_v38, 16  ;;  %v1779_v56 = vshll.u32 %v6332_v38, 16  ;;  %v7516_v45 = vld [vmem:[#allocation2 + $0x30] sm:$0xff]  }
  0x84   : > { %v6361_v1 = vcombine.low %v2544_v16, %v2545_v47  ;;  %v403_v60 = vmax.f32 %v371_v48, 0.0  ;;  %v8293_v9 = vor.u32 %v2995_v57, %v2992_v24  ;;  %v404_v23 = vmax.f32 %v372_v54, 0.0  ;;  %v7513_v47 = vld [vmem:[%s9874_s3 + $0x180] sm:$0xff]  }
  0x85   : > { %v2660_v53 = vshrl.u32 %v6360_v52, 16  ;;  %v2662_v44 = vshll.u32 %v6360_v52, 16  ;;  %v1778_v19 = vrot.slane %v1776_v8, 3  ;;  %v1781_v36 = vrot.slane %v1779_v56, 4  ;;  %v2830_v56 = vld [vmem:[#allocation2 + $0x28] sm:$0xf] }
  0x86   : > { %v2667_v51 = vshll.u32 %v6361_v1, 16  ;;  %v435_v37 = vmin.f32 %v403_v60, 6.0  ;;  %v436_v46 = vmin.f32 %v404_v23, 6.0  ;;  %v630_v48 = vadd.s32 96, %v7656_v6  ;;  %v6878_v60 = vld [vmem:[%s7690_s20 + $0x30] sm:$0xff]  }
  0x87   : > { %v2664_v14 = vrot.slane %v2662_v44, 1  ;;  %v623_v59 = vadd.s32 40, %v7656_v6  ;;  %v8297_v35 = vor.u32 %v1781_v36, %v1778_v19  ;;  %v2256_v24 = vrot.slane %v8243_v0, 4 }
  0x88   : > { %v2669_v38 = vrot.slane %v2667_v51, 1  ;;  %v2671_v57 = vshrl.u32 %v6361_v1, 16  ;;  %v6741_v52 = vpack.c.bf16 %v436_v46, %v435_v37  ;;  %v738_v54 = vand.u32 15, %v630_v48  ;;  %v2063_v37 = vld [vmem:[#allocation2 + $0x18] sm:$0xf] }
  0x89   : > { %v2665_v16 = vor.u32 %v2664_v14, %v2660_v53  ;;  %v689_v8 = vand.u32 15, %v623_v59  ;;  %vm10091_vm15 = vsmask.f32 4352  ;;  %v8313_v0 = vsel %vm8239_vm4, %v2256_v24, %v8206_v18  ;;  %v7519_v53 = vld [vmem:[%s9874_s3 + $0x1c8] sm:$0xff]  }
  0x8a   : > { %v1783_v12 = vsel %vm10091_vm15, %v8190_v5, %v8297_v35  ;;  %vm10092_vm14 = vmmov %vm10091_vm15  ;;  %10093 = vst [vmem:[#allocation25_spill] sm:$0xff] %v8313_v0  ;;  %v2862_v1 = vsel %vm8039_vm5, %v2829_v2, 0  ;;  %vm10094_vm7 = vsmask.f32 7424  ;;  %vm1046_vm15 = vcmp.ne.s32.totalorder %v738_v54, 0  ;;  %v7521_v59 = vld [vmem:[%s9874_s3 + $0x188] sm:$0xff]  }
  0x8b   : > { %v2997_v44 = vsel %vm10092_vm14, %v8177_v22, %v8293_v9  ;;  %5188 = vmatmul.mubr.bf16.gmra.mrb[16].mxu0 %v1783_v12  ;;  %v2670_v23 = vsel %vm10094_vm7, %v2665_v16, %v2669_v38  ;;  %6893 = vst [vmem:[#allocation2 + $0x38] sm:$0xff] %v6741_v52   ;;  %vm8321_vm3 = vcmp.ne.s32.totalorder %v689_v8, 15  ;;  %v8325_v22 = vor.u32 %v2671_v57, %v2669_v38  ;;  %vm1207_vm14 = vmpackc.low %vm1046_vm15, %vm1046_vm15  ;;  %v8342_v16 = vld [vmem:[%s7690_s20 + $0x38] sm:$0xff]  }
  0x8c   : > { %5317 = vmatmul.mubr.bf16.vlgmr.msra.gmra.mrb[16].mxu1 %v2670_v23  ;;  %5195 = vmatprep.mubr.bf16.mxu0 %v7516_v45  ;;  %vm9899_vm5 = vcmp.ne.s16.totalorder %v8313_v0, 0  ;;  %v2863_v2 = vsel %vm8065_vm11, %v2830_v56, 0  ;;  %v6675_v19 = vunpack.c.l.bf16 %v6878_v60  ;;  %v6676_v36 = vunpack.c.h.bf16 %v6878_v60  ;;  %vm2161_vm7 = vmpackc.low %vm8321_vm3, %vm8321_vm3  ;;  %v7527_v60 = vld [vmem:[%s9874_s3 + $0x190] sm:$0xff]  }
  0x8d   : > { %7256 = vmatpush3.bf16.msra.mxu1 %v7513_v47  ;;  %5324 = vmatprep.mubr.bf16.mxu1 %v2997_v44  ;;  %v1239_v51 = vsel %vm1207_vm14, 65537, %v9900_v3  ;;  %v6380_v14 = vcombine.low %v2862_v1, %v2863_v2  ;;  %v632_v46 = vadd.s32 112, %v7656_v6  ;;  %v625_v48 = vadd.s32 56, %v7656_v6  ;;  %v7526_v47 = vld [vmem:[%s9874_s3 + $0x1d0] sm:$0xff]  }
  0x8e   : > { %v1382_v38 = vshll.u32 %v1239_v51, 16  ;;  %v1386_v45 = vshrl.u32 %v1239_v51, 16  ;;  %v2193_v24 = vsel %vm2161_vm7, 65537, %v9900_v3  ;;  %7257 = vmatprep.subr.bf16.mxu1 %v7519_v53  ;;  %v334_v57 = vmul.f32 %v8232_v4, %v6675_v19  ;;  %v1110_v23 = vld [vmem:[#allocation2 + $0x34] sm:$0xf] }
  0x8f   : > { %v2267_v52 = vshrl.u32 %v2193_v24, 16  ;;  %v2270_v54 = vshll.u32 %v2193_v24, 16  ;;  %v2999_v8 = vshrl.u32 %v6380_v14, 16  ;;  %v3002_v56 = vshll.u32 %v6380_v14, 16 }
  0x90   : > { %v1384_v12 = vrot.slane %v1382_v38, 5  ;;  %v1388_v44 = vrot.slane %v1386_v45, 4  ;;  %v335_v1 = vmul.f32 %v8232_v4, %v6676_v36  ;;  %v373_v53 = vadd.f32 %v8149_v32, %v334_v57  ;;  %v7532_v36 = vld [vmem:[%s9874_s3 + $0x1d8] sm:$0xff]  }
  0x91   : > { %v8352_v5 = vrot.slane %v2267_v52, 7  ;;  %v3001_v2 = vrot.slane %v2999_v8, 3  ;;  %v3004_v19 = vrot.slane %v3002_v56, 4  ;;  %v752_v51 = vand.u32 15, %v632_v46  ;;  %7258 = vmatpush3.bf16.msra.mxu1 %v7521_v59  ;;  %v2064_v56 = vld [vmem:[#allocation2 + $0x1c] sm:$0xf] }
  0x92   : > { %v1385_v14 = vsel %vm7784_vm10, %v7795_v34, %v1384_v12  ;;  %v1389_v24 = vor.u32 %v1388_v44, %v1384_v12  ;;  %v2546_v38 = vsel %vm9899_vm5, %v2063_v37, 0  ;;  %v374_v45 = vadd.f32 %v8149_v32, %v335_v1  ;;  %7259 = vmatprep.subr.bf16.mxu1 %v7526_v47  ;;  %v1111_v47 = vld [vmem:[#allocation2 + $0x38] sm:$0xf] }
  0x93   : > { %vm8363_vm3 = vcmp.ne.s16.totalorder %v1385_v14, 0  ;;  %v10097_v57 = vmov 0  ;;  %v2272_v46 = vor.u32 %v2270_v54, %v8352_v5  ;;  %v405_v59 = vmax.f32 %v373_v53, 0.0  ;;  %v7533_v53 = vld [vmem:[%s9874_s3 + $0x198] sm:$0xff]  }
  0x94   : > { %v10098_v57 = vsel %vm8363_vm3, 4294967295, %v10097_v57  ;;  %v1390_v8 = vrot.slane %v1389_v24, 4  ;;  %v8369_v12 = vor.u32 %v3004_v19, %v3001_v2  ;;  %v406_v37 = vmax.f32 %v374_v45, 0.0 }
  0x95   : > { %10099 = vst [vmem:[#allocation26_spill] sm:$0xff] %v10098_v57  ;;  %vm1048_vm15 = vcmp.ne.s32.totalorder %v752_v51, 0  ;;  %v1626_v44 = vsel %vm8363_vm3, %v1110_v23, 0  ;;  %v2273_v1 = vsel %vm8239_vm4, %v8208_v25, %v2272_v46  ;;  %v437_v14 = vmin.f32 %v405_v59, 6.0  ;;  %7260 = vmatpush3.bf16.msra.mxu1 %v7527_v60 }
  0x96   : > { %vm1209_vm14 = vmpackc.low %vm1048_vm15, %vm1048_vm15  ;;  %v703_v54 = vand.u32 15, %v625_v48  ;;  %v1395_v2 = vsel %vm7784_vm10, %v1390_v8, %v7775_v7  ;;  %vm8382_vm7 = vcmp.ne.s16.totalorder %v2273_v1, 0  ;;  %v10100_v19 = vmov 0  ;;  %7261 = vmatprep.subr.bf16.mxu1 %v7532_v36  ;;  %v7537_v48 = vld [vmem:[%s9874_s3 + $0x1e0] sm:$0xff]  }
  0x97   : > { %v10101_v19 = vsel %vm8382_vm7, 4294967295, %v10100_v19  ;;  %v438_v23 = vmin.f32 %v406_v37, 6.0  ;;  %v1241_v51 = vsel %vm1209_vm14, 65537, %v9900_v3  ;;  %vm8390_vm15 = vcmp.ne.s16.totalorder %v1395_v2, 0  ;;  %v7540_v3 = vld [vmem:[%s9874_s3 + $0x1a0] sm:$0xff]  }
  0x98   : > { %10102 = vst [vmem:[#allocation27_spill] sm:$0xff] %v10101_v19  ;;  %v10103_v60 = vmov 0  ;;  %v2547_v24 = vsel %vm8382_vm7, %v2064_v56, 0  ;;  %v1402_v45 = vshll.u32 %v1241_v51, 16  ;;  %v1406_v46 = vshrl.u32 %v1241_v51, 16 }
  0x99   : > { %v10104_v60 = vsel %vm8390_vm15, 4294967295, %v10103_v60  ;;  %v1627_v59 = vsel %vm8390_vm15, %v1111_v47, 0  ;;  %v6362_v8 = vcombine.low %v2546_v38, %v2547_v24  ;;  %v6746_v37 = vpack.c.bf16 %v438_v23, %v437_v14  ;;  %7262 = vmatpush3.bf16.msra.mxu1 %v7533_v53 }
  0x9a   : > { %10105 = vst [vmem:[#allocation28_spill] sm:$0xff] %v10104_v60  ;;  %vm1073_vm14 = vcmp.ne.s32.totalorder %v703_v54, 15  ;;  %v6333_v36 = vcombine.low %v1626_v44, %v1627_v59  ;;  %v1404_v1 = vrot.slane %v1402_v45, 5  ;;  %v1408_v52 = vrot.slane %v1406_v46, 4  ;;  %v2831_v44 = vld [vmem:[#allocation2 + $0x2c] sm:$0xf]  ;;  %7263 = vmatprep.subr.bf16.mxu1 %v7537_v48 }
  0x9b   : > { %vm2163_vm5 = vmpackc.low %vm1073_vm14, %vm1073_vm14  ;;  %v2274_v2 = vrot.slane %v8352_v5, 4  ;;  %v2675_v56 = vshll.u32 %v6362_v8, 16  ;;  %vm10106_vm11 = vsmask.f32 4352  ;;  %6894 = vst [vmem:[#allocation2 + $0x40] sm:$0xff] %v6746_v37   ;;  %v10107_v38 = vmov 0  }
  0x9c   : > { %v3006_v51 = vsel %vm10106_vm11, %v8293_v9, %v8369_v12  ;;  %v2195_v47 = vsel %vm2163_vm5, 65537, %v10107_v38  ;;  %v2679_v14 = vshrl.u32 %v6362_v8, 16  ;;  %v7542_v5 = vld [vmem:[%s9874_s3 + $0x1e8] sm:$0xff]   ;;  %v1785_v54 = vshrl.u32 %v6333_v36, 16  ;;  %v2065_v45 = vld [vmem:[#allocation2 + $0x20] sm:$0xf] }
  0x9d   : > { %v1788_v53 = vshll.u32 %v6333_v36, 16  ;;  %v1405_v23 = vsel %vm7784_vm10, %v7795_v34, %v1404_v1  ;;  %v1409_v24 = vor.u32 %v1408_v52, %v1404_v1  ;;  %v2832_v46 = vld [vmem:[#allocation2 + $0x30] sm:$0xf]  ;;  %v2677_v9 = vrot.slane %v2675_v56, 1  ;;  %v1112_v59 = vld [vmem:[#allocation2 + $0x3c] sm:$0xf]  ;;  %7264 = vmatpush3.bf16.msra.mxu1 %v7540_v3 }
  0x9e   : > { %vm8412_vm11 = vcmp.ne.s16.totalorder %v1405_v23, 0  ;;  %v10108_v37 = vmov 0  ;;  %v8419_v48 = vsel %vm8239_vm4, %v2274_v2, %v8206_v18  ;;  %v2285_v8 = vshrl.u32 %v2195_v47, 16  ;;  %v7545_v36 = vld [vmem:[%s9874_s3 + $0x1a8] sm:$0xff]   ;;  %v7517_v1 = vld [vmem:[#allocation2 + $0x38] sm:$0xff]   ;;  %7265 = vmatprep.subr.bf16.mxu1 %v7542_v5 }
  0x9f   : > { %v10109_v37 = vsel %vm8412_vm11, 4294967295, %v10108_v37  ;;  %v1787_v49 = vrot.slane %v1785_v54, 3  ;;  %v1790_v52 = vrot.slane %v1788_v53, 4  ;;  %v1410_v15 = vrot.slane %v1409_v24, 4  ;;  %v7547_v54 = vld [vmem:[%s9874_s3 + $0x1f0] sm:$0xff]  }
  0xa0   : > { %10110 = vst [vmem:[#allocation29_spill] sm:$0xff] %v10109_v37  ;;  %v2864_v56 = vsel %vm8140_vm9, %v2831_v44, 0  ;;  %vm10111_vm5 = vsmask.f32 7424  ;;  %v8428_v41 = vrot.slane %v2285_v8, 7  ;;  %v2288_v2 = vshll.u32 %v2195_v47, 16 }
  0xa1   : > { %v2678_v23 = vsel %vm10111_vm5, %v8325_v22, %v2677_v9  ;;  %vm9907_vm14 = vcmp.ne.s16.totalorder %v8419_v48, 0  ;;  %v8434_v53 = vor.u32 %v1790_v52, %v1787_v49  ;;  %v1415_v3 = vsel %vm7784_vm10, %v1410_v15, %v7775_v7  ;;  %v2066_v5 = vld [vmem:[#allocation2 + $0x24] sm:$0xf]  ;;  %7266 = vmatpush3.bf16.msra.mxu1 %v7545_v36 }
  0xa2   : > { %5325 = vmatmul.mubr.bf16.gmra.mrb[20].mxu1 %v2678_v23  ;;  %v1628_v22 = vsel %vm8412_vm11, %v1112_v59, 0  ;;  %v2548_v47 = vsel %vm9907_vm14, %v2065_v45, 0  ;;  %vm8443_vm5 = vcmp.ne.s16.totalorder %v1415_v3, 0  ;;  %v10112_v44 = vmov 0  ;;  %v1113_v59 = vld [vmem:[#allocation2 + $0x40] sm:$0xf]  ;;  %7267 = vmatprep.subr.bf16.mxu1 %v7547_v54 }
  0xa3   : > { %5332 = vmatprep.mubr.bf16.mxu1 %v3006_v51  ;;  %v10113_v44 = vsel %vm8443_vm5, 4294967295, %v10112_v44  ;;  %v2290_v49 = vor.u32 %v2288_v2, %v8428_v41  ;;  %v2865_v24 = vsel %vm8162_vm0, %v2832_v46, 0  ;;  %v6680_v8 = vunpack.c.h.bf16 %v8342_v16 }
  0xa4   : > { %10114 = vst [vmem:[#allocation30_spill] sm:$0xff] %v10113_v44  ;;  %vm10115_vm9 = vsmask.f32 4352  ;;  %v2681_v52 = vor.u32 %v2679_v14, %v2677_v9  ;;  %v6381_v45 = vcombine.low %v2864_v56, %v2865_v24  ;;  %v10116_v51 = vunpack.c.l.bf16 %v8342_v16 }
  0xa5   : > { %v1792_v15 = vsel %vm10115_vm9, %v8297_v35, %v8434_v53  ;;  %v1629_v2 = vsel %vm8443_vm5, %v1113_v59, 0  ;;  %v2291_v46 = vsel %vm8239_vm4, %v8208_v25, %v2290_v49  ;;  %v337_v3 = vmul.f32 %v8232_v4, %v6680_v8 }
  0xa6   : > { %v336_v23 = vmul.f32 %v8232_v4, %v10116_v51  ;;  %5196 = vmatmul.mubr.bf16.gmra.mrb[20].mxu0 %v1792_v15  ;;  %v634_v35 = vadd.s32 128, %v7656_v6  ;;  %v6334_v14 = vcombine.low %v1628_v22, %v1629_v2  ;;  %vm8464_vm9 = vcmp.ne.s16.totalorder %v2291_v46, 0 }
  0xa7   : > { %5203 = vmatprep.mubr.bf16.mxu0 %v7517_v1  ;;  %v10117_v16 = vmov 0  ;;  %v3008_v9 = vshrl.u32 %v6381_v45, 16  ;;  %v3011_v36 = vshll.u32 %v6381_v45, 16  ;;  %v2549_v56 = vsel %vm8464_vm9, %v2066_v5, 0 }
  0xa8   : > { %v10118_v16 = vsel %vm8464_vm9, 4294967295, %v10117_v16  ;;  %v375_v24 = vadd.f32 %v8149_v32, %v336_v23  ;;  %v376_v49 = vadd.f32 %v8149_v32, %v337_v3  ;;  %v766_v8 = vand.u32 15, %v634_v35  ;;  %v2833_v23 = vld [vmem:[#allocation2 + $0x34] sm:$0xf]  ;;  %v6880_v3 = vld [vmem:[%s7690_s20 + $0x40] sm:$0xff]  }
  0xa9   : > { %10119 = vst [vmem:[#allocation31_spill] sm:$0xff] %v10118_v16  ;;  %v1794_v15 = vshrl.u32 %v6334_v14, 16  ;;  %v1797_v59 = vshll.u32 %v6334_v14, 16  ;;  %v8472_v54 = vcombine.low %v2548_v47, %v2549_v56  ;;  %v3010_v1 = vrot.slane %v3008_v9, 3  ;;  %v7550_v9 = vld [vmem:[%s9874_s3 + $0x1b0] sm:$0xff]  }
  0xaa   : > { %v3013_v22 = vrot.slane %v3011_v36, 4  ;;  %v407_v51 = vmax.f32 %v375_v24, 0.0  ;;  %v408_v2 = vmax.f32 %v376_v49, 0.0  ;;  %vm1050_vm14 = vcmp.ne.s32.totalorder %v766_v8, 0  ;;  %v7522_v24 = vld [vmem:[#allocation2 + $0x40] sm:$0xff]   ;;  %7268 = vmatpush3.bf16.msra.mxu1 %v7550_v9 }
  0xab   : > { %v1796_v46 = vrot.slane %v1794_v15, 3  ;;  %v1799_v45 = vrot.slane %v1797_v59, 4  ;;  %v2683_v39 = vshll.u32 %v8472_v54, 16  ;;  %vm1211_vm0 = vmpackc.low %vm1050_vm14, %vm1050_vm14  ;;  %v627_v5 = vadd.s32 72, %v7656_v6 }
  0xac   : > { %v8477_v31 = vor.u32 %v3013_v22, %v3010_v1  ;;  %v439_v35 = vmin.f32 %v407_v51, 6.0  ;;  %v440_v14 = vmin.f32 %v408_v2, 6.0  ;;  %v1243_v47 = vsel %vm1211_vm0, 65537, %v10107_v38  ;;  %v2834_v51 = vld [vmem:[#allocation2 + $0x38] sm:$0xf] }
  0xad   : > { %v8483_v36 = vor.u32 %v1799_v45, %v1796_v46  ;;  %v2685_v56 = vrot.slane %v2683_v39, 1  ;;  %v1422_v49 = vshll.u32 %v1243_v47, 16  ;;  %v1426_v8 = vshrl.u32 %v1243_v47, 16  ;;  %v1114_v47 = vld [vmem:[#allocation2 + $0x44] sm:$0xf] }
  0xae   : > { %vm10120_vm14 = vsmask.f32 4352  ;;  %v6751_v59 = vpack.c.bf16 %v440_v14, %v439_v35  ;;  %v717_v1 = vand.u32 15, %v627_v5  ;;  %v2292_v22 = vrot.slane %v8428_v41, 4  ;;  %v8506_v14 = vld [vmem:[#allocation2 + $0x3c] sm:$0xf] }
  0xaf   : > { %v3015_v15 = vsel %vm10120_vm14, %v8369_v12, %v8477_v31  ;;  %vm10121_vm0 = vmmov %vm10120_vm14  ;;  %vm10122_vm6 = vsmask.f32 7424  ;;  %v1424_v39 = vrot.slane %v1422_v49, 5  ;;  %v1428_v45 = vrot.slane %v1426_v8, 4 }
  0xb0   : > { %v1801_v2 = vsel %vm10121_vm0, %v8434_v53, %v8483_v36  ;;  %v2686_v46 = vsel %vm10122_vm6, %v2681_v52, %v2685_v56  ;;  %6895 = vst [vmem:[#allocation2 + $0x48] sm:$0xff] %v6751_v59   ;;  %vm1075_vm14 = vcmp.ne.s32.totalorder %v717_v1, 15  ;;  %v8496_v41 = vsel %vm8239_vm4, %v2292_v22, %v8206_v18 }
  0xb1   : > { %5204 = vmatmul.mubr.bf16.gmra.mrb[24].mxu0 %v1801_v2  ;;  %5333 = vmatmul.mubr.bf16.gmra.mrb[24].mxu1 %v2686_v46  ;;  %10123 = vst [vmem:[#allocation32_spill] sm:$0xff] %v8496_v41  ;;  %v2866_v12 = vsel %vm8223_vm8, %v2833_v23, 0  ;;  %v6683_v5 = vunpack.c.l.bf16 %v6880_v3  ;;  %v1425_v53 = vsel %vm7784_vm10, %v7795_v34, %v1424_v39  ;;  %v1429_v52 = vor.u32 %v1428_v45, %v1424_v39  ;;  %vm2165_vm6 = vmpackc.low %vm1075_vm14, %vm1075_vm14  ;;  %v8521_v39 = vld [vmem:[%s7690_s20 + $0x48] sm:$0xff]  }
  0xb2   : > { %5211 = vmatprep.mubr.bf16.mxu0 %v7522_v24  ;;  %5340 = vmatprep.mubr.bf16.mxu1 %v3015_v15  ;;  %vm9922_vm0 = vcmp.ne.s16.totalorder %v8496_v41, 0  ;;  %v2867_v35 = vsel %vm8254_vm13, %v2834_v51, 0  ;;  %vm8508_vm2 = vcmp.ne.s16.totalorder %v1425_v53, 0  ;;  %v10124_v9 = vmov 0 }
  0xb3   : > { %v10125_v9 = vsel %vm8508_vm2, 4294967295, %v10124_v9  ;;  %v2197_v23 = vsel %vm2165_vm6, 65537, %v10107_v38  ;;  %v2550_v24 = vsel %vm9922_vm0, %v2067_v11, 0  ;;  %v2687_v49 = vshrl.u32 %v8472_v54, 16 }
  0xb4   : > { %10126 = vst [vmem:[#allocation33_spill] sm:$0xff] %v10125_v9  ;;  %v1430_v8 = vrot.slane %v1429_v52, 4  ;;  %v1630_v15 = vsel %vm8508_vm2, %v1114_v47, 0  ;;  %v2303_v59 = vshrl.u32 %v2197_v23, 16  ;;  %v2306_v1 = vshll.u32 %v2197_v23, 16 }
  0xb5   : > { %v6382_v22 = vcombine.low %v2866_v12, %v2867_v35  ;;  %v6684_v51 = vunpack.c.h.bf16 %v6880_v3  ;;  %v338_v2 = vmul.f32 %v8232_v4, %v6683_v5  ;;  %v636_v46 = vadd.s32 144, %v7656_v6 }
  0xb6   : > { %v1435_v11 = vsel %vm7784_vm10, %v1430_v8, %v7775_v7  ;;  %v2305_v45 = vrot.slane %v2303_v59, 7  ;;  %v629_v54 = vadd.s32 88, %v7656_v6  ;;  %v2689_v23 = vor.u32 %v2687_v49, %v2685_v56 }
  0xb7   : > { %vm8530_vm14 = vcmp.ne.s16.totalorder %v1435_v11, 0  ;;  %v3017_v3 = vshrl.u32 %v6382_v22, 16  ;;  %v3020_v5 = vshll.u32 %v6382_v22, 16  ;;  %v339_v53 = vmul.f32 %v8232_v4, %v6684_v51  ;;  %v1115_v52 = vld [vmem:[#allocation2 + $0x48] sm:$0xf] }
  0xb8   : > { %v2308_v35 = vor.u32 %v2306_v1, %v2305_v45  ;;  %v377_v8 = vadd.f32 %v8149_v32, %v338_v2  ;;  %v6687_v59 = vunpack.c.l.bf16 %v8521_v39  ;;  %v1631_v21 = vsel %vm8530_vm14, %v1115_v52, 0 }
  0xb9   : > { %v3019_v47 = vrot.slane %v3017_v3, 3  ;;  %v3022_v11 = vrot.slane %v3020_v5, 4  ;;  %v378_v63 = vadd.f32 %v8149_v32, %v339_v53  ;;  %v6335_v62 = vcombine.low %v1630_v15, %v1631_v21 }
  0xba   : > { %v2309_v22 = vsel %vm8239_vm4, %v8208_v25, %v2308_v35  ;;  %v409_v51 = vmax.f32 %v377_v8, 0.0  ;;  %v780_v1 = vand.u32 15, %v636_v46  ;;  %v10129_v56 = vmov 0 }
  0xbb   : > { %vm8543_vm6 = vcmp.ne.s16.totalorder %v2309_v22, 0  ;;  %v8547_v49 = vor.u32 %v3022_v11, %v3019_v47  ;;  %v410_v2 = vmax.f32 %v378_v63, 0.0  ;;  %v731_v52 = vand.u32 15, %v629_v54  ;;  %v7525_v11 = vld [vmem:[#allocation2 + $0x48] sm:$0xff]  }
  0xbc   : > { %v10130_v56 = vsel %vm8543_vm6, 4294967295, %v10129_v56  ;;  %v1803_v50 = vshrl.u32 %v6335_v62, 16  ;;  %v1806_v3 = vshll.u32 %v6335_v62, 16  ;;  %v2551_v32 = vsel %vm8543_vm6, %v2068_v30, 0 }
  0xbd   : > { %10131 = vst [vmem:[#allocation34_spill] sm:$0xff] %v10130_v56  ;;  %v441_v21 = vmin.f32 %v409_v51, 6.0  ;;  %v8551_v15 = vcombine.low %v2550_v24, %v2551_v32  ;;  %v442_v5 = vmin.f32 %v410_v2, 6.0  ;;  %vm1052_vm0 = vcmp.ne.s32.totalorder %v780_v1, 0  ;;  %v2836_v24 = vld [vmem:[#allocation2 + $0x40] sm:$0xf] }
  0xbe   : > { %v6688_v46 = vunpack.c.h.bf16 %v8521_v39  ;;  %v1805_v53 = vrot.slane %v1803_v50, 3  ;;  %v1808_v35 = vrot.slane %v1806_v3, 4  ;;  %vm1213_vm13 = vmpackc.low %vm1052_vm0, %vm1052_vm0  ;;  %vm1077_vm8 = vcmp.ne.s32.totalorder %v731_v52, 15  ;;  %v2069_v1 = vld [vmem:[#allocation2 + $0x30] sm:$0xf] }
  0xbf   : > { %v2310_v47 = vrot.slane %v2305_v45, 4  ;;  %v2691_v63 = vshll.u32 %v8551_v15, 16  ;;  %vm10132_vm9 = vsmask.f32 4352  ;;  %v6756_v54 = vpack.c.bf16 %v442_v5, %v441_v21  ;;  %vm2167_vm6 = vmpackc.low %vm1077_vm8, %vm1077_vm8  ;;  %v7552_v45 = vld [vmem:[%s9874_s3 + $0x1f8] sm:$0xff]  }
  0xc0   : > { %v3024_v62 = vsel %vm10132_vm9, %v8477_v31, %v8547_v49  ;;  %v1245_v30 = vsel %vm1213_vm13, 65537, %v10107_v38  ;;  %v8559_v8 = vor.u32 %v1808_v35, %v1805_v53  ;;  %v2199_v22 = vsel %vm2167_vm6, 65537, %v10107_v38  ;;  %vm10134_vm8 = vmmov %vm10132_vm9  ;;  %7269 = vmatprep.subr.bf16.mxu1 %v7552_v45  ;;  %v7555_v53 = vld [vmem:[%s9874_s3 + $0x1b8] sm:$0xff]  }
  0xc1   : > { %v1442_v39 = vshll.u32 %v1245_v30, 16  ;;  %v1446_v50 = vshrl.u32 %v1245_v30, 16  ;;  %v2693_v51 = vrot.slane %v2691_v63, 1  ;;  %6896 = vst [vmem:[#allocation2 + $0x50] sm:$0xff] %v6756_v54   ;;  %v8568_v31 = vsel %vm8239_vm4, %v2310_v47, %v8206_v18  ;;  %v1116_v30 = vld [vmem:[#allocation2 + $0x4c] sm:$0xf]  ;;  %7270 = vmatpush3.bf16.msra.mxu1 %v7555_v53 }
  0xc2   : > { %10133 = vst [vmem:[#allocation35_spill] sm:$0xff] %v8568_v31  ;;  %v2321_v2 = vshrl.u32 %v2199_v22, 16  ;;  %v2324_v52 = vshll.u32 %v2199_v22, 16  ;;  %v1810_v3 = vsel %vm10134_vm8, %v8483_v36, %v8559_v8  ;;  %v2695_v5 = vshrl.u32 %v8551_v15, 16 }
  0xc3   : > { %v1444_v32 = vrot.slane %v1442_v39, 5  ;;  %v1448_v21 = vrot.slane %v1446_v50, 4  ;;  %5212 = vmatmul.mubr.bf16.gmra.mrb[28].mxu0 %v1810_v3  ;;  %vm10135_vm13 = vsmask.f32 7424  ;;  %vm9929_vm9 = vcmp.ne.s16.totalorder %v8568_v31, 0 }
  0xc4   : > { %v2694_v35 = vsel %vm10135_vm13, %v2689_v23, %v2693_v51  ;;  %v2323_v47 = vrot.slane %v2321_v2, 7  ;;  %5219 = vmatprep.mubr.bf16.mxu0 %v7525_v11  ;;  %v2869_v15 = vsel %vm8390_vm15, %v2836_v24, 0  ;;  %v340_v54 = vmul.f32 %v8232_v4, %v6687_v59  ;;  %v2070_v2 = vld [vmem:[#allocation2 + $0x34] sm:$0xf] }
  0xc5   : > { %5341 = vmatmul.mubr.bf16.gmra.mrb[28].mxu1 %v2694_v35  ;;  %v1445_v36 = vsel %vm7784_vm10, %v7795_v34, %v1444_v32  ;;  %v1449_v63 = vor.u32 %v1448_v21, %v1444_v32  ;;  %v10136_v39 = vmov 0  ;;  %v10139_v11 = vsel %vm8363_vm3, %v8506_v14, 0 }
  0xc6   : > { %5348 = vmatprep.mubr.bf16.mxu1 %v3024_v62  ;;  %vm8585_vm0 = vcmp.ne.s16.totalorder %v1445_v36, 0  ;;  %v2326_v23 = vor.u32 %v2324_v52, %v2323_v47  ;;  %v6383_v50 = vcombine.low %v10139_v11, %v2869_v15  ;;  %v341_v22 = vmul.f32 %v8232_v4, %v6688_v46  ;;  %v7587_v62 = vld [vmem:[%s9873_s2] ss:$0 sm:$0xff] }
  0xc7   : > { %v10137_v39 = vsel %vm8585_vm0, 4294967295, %v10136_v39  ;;  %v1450_v45 = vrot.slane %v1449_v63, 4  ;;  %v2552_v59 = vsel %vm9929_vm9, %v2069_v1, 0  ;;  %v379_v24 = vadd.f32 %v7587_v62, %v340_v54 }
  0xc8   : > { %10138 = vst [vmem:[#allocation36_spill] sm:$0xff] %v10137_v39  ;;  %v638_v52 = vadd.s32 160, %v7656_v6  ;;  %v2327_v14 = vsel %vm8239_vm4, %v8208_v25, %v2326_v23  ;;  %v3026_v3 = vshrl.u32 %v6383_v50, 16  ;;  %v3029_v32 = vshll.u32 %v6383_v50, 16  ;;  %v1117_v46 = vld [vmem:[#allocation2 + $0x50] sm:$0xf] }
  0xc9   : > { %v380_v4 = vadd.f32 %v7587_v62, %v341_v22  ;;  %v1455_v21 = vsel %vm7784_vm10, %v1450_v45, %v7775_v7  ;;  %v1632_v1 = vsel %vm8585_vm0, %v1116_v30, 0  ;;  %vm8608_vm6 = vcmp.ne.s16.totalorder %v2327_v14, 0  ;;  %v2841_v58 = vld [vmem:[#allocation2 + $0x54] sm:$0xf] }
  0xca   : > { %v10140_v53 = vmov 0  ;;  %v2697_v35 = vor.u32 %v2695_v5, %v2693_v51  ;;  %vm8612_vm8 = vcmp.ne.s16.totalorder %v1455_v21, 0  ;;  %v10143_v36 = vmov 0  ;;  %v2078_v19 = vld [vmem:[#allocation2 + $0x54] sm:$0xf] }
  0xcb   : > { %v10141_v53 = vsel %vm8608_vm6, 4294967295, %v10140_v53  ;;  %v10144_v36 = vsel %vm8612_vm8, 4294967295, %v10143_v36  ;;  %v2553_v63 = vsel %vm8608_vm6, %v2070_v2, 0  ;;  %v3028_v15 = vrot.slane %v3026_v3, 3 }
  0xcc   : > { %10142 = vst [vmem:[#allocation37_spill] sm:$0xff] %v10141_v53  ;;  %10145 = vst [vmem:[#allocation38_spill] sm:$0xff] %v10144_v36  ;;  %v3031_v54 = vrot.slane %v3029_v32, 4  ;;  %v1633_v23 = vsel %vm8612_vm8, %v1117_v46, 0  ;;  %v8620_v11 = vcombine.low %v2552_v59, %v2553_v63  ;;  %v411_v30 = vmax.f32 %v379_v24, 0.0  ;;  %v7536_v36 = vld [vmem:[#allocation2 + $0x60] sm:$0xff]  }
  0xcd   : > { %v412_v50 = vmax.f32 %v380_v4, 0.0  ;;  %v6336_v22 = vcombine.low %v1632_v1, %v1633_v23  ;;  %v794_v51 = vand.u32 15, %v638_v52  ;;  %v631_v5 = vadd.s32 104, %v7656_v6  ;;  %v2071_v24 = vld [vmem:[#allocation2 + $0x38] sm:$0xf] }
  0xce   : > { %v8622_v45 = vor.u32 %v3031_v54, %v3028_v15  ;;  %v2699_v62 = vshll.u32 %v8620_v11, 16  ;;  %v443_v14 = vmin.f32 %v411_v30, 6.0  ;;  %v2328_v2 = vrot.slane %v2323_v47, 4  ;;  %v2837_v63 = vld [vmem:[#allocation2 + $0x44] sm:$0xf] }
  0xcf   : > { %v444_v21 = vmin.f32 %v412_v50, 6.0  ;;  %v1812_v3 = vshrl.u32 %v6336_v22, 16  ;;  %v1815_v32 = vshll.u32 %v6336_v22, 16  ;;  %vm10146_vm13 = vsmask.f32 4352 }
  0xd0   : > { %v3033_v59 = vsel %vm10146_vm13, %v8547_v49, %v8622_v45  ;;  %vm1054_vm9 = vcmp.ne.s32.totalorder %v794_v51, 0  ;;  %v2701_v4 = vrot.slane %v2699_v62, 1  ;;  %v745_v52 = vand.u32 15, %v631_v5  ;;  %v2838_v49 = vld [vmem:[#allocation2 + $0x48] sm:$0xf]  ;;  %v8640_v51 = vld [vmem:[%s7690_s20 + $0x78] sm:$0xff]   ;;  %s9813_s20 = scalar_lea.vmem %s9875_s4, %s6583_s9 }
  0xd1   : > { %v6761_v46 = vpack.c.bf16 %v444_v21, %v443_v14  ;;  %vm1215_vm15 = vmpackc.low %vm1054_vm9, %vm1054_vm9  ;;  %v8632_v1 = vsel %vm8239_vm4, %v2328_v2, %v8206_v18  ;;  %v1814_v47 = vrot.slane %v1812_v3, 3  ;;  %v1817_v15 = vrot.slane %v1815_v32, 4  ;;  %v8637_v22 = vld [vmem:[#allocation2 + $0x4c] sm:$0xf]  ;;  %v7528_v62 = vld [vmem:[#allocation2 + $0x50] sm:$0xff]   ;;  %s6292_s9 = sshll.u32 %s10420_s19, 1 }
  0xd2   : > { %10147 = vst [vmem:[#allocation39_spill] sm:$0xff] %v8632_v1  ;;  %v1247_v54 = vsel %vm1215_vm15, 65537, %v10107_v38  ;;  %vm9937_vm3 = vcmp.ne.s16.totalorder %v8632_v1, 0  ;;  %vm10148_vm13 = vsmask.f32 7424  ;;  %vm1079_vm9 = vcmp.ne.s32.totalorder %v745_v52, 15  ;;  %s235_s14 = scalar_lea.vmem %s9876_s5, %s6292_s9 }
  0xd3   : > { %v2702_v23 = vsel %vm10148_vm13, %v2697_v35, %v2701_v4  ;;  %6897 = vst [vmem:[#allocation2 + $0x58] sm:$0xff] %v6761_v46   ;;  %v1462_v30 = vshll.u32 %v1247_v54, 16  ;;  %v1466_v50 = vshrl.u32 %v1247_v54, 16  ;;  %v8642_v5 = vor.u32 %v1817_v15, %v1814_v47  ;;  %v1118_v14 = vld [vmem:[#allocation2 + $0x54] sm:$0xf]  ;;  %vm2169_vm6 = vmpackc.low %vm1079_vm9, %vm1079_vm9 }
  0xd4   : > { %5349 = vmatmul.mubr.bf16.gmra.mrb[32].mxu1 %v2702_v23  ;;  %v2554_v21 = vsel %vm9937_vm3, %v2071_v24, 0  ;;  %v2703_v2 = vshrl.u32 %v8620_v11, 16  ;;  %v2870_v35 = vsel %vm8412_vm11, %v2837_v63, 0  ;;  %v2201_v46 = vsel %vm2169_vm6, 65537, %v10107_v38 }
  0xd5   : > { %5356 = vmatprep.mubr.bf16.mxu1 %v3033_v59  ;;  %v1464_v3 = vrot.slane %v1462_v30, 5  ;;  %v1468_v32 = vrot.slane %v1466_v50, 4  ;;  %v2871_v52 = vsel %vm8443_vm5, %v2838_v49, 0  ;;  %vm10149_vm15 = vsmask.f32 4352 }
  0xd6   : > { %v1819_v47 = vsel %vm10149_vm15, %v8559_v8, %v8642_v5  ;;  %v2339_v15 = vshrl.u32 %v2201_v46, 16  ;;  %v2342_v54 = vshll.u32 %v2201_v46, 16  ;;  %v6711_v24 = vunpack.c.l.bf16 %v8640_v51 }
  0xd7   : > { %5220 = vmatmul.mubr.bf16.gmra.mrb[32].mxu0 %v1819_v47  ;;  %v1465_v11 = vsel %vm7784_vm10, %v7795_v34, %v1464_v3  ;;  %v1469_v59 = vor.u32 %v1468_v32, %v1464_v3  ;;  %v6384_v63 = vcombine.low %v2870_v35, %v2871_v52  ;;  %v640_v23 = vadd.s32 176, %v7656_v6 }
  0xd8   : > { %5227 = vmatprep.mubr.bf16.mxu0 %v7528_v62  ;;  %vm8660_vm6 = vcmp.ne.s16.totalorder %v1465_v11, 0  ;;  %v10150_v49 = vmov 0  ;;  %v2341_v30 = vrot.slane %v2339_v15, 7  ;;  %v633_v8 = vadd.s32 120, %v7656_v6  ;;  %v7588_v15 = vld [vmem:[%s9872_s1] ss:$0 sm:$0xff] }
  0xd9   : > { %v10151_v49 = vsel %vm8660_vm6, 4294967295, %v10150_v49  ;;  %v2872_v50 = vsel %vm8508_vm2, %v8637_v22, 0  ;;  %v1470_v46 = vrot.slane %v1469_v59, 4  ;;  %v1634_v47 = vsel %vm8660_vm6, %v1118_v14, 0  ;;  %v2072_v59 = vld [vmem:[#allocation2 + $0x3c] sm:$0xf] }
  0xda   : > { %10152 = vst [vmem:[#allocation40_spill] sm:$0xff] %v10151_v49  ;;  %v3035_v3 = vshrl.u32 %v6384_v63, 16  ;;  %v3038_v35 = vshll.u32 %v6384_v63, 16  ;;  %v1119_v32 = vld [vmem:[#allocation2 + $0x58] sm:$0xf]  ;;  %v2344_v52 = vor.u32 %v2342_v54, %v2341_v30  ;;  %v2705_v62 = vor.u32 %v2703_v2, %v2701_v4 }
  0xdb   : > { %v6712_v11 = vunpack.c.h.bf16 %v8640_v51  ;;  %v8674_v44 = vmul.f32 %v7588_v15, %v6711_v24  ;;  %v1475_v22 = vsel %vm7784_vm10, %v1470_v46, %v7775_v7  ;;  %v808_v37 = vand.u32 15, %v640_v23  ;;  %v3307_v49 = vld [vmem:[#allocation2 + $0x2c] sm:$0xf] }
  0xdc   : > { %v3037_v9 = vrot.slane %v3035_v3, 3  ;;  %v3040_v14 = vrot.slane %v3038_v35, 4  ;;  %vm8679_vm13 = vcmp.ne.s16.totalorder %v1475_v22, 0  ;;  %v10154_v63 = vmov 0 }
  0xdd   : > { %10153 = vst [vmem:[#allocation41_spill] sm:$0xff] %v8674_v44  ;;  %v10155_v63 = vsel %vm8679_vm13, 4294967295, %v10154_v63  ;;  %v2345_v4 = vsel %vm8239_vm4, %v8208_v25, %v2344_v52  ;;  %v759_v51 = vand.u32 15, %v633_v8  ;;  %v2346_v2 = vrot.slane %v2341_v30, 4  ;;  %v2073_v30 = vld [vmem:[#allocation2 + $0x40] sm:$0xf] }
  0xde   : > { %10156 = vst [vmem:[#allocation42_spill] sm:$0xff] %v10155_v63  ;;  %v1635_v54 = vsel %vm8679_vm13, %v1119_v32, 0  ;;  %vm8688_vm9 = vcmp.ne.s16.totalorder %v2345_v4, 0  ;;  %v10157_v24 = vmov 0  ;;  %v8692_v46 = vor.u32 %v3040_v14, %v3037_v9  ;;  %v2840_v14 = vld [vmem:[#allocation2 + $0x50] sm:$0xf] }
  0xdf   : > { %v10158_v24 = vsel %vm8688_vm9, 4294967295, %v10157_v24  ;;  %vm1056_vm15 = vcmp.ne.s32.totalorder %v808_v37, 0  ;;  %v6337_v23 = vcombine.low %v1634_v47, %v1635_v54  ;;  %v2555_v3 = vsel %vm8688_vm9, %v2072_v59, 0  ;;  %v1120_v4 = vld [vmem:[#allocation2 + $0x5c] sm:$0xf] }
  0xe0   : > { %10159 = vst [vmem:[#allocation43_spill] sm:$0xff] %v10158_v24  ;;  %vm1217_vm3 = vmpackc.low %vm1056_vm15, %vm1056_vm15  ;;  %vm8696_vm2 = vcmp.ne.s32.totalorder %v759_v51, 15  ;;  %v8703_v8 = vsel %vm8239_vm4, %v2346_v2, %v8206_v18  ;;  %v8705_v32 = vcombine.low %v2554_v21, %v2555_v3  ;;  %vm10163_vm5 = vsmask.f32 4352  ;;  %v7531_v44 = vld [vmem:[#allocation2 + $0x58] sm:$0xff]  }
  0xe1   : > { %10162 = vst [vmem:[#allocation44_spill] sm:$0xff] %v8703_v8  ;;  %v3042_v37 = vsel %vm10163_vm5, %v8622_v45, %v8692_v46  ;;  %v1249_v9 = vsel %vm1217_vm3, 65537, %v10107_v38  ;;  %vm2171_vm15 = vmpackc.low %vm8696_vm2, %vm8696_vm2  ;;  %vm9949_vm11 = vcmp.ne.s16.totalorder %v8703_v8, 0  ;;  %v1821_v47 = vshrl.u32 %v6337_v23, 16  ;;  %v3317_v24 = vld [vmem:[#allocation2 + $0x54] sm:$0xf] }
  0xe2   : > { %v1824_v52 = vshll.u32 %v6337_v23, 16  ;;  %v1482_v22 = vshll.u32 %v1249_v9, 16  ;;  %v1486_v59 = vshrl.u32 %v1249_v9, 16  ;;  %v2707_v21 = vshll.u32 %v8705_v32, 16 }
  0xe3   : > { %v2203_v51 = vsel %vm2171_vm15, 65537, %v10107_v38  ;;  %v2556_v45 = vsel %vm9949_vm11, %v2073_v30, 0  ;;  %v2711_v2 = vshrl.u32 %v8705_v32, 16  ;;  %v1823_v54 = vrot.slane %v1821_v47, 3  ;;  %v2842_v47 = vld [vmem:[#allocation2 + $0x58] sm:$0xf] }
  0xe4   : > { %v1826_v3 = vrot.slane %v1824_v52, 4  ;;  %v1484_v35 = vrot.slane %v1482_v22, 5  ;;  %v1488_v60 = vrot.slane %v1486_v59, 4  ;;  %v2709_v57 = vrot.slane %v2707_v21, 1  ;;  %v1121_v22 = vld [vmem:[#allocation2 + $0x60] sm:$0xf] }
  0xe5   : > { %v2357_v40 = vshrl.u32 %v2203_v51, 16  ;;  %v2360_v23 = vshll.u32 %v2203_v51, 16  ;;  %v2873_v9 = vsel %vm8530_vm14, %v2840_v14, 0  ;;  %vm10164_vm2 = vsmask.f32 7424 }
  0xe6   : > { %v8722_v43 = vor.u32 %v1826_v3, %v1823_v54  ;;  %v1485_v30 = vsel %vm7784_vm10, %v7795_v34, %v1484_v35  ;;  %v1489_v8 = vor.u32 %v1488_v60, %v1484_v35  ;;  %v6385_v32 = vcombine.low %v2872_v50, %v2873_v9  ;;  %v2074_v50 = vld [vmem:[#allocation2 + $0x44] sm:$0xf] }
  0xe7   : > { %v2710_v52 = vsel %vm10164_vm2, %v2705_v62, %v2709_v57  ;;  %vm8728_vm3 = vcmp.ne.s16.totalorder %v1485_v30, 0  ;;  %v10165_v59 = vmov 0  ;;  %v2359_v21 = vrot.slane %v2357_v40, 7 }
  0xe8   : > { %v10166_v59 = vsel %vm8728_vm3, 4294967295, %v10165_v59  ;;  %v8732_v14 = vmul.f32 %v7588_v15, %v6712_v11  ;;  %v1828_v51 = vsel %vm10163_vm5, %v8642_v5, %v8722_v43  ;;  %5357 = vmatmul.mubr.bf16.gmra.mrb[36].mxu1 %v2710_v52  ;;  %v1490_v54 = vrot.slane %v1489_v8, 4 }
  0xe9   : > { %10167 = vst [vmem:[#allocation45_spill] sm:$0xff] %v10166_v59  ;;  %v1636_v60 = vsel %vm8728_vm3, %v1120_v4, 0  ;;  %v3044_v3 = vshrl.u32 %v6385_v32, 16  ;;  %5228 = vmatmul.mubr.bf16.gmra.mrb[36].mxu0 %v1828_v51  ;;  %5364 = vmatprep.mubr.bf16.mxu1 %v3042_v37  ;;  %v2362_v62 = vor.u32 %v2360_v23, %v2359_v21  ;;  %v3047_v35 = vshll.u32 %v6385_v32, 16 }
  0xea   : > { %v635_v9 = vadd.s32 136, %v7656_v6  ;;  %v2364_v40 = vrot.slane %v2359_v21, 4  ;;  %5235 = vmatprep.mubr.bf16.mxu0 %v7531_v44  ;;  %v1495_v11 = vsel %vm7784_vm10, %v1490_v54, %v7775_v7  ;;  %v2874_v15 = vsel %vm8585_vm0, %v2841_v58, 0  ;;  %v3300_v21 = vld [vmem:[#allocation2 + $0x10] sm:$0xf] }
  0xeb   : > { %v3046_v5 = vrot.slane %v3044_v3, 3  ;;  %v2875_v8 = vsel %vm8612_vm8, %v2842_v47, 0  ;;  %vm8747_vm15 = vcmp.ne.s16.totalorder %v1495_v11, 0  ;;  %v10168_v4 = vmov 0 }
  0xec   : > { %v10169_v4 = vsel %vm8747_vm15, 4294967295, %v10168_v4  ;;  %v2363_v37 = vsel %vm8239_vm4, %v8208_v25, %v2362_v62  ;;  %v3049_v44 = vrot.slane %v3047_v35, 4  ;;  %v773_v23 = vand.u32 15, %v635_v9  ;;  %v3301_v62 = vld [vmem:[#allocation2 + $0x14] sm:$0xf] }
  0xed   : > { %10170 = vst [vmem:[#allocation46_spill] sm:$0xff] %v10169_v4  ;;  %v1637_v7 = vsel %vm8747_vm15, %v1121_v22, 0  ;;  %vm8756_vm10 = vcmp.ne.s16.totalorder %v2363_v37, 0  ;;  %v10171_v17 = vmov 0  ;;  %v8763_v58 = vsel %vm8239_vm4, %v2364_v40, %v8206_v18  ;;  %v3302_v35 = vld [vmem:[#allocation2 + $0x18] sm:$0xf] }
  0xee   : > { %v10172_v17 = vsel %vm8756_vm10, 4294967295, %v10171_v17  ;;  %10174 = vst [vmem:[#allocation48_spill] sm:$0xff] %v8763_v58  ;;  %v6386_v30 = vcombine.low %v2874_v15, %v2875_v8  ;;  %v6338_v32 = vcombine.low %v1636_v60, %v1637_v7  ;;  %v2557_v47 = vsel %vm8756_vm10, %v2074_v50, 0  ;;  %v3303_v9 = vld [vmem:[#allocation2 + $0x1c] sm:$0xf] }
  0xef   : > { %10173 = vst [vmem:[#allocation47_spill] sm:$0xff] %v10172_v17  ;;  %v8767_v52 = vor.u32 %v3049_v44, %v3046_v5  ;;  %vm1083_vm2 = vcmp.ne.s32.totalorder %v773_v23, 15  ;;  %v6367_v51 = vcombine.low %v2556_v45, %v2557_v47  ;;  %v2713_v22 = vor.u32 %v2711_v2, %v2709_v57  ;;  %v2075_v37 = vld [vmem:[#allocation2 + $0x48] sm:$0xf] }
  0xf0   : > { %vm2173_vm5 = vmpackc.low %vm1083_vm2, %vm1083_vm2  ;;  %v3053_v54 = vshrl.u32 %v6386_v30, 16  ;;  %v3056_v3 = vshll.u32 %v6386_v30, 16  ;;  %v1830_v11 = vshrl.u32 %v6338_v32, 16  ;;  %v1833_v40 = vshll.u32 %v6338_v32, 16 }
  0xf1   : > { %v2205_v60 = vsel %vm2173_vm5, 65537, %v10107_v38  ;;  %vm9953_vm11 = vcmp.ne.s16.totalorder %v8763_v58, 0  ;;  %v2715_v50 = vshll.u32 %v6367_v51, 16  ;;  %vm10175_vm8 = vsmask.f32 4352 }
  0xf2   : > { %v3051_v5 = vsel %vm10175_vm8, %v8692_v46, %v8767_v52  ;;  %v2375_v45 = vshrl.u32 %v2205_v60, 16  ;;  %v2378_v57 = vshll.u32 %v2205_v60, 16  ;;  %v1832_v2 = vrot.slane %v1830_v11, 3 }
  0xf3   : > { %v1835_v15 = vrot.slane %v1833_v40, 4  ;;  %v2719_v8 = vshrl.u32 %v6367_v51, 16  ;;  %v3055_v44 = vrot.slane %v3053_v54, 3  ;;  %v2717_v23 = vrot.slane %v2715_v50, 1  ;;  %v2076_v54 = vld [vmem:[#allocation2 + $0x4c] sm:$0xf] }
  0xf4   : > { %v2377_v7 = vrot.slane %v2375_v45, 7  ;;  %v3058_v30 = vrot.slane %v3056_v3, 4  ;;  %vm10176_vm2 = vcmp.ne.s16.totalorder %v8206_v18, 0  ;;  %v3334_v39 = vsel %vm8271_vm12, %v3301_v62, 0 }
  0xf5   : > { %v3333_v32 = vsel %vm10176_vm2, %v3300_v21, 0  ;;  %v1836_v47 = vor.u32 %v1835_v15, %v1832_v2  ;;  %vm10177_vm5 = vcmp.ne.s16.totalorder %v8264_v28, 0  ;;  %v3336_v11 = vsel %vm8279_vm1, %v3303_v9, 0  ;;  %v2843_v21 = vld [vmem:[#allocation2 + $0x5c] sm:$0xf] }
  0xf6   : > { %v3335_v46 = vsel %vm10177_vm5, %v3302_v35, 0  ;;  %vm10178_vm8 = vsmask.f32 7424  ;;  %v2380_v40 = vor.u32 %v2378_v57, %v2377_v7  ;;  %v2558_v3 = vsel %vm9953_vm11, %v2075_v37, 0  ;;  %v2077_v2 = vld [vmem:[#allocation2 + $0x50] sm:$0xf] }
  0xf7   : > { %v2718_v51 = vsel %vm10178_vm8, %v2713_v22, %v2717_v23  ;;  %v2721_v60 = vor.u32 %v2719_v8, %v2717_v23  ;;  %vm10179_vm2 = vsmask.f32 4352  ;;  %v8787_v62 = vor.u32 %v3058_v30, %v3055_v44  ;;  %v2844_v15 = vld [vmem:[#allocation2 + $0x60] sm:$0xf] }
  0xf8   : > { %v1837_v50 = vsel %vm10179_vm2, %v8722_v43, %v1836_v47  ;;  %5365 = vmatmul.mubr.bf16.gmra.mrb[40].mxu1 %v2718_v51  ;;  %v6410_v45 = vcombine.low %v3333_v32, %v3334_v39  ;;  %v6411_v35 = vcombine.low %v3335_v46, %v3336_v11  ;;  %vm10180_vm5 = vmmov %vm10179_vm2  ;;  %v2381_v9 = vsel %vm8239_vm4, %v8208_v25, %v2380_v40  ;;  %v3305_v46 = vld [vmem:[#allocation2 + $0x24] sm:$0xf] }
  0xf9   : > { %5236 = vmatmul.mubr.bf16.gmra.mrb[40].mxu0 %v1837_v50  ;;  %5372 = vmatprep.mubr.bf16.mxu1 %v3051_v5  ;;  %v1846_v22 = vsel %vm10180_vm5, %v1836_v47, %v7943_v13  ;;  %v637_v37 = vadd.s32 152, %v7656_v6  ;;  %v2382_v57 = vrot.slane %v2377_v7, 4  ;;  %vm8795_vm8 = vcmp.ne.s16.totalorder %v2381_v9, 0 }
  0xfa   : > { %5243 = vmatprep.mubr.bf16.mxu0 %v7536_v36  ;;  %v10181_v43 = vmov 0  ;;  %v3450_v39 = vshrl.u32 %v6410_v45, 16  ;;  %v3452_v8 = vshll.u32 %v6410_v45, 16  ;;  %v3457_v44 = vshll.u32 %v6411_v35, 16  ;;  %v3304_v36 = vld [vmem:[#allocation2 + $0x20] sm:$0xf] }
  0xfb   : > { %v10182_v43 = vsel %vm8795_vm8, 4294967295, %v10181_v43  ;;  %v2559_v5 = vsel %vm8795_vm8, %v2076_v54, 0  ;;  %v787_v23 = vand.u32 15, %v637_v37  ;;  %v8804_v13 = vsel %vm8239_vm4, %v2382_v57, %v8206_v18  ;;  %v2845_v45 = vld [vmem:[#allocation2 + $0x64] sm:$0xf] }
  0xfc   : > { %10183 = vst [vmem:[#allocation49_spill] sm:$0xff] %v10182_v43  ;;  %10184 = vst [vmem:[#allocation50_spill] sm:$0xff] %v8804_v13  ;;  %v2876_v7 = vsel %vm8660_vm6, %v2843_v21, 0  ;;  %v6368_v30 = vcombine.low %v2558_v3, %v2559_v5  ;;  %v3454_v32 = vrot.slane %v3452_v8, 1  ;;  %v3459_v47 = vrot.slane %v3457_v44, 1 }
  0xfd   : > { %vm9960_vm2 = vcmp.ne.s16.totalorder %v8804_v13, 0  ;;  %v3060_v11 = vsel %vm10180_vm5, %v8767_v52, %v8787_v62  ;;  %vm1085_vm11 = vcmp.ne.s32.totalorder %v787_v23, 15  ;;  %v2877_v54 = vsel %vm8679_vm13, %v2844_v15, 0 }
  0xfe   : > { %v2560_v51 = vsel %vm9960_vm2, %v2077_v2, 0  ;;  %v2723_v40 = vshll.u32 %v6368_v30, 16  ;;  %v3455_v21 = vor.u32 %v3454_v32, %v3450_v39  ;;  %vm2175_vm6 = vmpackc.low %vm1085_vm11, %vm1085_vm11  ;;  %v6387_v3 = vcombine.low %v2876_v7, %v2877_v54  ;;  %v2846_v2 = vld [vmem:[#allocation2 + $0x68] sm:$0xf] }
  0xff   : > { %vm10185_vm0 = vcmp.ne.s16.totalorder %v8313_v0, 0  ;;  %v2207_v9 = vsel %vm2175_vm6, 65537, %v10107_v38  ;;  %v3338_v52 = vsel %vm8382_vm7, %v3305_v46, 0  ;;  %v3461_v37 = vshrl.u32 %v6411_v35, 16  ;;  %v3306_v35 = vld [vmem:[#allocation2 + $0x28] sm:$0xf] }
 0x100   : > { %v3337_v50 = vsel %vm10185_vm0, %v3304_v36, 0  ;;  %v639_v57 = vadd.s32 168, %v7656_v6  ;;  %v2725_v8 = vrot.slane %v2723_v40, 1  ;;  %vm10186_vm5 = vsmask.f32 7424 }
 0x101   : > { %v3460_v15 = vsel %vm10186_vm5, %v3455_v21, %v3459_v47  ;;  %v2393_v44 = vshrl.u32 %v2207_v9, 16  ;;  %v2396_v39 = vshll.u32 %v2207_v9, 16  ;;  %5244 = vmatmul.mubr.bf16.gmra.mrb[44].mxu0 %v1846_v22  ;;  %v2727_v5 = vshrl.u32 %v6368_v30, 16  ;;  %vm10187_vm11 = vmmov %vm10186_vm5 }
 0x102   : > { %v3062_v23 = vshrl.u32 %v6387_v3, 16  ;;  %v3065_v7 = vshll.u32 %v6387_v3, 16  ;;  %v6412_v36 = vcombine.low %v3337_v50, %v3338_v52  ;;  %v2726_v32 = vsel %vm10187_vm11, %v2721_v60, %v2725_v8  ;;  %5477 = vmatprep.mubr.bf16.mxu0 %v3460_v15  ;;  %v7539_v3 = vld [vmem:[#allocation2 + $0x10] sm:$0xff]  }
 0x103   : > { %v2395_v54 = vrot.slane %v2393_v44, 7  ;;  %v3463_v63 = vor.u32 %v3461_v37, %v3459_v47  ;;  %v801_v46 = vand.u32 15, %v639_v57  ;;  %5373 = vmatmul.mubr.bf16.gmra.mrb[44].mxu1 %v2726_v32  ;;  %v2878_v22 = vsel %vm8728_vm3, %v2845_v45, 0 }
 0x104   : > { %v3064_v40 = vrot.slane %v3062_v23, 3  ;;  %v3067_v0 = vrot.slane %v3065_v7, 4  ;;  %v3465_v21 = vshll.u32 %v6412_v36, 16  ;;  %5380 = vmatprep.mubr.bf16.mxu1 %v3060_v11  ;;  %v2879_v60 = vsel %vm8747_vm15, %v2846_v2, 0 }
 0x105   : > { %v2398_v30 = vor.u32 %v2396_v39, %v2395_v54  ;;  %vm1087_vm0 = vcmp.ne.s32.totalorder %v801_v46, 15  ;;  %v2400_v50 = vrot.slane %v2395_v54, 4  ;;  %v2729_v47 = vor.u32 %v2727_v5, %v2725_v8  ;;  %v7543_v39 = vld [vmem:[%s9874_s3 + $0x208] sm:$0xff]  }
 0x106   : > { %v8828_v9 = vor.u32 %v3067_v0, %v3064_v40  ;;  %v3467_v52 = vrot.slane %v3465_v21, 1  ;;  %vm2177_vm6 = vmpackc.low %vm1087_vm0, %vm1087_vm0  ;;  %v6388_v37 = vcombine.low %v2878_v22, %v2879_v60  ;;  %vm10188_vm5 = vcmp.ne.s16.totalorder %v8419_v48, 0 }
 0x107   : > { %v2399_v57 = vsel %vm8239_vm4, %v8208_v25, %v2398_v30  ;;  %v2209_v45 = vsel %vm2177_vm6, 65537, %v10107_v38  ;;  %v8837_v11 = vsel %vm8239_vm4, %v2400_v50, %v8206_v18  ;;  %v3339_v2 = vsel %vm10188_vm5, %v3306_v35, 0  ;;  %v7589_v35 = vld [vmem:[%s9874_s3 + $0x200] sm:$0xff]  }
 0x108   : > { %vm8841_vm11 = vcmp.ne.s16.totalorder %v2399_v57, 0  ;;  %v10189_v0 = vmov 0  ;;  %vm10192_vm0 = vsmask.f32 7424  ;;  %v2411_v15 = vshrl.u32 %v2209_v45, 16  ;;  %v7541_v57 = vld [vmem:[#allocation2 + $0x18] sm:$0xff]  }
 0x109   : > { %v10190_v0 = vsel %vm8841_vm11, 4294967295, %v10189_v0  ;;  %v3468_v8 = vsel %vm10192_vm0, %v3463_v63, %v3467_v52  ;;  %vm10193_vm2 = vnez %v10118_v16  ;;  %v2561_v5 = vsel %vm8841_vm11, %v2078_v19, 0  ;;  %5478 = vmatmul.mubr.bf16.vlgmr.msra.gmra.mrb[48].mxu0 %v7539_v3  ;;  %v2079_v63 = vld [vmem:[#allocation2 + $0x58] sm:$0xf]  ;;  %v2080_v19 = vld [vmem:[#allocation2 + $0x5c] sm:$0xf] }
 0x10a   : > { %10191 = vst [vmem:[#allocation51_spill] sm:$0xff] %v10190_v0  ;;  %v3340_v44 = vsel %vm10193_vm2, %v3307_v49, 0  ;;  %vm10194_vm6 = vsmask.f32 4352  ;;  %v2414_v7 = vshll.u32 %v2209_v45, 16  ;;  %v3071_v32 = vshrl.u32 %v6388_v37, 16  ;;  %7392 = vmatpush3.bf16.msra.mxu0 %v7589_v35  ;;  %5485 = vmatprep.mubr.bf16.mxu0 %v3468_v8 }
 0x10b   : > { %v3069_v23 = vsel %vm10194_vm6, %v8787_v62, %v8828_v9  ;;  %v6369_v54 = vcombine.low %v2560_v51, %v2561_v5  ;;  %v2413_v46 = vrot.slane %v2411_v15, 7  ;;  %vm9961_vm5 = vcmp.ne.s16.totalorder %v8837_v11, 0  ;;  %v2847_v51 = vld [vmem:[#allocation2 + $0x6c] sm:$0xf]  ;;  %7393 = vmatprep.subr.bf16.mxu0 %v7543_v39 }
 0x10c   : > { %v3074_v49 = vshll.u32 %v6388_v37, 16  ;;  %v3073_v40 = vrot.slane %v3071_v32, 3  ;;  %v8860_v21 = vcombine.low %v3339_v2, %v3340_v44  ;;  %v3469_v62 = vshrl.u32 %v6412_v36, 16  ;;  %v7548_v37 = vld [vmem:[%s9874_s3 + $0x210] sm:$0xff]  }
 0x10d   : > { %v641_v22 = vadd.s32 184, %v7656_v6  ;;  %v2731_v30 = vshll.u32 %v6369_v54, 16  ;;  %v2416_v3 = vor.u32 %v2414_v7, %v2413_v46  ;;  %v2735_v50 = vshrl.u32 %v6369_v54, 16  ;;  %v2848_v44 = vld [vmem:[#allocation2 + $0x70] sm:$0xf] }
 0x10e   : > { %v3076_v60 = vrot.slane %v3074_v49, 4  ;;  %v3471_v45 = vor.u32 %v3469_v62, %v3467_v52  ;;  %v3473_v8 = vshll.u32 %v8860_v21, 16  ;;  %v2418_v2 = vrot.slane %v2413_v46, 4  ;;  %v3308_v54 = vld [vmem:[#allocation2 + $0x30] sm:$0xf]  ;;  %7394 = vmatpush3.bf16.msra.mxu0 %v7543_v39 }
 0x10f   : > { %v815_v15 = vand.u32 15, %v641_v22  ;;  %v2733_v36 = vrot.slane %v2731_v30, 1  ;;  %v2417_v5 = vsel %vm8239_vm4, %v8208_v25, %v2416_v3  ;;  %v2562_v7 = vsel %vm9961_vm5, %v2079_v63, 0  ;;  %v3309_v62 = vld [vmem:[#allocation2 + $0x34] sm:$0xf]  ;;  %7395 = vmatprep.subr.bf16.mxu0 %v7548_v37  ;;  %v7553_v3 = vld [vmem:[%s9874_s3 + $0x218] sm:$0xff]  }
 0x110   : > { %v8872_v32 = vor.u32 %v3076_v60, %v3073_v40  ;;  %vm8874_vm0 = vcmp.ne.s16.totalorder %v2417_v5, 0  ;;  %v3475_v52 = vrot.slane %v3473_v8, 1  ;;  %v8885_v46 = vsel %vm8239_vm4, %v2418_v2, %v8206_v18 }
 0x111   : > { %vm8878_vm6 = vcmp.ne.s32.totalorder %v815_v15, 15  ;;  %10199 = vst [vmem:[#allocation52_spill] sm:$0xff] %v8885_v46  ;;  %vm10200_vm5 = vsmask.f32 7424  ;;  %v2563_v40 = vsel %vm8874_vm0, %v2080_v19, 0  ;;  %v2737_v22 = vor.u32 %v2735_v50, %v2733_v36  ;;  %5486 = vmatmul.mubr.bf16.gmra.mrb[52].mxu0 %v7541_v57 }
 0x112   : > { %v2734_v63 = vsel %vm10200_vm5, %v2729_v47, %v2733_v36  ;;  %vm2179_vm15 = vmpackc.low %vm8878_vm6, %vm8878_vm6  ;;  %vm10201_vm3 = vnez %v10026_v55  ;;  %v6370_v39 = vcombine.low %v2562_v7, %v2563_v40  ;;  %vm10202_vm5 = vsmask.f32 4352  ;;  %v2081_v50 = vld [vmem:[#allocation2 + $0x60] sm:$0xf]  ;;  %7396 = vmatpush3.bf16.msra.mxu0 %v7548_v37 }
 0x113   : > { %v2880_v30 = vsel %vm10201_vm3, %v2847_v51, 0  ;;  %5381 = vmatmul.mubr.bf16.gmra.mrb[48].mxu1 %v2734_v63  ;;  %v3078_v47 = vsel %vm10202_vm5, %v8828_v9, %v8872_v32  ;;  %vm10203_vm13 = vsmask.f32 7424  ;;  %v2211_v60 = vsel %vm2179_vm15, 65537, %v10107_v38  ;;  %7397 = vmatprep.subr.bf16.mxu0 %v7553_v3  ;;  %v2082_v63 = vld [vmem:[#allocation2 + $0x64] sm:$0xf] }
 0x114   : > { %v3476_v19 = vsel %vm10203_vm13, %v3471_v45, %v3475_v52  ;;  %5388 = vmatprep.mubr.bf16.mxu1 %v3069_v23  ;;  %v2429_v8 = vshrl.u32 %v2211_v60, 16  ;;  %v2432_v51 = vshll.u32 %v2211_v60, 16  ;;  %vm9968_vm6 = vcmp.ne.s16.totalorder %v8885_v46, 0  ;;  %v7558_v23 = vld [vmem:[%s9874_s3 + $0x220] sm:$0xff]  }
 0x115   : > { %vm10204_vm3 = vnez %v10032_v20  ;;  %v2739_v2 = vshll.u32 %v6370_v39, 16  ;;  %5493 = vmatprep.mubr.bf16.mxu0 %v3476_v19  ;;  %v2743_v36 = vshrl.u32 %v6370_v39, 16  ;;  %vm10205_vm5 = vcmp.ne.s16.totalorder %v8496_v41, 0  ;;  %v7544_v19 = vld [vmem:[#allocation2 + $0x20] sm:$0xff]  }
 0x116   : > { %v2881_v15 = vsel %vm10204_vm3, %v2848_v44, 0  ;;  %v3341_v9 = vsel %vm10205_vm5, %v3308_v54, 0  ;;  %v2431_v57 = vrot.slane %v2429_v8, 7  ;;  %vm10206_vm13 = vnez %v10130_v56  ;;  %v2083_v8 = vld [vmem:[#allocation2 + $0x68] sm:$0xf]  ;;  %7398 = vmatpush3.bf16.msra.mxu0 %v7553_v3 }
 0x117   : > { %v6389_v5 = vcombine.low %v2880_v30, %v2881_v15  ;;  %v3342_v45 = vsel %vm10206_vm13, %v3309_v62, 0  ;;  %v3477_v7 = vshrl.u32 %v8860_v21, 16  ;;  %v643_v44 = vadd.s32 200, %v7656_v6  ;;  %v2849_v62 = vld [vmem:[#allocation2 + $0x74] sm:$0xf]  ;;  %7399 = vmatprep.subr.bf16.mxu0 %v7558_v23 }
 0x118   : > { %v2741_v35 = vrot.slane %v2739_v2, 1  ;;  %v8915_v39 = vcombine.low %v3341_v9, %v3342_v45  ;;  %v2434_v37 = vor.u32 %v2432_v51, %v2431_v57  ;;  %v2564_v54 = vsel %vm9968_vm6, %v2081_v50, 0  ;;  %v2850_v2 = vld [vmem:[#allocation2 + $0x78] sm:$0xf] }
 0x119   : > { %v3080_v40 = vshrl.u32 %v6389_v5, 16  ;;  %v3083_v30 = vshll.u32 %v6389_v5, 16  ;;  %v829_v60 = vand.u32 15, %v643_v44  ;;  %v2436_v15 = vrot.slane %v2431_v57, 4  ;;  %5494 = vmatmul.mubr.bf16.gmra.mrb[56].mxu0 %v7544_v19 }
 0x11a   : > { %vm10207_vm15 = vsmask.f32 7424  ;;  %v3479_v4 = vor.u32 %v3477_v7, %v3475_v52  ;;  %v2435_v5 = vsel %vm8239_vm4, %v8208_v25, %v2434_v37  ;;  %v3481_v51 = vshll.u32 %v8915_v39, 16  ;;  %v7563_v52 = vld [vmem:[%s9874_s3 + $0x228] sm:$0xff]   ;;  %v3311_v7 = vld [vmem:[#allocation2 + $0x3c] sm:$0xf]  ;;  %7400 = vmatpush3.bf16.msra.mxu0 %v7558_v23 }
 0x11b   : > { %v2742_v21 = vsel %vm10207_vm15, %v2737_v22, %v2741_v35  ;;  %v3082_v20 = vrot.slane %v3080_v40, 3  ;;  %v3085_v55 = vrot.slane %v3083_v30, 4  ;;  %vm8924_vm5 = vcmp.ne.s32.totalorder %v829_v60, 15  ;;  %v3310_v22 = vld [vmem:[#allocation2 + $0x38] sm:$0xf]  ;;  %7401 = vmatprep.subr.bf16.mxu0 %v7563_v52 }
 0x11c   : > { %v8931_v9 = vsel %vm8239_vm4, %v2436_v15, %v8206_v18  ;;  %5389 = vmatmul.mubr.bf16.gmra.mrb[52].mxu1 %v2742_v21  ;;  %vm8936_vm15 = vcmp.ne.s16.totalorder %v2435_v5, 0  ;;  %v10211_v3 = vmov 0  ;;  %v2745_v57 = vor.u32 %v2743_v36, %v2741_v35  ;;  %vm2181_vm6 = vmpackc.low %vm8924_vm5, %vm8924_vm5 }
 0x11d   : > { %10210 = vst [vmem:[#allocation53_spill] sm:$0xff] %v8931_v9  ;;  %v10212_v3 = vsel %vm8936_vm15, 4294967295, %v10211_v3  ;;  %v8940_v45 = vor.u32 %v3085_v55, %v3082_v20  ;;  %vm9970_vm3 = vcmp.ne.s16.totalorder %v8931_v9, 0  ;;  %5396 = vmatprep.mubr.bf16.mxu1 %v3078_v47  ;;  %v2565_v44 = vsel %vm8936_vm15, %v2082_v63, 0 }
 0x11e   : > { %10213 = vst [vmem:[#allocation54_spill] sm:$0xff] %v10212_v3  ;;  %v3483_v40 = vrot.slane %v3481_v51, 1  ;;  %v2213_v30 = vsel %vm2181_vm6, 65537, %v10107_v38  ;;  %vm10214_vm13 = vnez %v10029_v10  ;;  %v6371_v55 = vcombine.low %v2564_v54, %v2565_v44  ;;  %v7568_v54 = vld [vmem:[%s9874_s3 + $0x230] sm:$0xff]   ;;  %v2852_v10 = vld [vmem:[#allocation2 + $0x80] sm:$0xf]  ;;  %7402 = vmatpush3.bf16.msra.mxu0 %v7563_v52 }
 0x11f   : > { %v2882_v36 = vsel %vm10214_vm13, %v2849_v62, 0  ;;  %v2447_v20 = vshrl.u32 %v2213_v30, 16  ;;  %v2450_v35 = vshll.u32 %v2213_v30, 16  ;;  %v2566_v37 = vsel %vm9970_vm3, %v2083_v8, 0  ;;  %v2084_v62 = vld [vmem:[#allocation2 + $0x6c] sm:$0xf]  ;;  %7403 = vmatprep.subr.bf16.mxu0 %v7568_v54 }
 0x120   : > { %vm10215_vm5 = vsmask.f32 7424  ;;  %vm10216_vm2 = vnez %v10035_v27  ;;  %vm10217_vm7 = vcmp.ne.s16.totalorder %v8568_v31, 0  ;;  %vm10218_vm6 = vnez %v10141_v53  ;;  %v3623_v3 = vld [vmem:[#allocation2 + $0x3c] sm:$0xf] }
 0x121   : > { %v3484_v60 = vsel %vm10215_vm5, %v3479_v4, %v3483_v40  ;;  %v2883_v47 = vsel %vm10216_vm2, %v2850_v2, 0  ;;  %v3343_v63 = vsel %vm10217_vm7, %v3310_v22, 0  ;;  %v3344_v19 = vsel %vm10218_vm6, %v3311_v7, 0  ;;  %v7546_v2 = vld [vmem:[#allocation2 + $0x28] sm:$0xff]   ;;  %v2851_v22 = vld [vmem:[#allocation2 + $0x7c] sm:$0xf]  ;;  %vm10220_vm7 = vmmov %vm10215_vm5 }
 0x122   : > { %v2747_v15 = vshll.u32 %v6371_v55, 16  ;;  %vm10219_vm3 = vsmask.f32 4352  ;;  %5501 = vmatprep.mubr.bf16.mxu0 %v3484_v60  ;;  %v2449_v4 = vrot.slane %v2447_v20, 7  ;;  %v6390_v8 = vcombine.low %v2882_v36, %v2883_v47  ;;  %v8974_v47 = vpop.f32.mrb[0].mxu0  ;;  %7404 = vmatpush3.bf16.msra.mxu0 %v7568_v54  ;;  %v7549_v54 = vld [vmem:[#allocation2 + $0x30] sm:$0xff]  }
 0x123   : > { %v3087_v23 = vsel %vm10219_vm3, %v8872_v32, %v8940_v45  ;;  %v2751_v21 = vshrl.u32 %v6371_v55, 16  ;;  %v8966_v5 = vcombine.low %v3343_v63, %v3344_v19  ;;  %v3485_v51 = vshrl.u32 %v8915_v39, 16  ;;  %v3312_v55 = vld [vmem:[#allocation2 + $0x40] sm:$0xf]  ;;  %v7573_v39 = vld [vmem:[%s9874_s3 + $0x238] sm:$0xff]   ;;  %v8982_v19 = vpop.f32.mrb[1].mxu0  ;;  %5502 = vmatmul.mubr.bf16.gmra.mrb[60].mxu0 %v7546_v2 }
 0x124   : > { %v645_v50 = vadd.s32 216, %v7656_v6  ;;  %v2749_v7 = vrot.slane %v2747_v15, 1  ;;  %v2452_v44 = vor.u32 %v2450_v35, %v2449_v4  ;;  %v3089_v30 = vshrl.u32 %v6390_v8, 16  ;;  %7405 = vmatprep.subr.bf16.mxu0 %v7573_v39 }
 0x125   : > { %v3092_v27 = vshll.u32 %v6390_v8, 16  ;;  %v3487_v32 = vor.u32 %v3485_v51, %v3483_v40  ;;  %v3489_v20 = vshll.u32 %v8966_v5, 16  ;;  %v2454_v60 = vrot.slane %v2449_v4, 4 }
 0x126   : > { %v843_v36 = vand.u32 15, %v645_v50  ;;  %v2750_v63 = vsel %vm10220_vm7, %v2745_v57, %v2749_v7  ;;  %v2453_v35 = vsel %vm8239_vm4, %v8208_v25, %v2452_v44  ;;  %v3091_v52 = vrot.slane %v3089_v30, 3  ;;  %v8988_v57 = vpop.f32.mrb[2].mxu0  ;;  %7406 = vmatpush3.bf16.msra.mxu0 %v7573_v39 }
 0x127   : > { %vm10221_vm3 = vnez %v10046_v61  ;;  %5397 = vmatmul.mubr.bf16.gmra.mrb[56].mxu1 %v2750_v63  ;;  %vm8984_vm5 = vcmp.ne.s16.totalorder %v2453_v35, 0  ;;  %v10222_v15 = vmov 0  ;;  %v3094_v4 = vrot.slane %v3092_v27, 4  ;;  %v8999_v27 = vpop.f32.mrb[3].mxu0 }
 0x128   : > { %v2884_v40 = vsel %vm10221_vm3, %v2851_v22, 0  ;;  %v10223_v15 = vsel %vm8984_vm5, 4294967295, %v10222_v15  ;;  %v3491_v8 = vrot.slane %v3489_v20, 1  ;;  %vm1093_vm2 = vcmp.ne.s32.totalorder %v843_v36, 15  ;;  %5404 = vmatprep.mubr.bf16.mxu1 %v3087_v23 }
 0x129   : > { %10224 = vst [vmem:[#allocation55_spill] sm:$0xff] %v10223_v15  ;;  %v2567_v51 = vsel %vm8984_vm5, %v2084_v62, 0  ;;  %v2753_v50 = vor.u32 %v2751_v21, %v2749_v7  ;;  %vm2183_vm7 = vmpackc.low %vm1093_vm2, %vm1093_vm2  ;;  %v8995_v22 = vsel %vm8239_vm4, %v2454_v60, %v8206_v18  ;;  %vm10226_vm3 = vnez %v10049_v26  ;;  %v3313_v62 = vld [vmem:[#allocation2 + $0x44] sm:$0xf] }
 0x12a   : > { %10225 = vst [vmem:[#allocation56_spill] sm:$0xff] %v8995_v22  ;;  %v2885_v44 = vsel %vm10226_vm3, %v2852_v10, 0  ;;  %v6372_v2 = vcombine.low %v2566_v37, %v2567_v51  ;;  %v3095_v30 = vor.u32 %v3094_v4, %v3091_v52  ;;  %vm10227_vm13 = vsmask.f32 7424 }
 0x12b   : > { %v3492_v23 = vsel %vm10227_vm13, %v3487_v32, %v3491_v8  ;;  %v2215_v20 = vsel %vm2183_vm7, 65537, %v10107_v38  ;;  %v6391_v36 = vcombine.low %v2884_v40, %v2885_v44  ;;  %vm10228_vm2 = vcmp.ne.s16.totalorder %v8632_v1, 0  ;;  %v2085_v32 = vld [vmem:[#allocation2 + $0x70] sm:$0xf]  ;;  %v2086_v44 = vld [vmem:[#allocation2 + $0x74] sm:$0xf] }
 0x12c   : > { %5509 = vmatprep.mubr.bf16.mxu0 %v3492_v23  ;;  %v2465_v21 = vshrl.u32 %v2215_v20, 16  ;;  %v2468_v7 = vshll.u32 %v2215_v20, 16  ;;  %v3345_v60 = vsel %vm10228_vm2, %v3312_v55, 0  ;;  %v2755_v63 = vshll.u32 %v6372_v2, 16 }
 0x12d   : > { %vm10229_vm3 = vsmask.f32 4352  ;;  %vm9975_vm6 = vcmp.ne.s16.totalorder %v8995_v22, 0  ;;  %v2759_v37 = vshrl.u32 %v6372_v2, 16  ;;  %v3098_v52 = vshrl.u32 %v6391_v36, 16  ;;  %5510 = vmatmul.mubr.bf16.gmra.mrb[64].mxu0 %v7549_v54 }
 0x12e   : > { %v3096_v10 = vsel %vm10229_vm3, %v8940_v45, %v3095_v30  ;;  %v2467_v35 = vrot.slane %v2465_v21, 7  ;;  %v3101_v4 = vshll.u32 %v6391_v36, 16  ;;  %v3346_v51 = vsel %vm8688_vm9, %v3313_v62, 0  ;;  %v3314_v54 = vld [vmem:[#allocation2 + $0x48] sm:$0xf] }
 0x12f   : > { %v2757_v40 = vrot.slane %v2755_v63, 1  ;;  %v9010_v23 = vcombine.low %v3345_v60, %v3346_v51  ;;  %v3493_v55 = vshrl.u32 %v8966_v5, 16  ;;  %v647_v45 = vadd.s32 232, %v7656_v6  ;;  %v2087_v63 = vld [vmem:[#allocation2 + $0x78] sm:$0xf] }
 0x130   : > { %v2470_v20 = vor.u32 %v2468_v7, %v2467_v35  ;;  %v3100_v26 = vrot.slane %v3098_v52, 3  ;;  %v3103_v2 = vrot.slane %v3101_v4, 4  ;;  %v2472_v61 = vrot.slane %v2467_v35, 4  ;;  %v9028_v35 = vld [vmem:[#allocation2 + $0x84] sm:$0xf] }
 0x131   : > { %v2758_v21 = vsel %vm10227_vm13, %v2753_v50, %v2757_v40  ;;  %v2568_v36 = vsel %vm9975_vm6, %v2085_v32, 0  ;;  %v3495_v62 = vor.u32 %v3493_v55, %v3491_v8  ;;  %v3497_v39 = vshll.u32 %v9010_v23, 16  ;;  %v10234_v52 = vld [vmem:[#allocation41_spill] sm:$0xff]  ;;  %v3315_v51 = vld [vmem:[#allocation2 + $0x4c] sm:$0xf] }
 0x132   : > { %5405 = vmatmul.mubr.bf16.gmra.mrb[60].mxu1 %v2758_v21  ;;  %v2471_v5 = vsel %vm8239_vm4, %v8208_v25, %v2470_v20  ;;  %v9021_v60 = vor.u32 %v3103_v2, %v3100_v26  ;;  %v857_v7 = vand.u32 15, %v647_v45  ;;  %v9026_v50 = vsel %vm8239_vm4, %v2472_v61, %v8206_v18  ;;  %v7590_v26 = vld [vmem:[%s9873_s2] ss:$0 sm:$0xff]  ;;  %v9039_v61 = vpop.f32.mrb[0].mxu1  ;;  %v7551_v20 = vld [vmem:[#allocation2 + $0x38] sm:$0xff]  }
 0x133   : > { %10230 = vst [vmem:[#allocation57_spill] sm:$0xff] %v9026_v50  ;;  %5412 = vmatprep.mubr.bf16.mxu1 %v3096_v10  ;;  %vm9030_vm3 = vcmp.ne.s16.totalorder %v2471_v5, 0  ;;  %v10231_v8 = vmov 0  ;;  %v3499_v32 = vrot.slane %v3497_v39, 1  ;;  %v391_v4 = vadd.f32 %v7590_v26, %v10234_v52  ;;  %v3316_v2 = vld [vmem:[#allocation2 + $0x50] sm:$0xf] }
 0x134   : > { %v10232_v8 = vsel %vm9030_vm3, 4294967295, %v10231_v8  ;;  %v2569_v55 = vsel %vm9030_vm3, %v2086_v44, 0  ;;  %v2761_v10 = vor.u32 %v2759_v37, %v2757_v40  ;;  %vm10235_vm2 = vsmask.f32 4352  ;;  %v9045_v21 = vpop.f32.mrb[1].mxu1  ;;  %v10238_v40 = vld [vmem:[#allocation44_spill] sm:$0xff] }
 0x135   : > { %10233 = vst [vmem:[#allocation58_spill] sm:$0xff] %v10232_v8  ;;  %v3105_v45 = vsel %vm10235_vm2, %v3095_v30, %v9021_v60  ;;  %vm1095_vm13 = vcmp.ne.s32.totalorder %v857_v7, 15  ;;  %v9047_v39 = vcombine.low %v2568_v36, %v2569_v55  ;;  %vm10236_vm6 = vsmask.f32 7424  ;;  %v9051_v1 = vpop.f32.mrb[2].mxu1 }
 0x136   : > { %v3500_v5 = vsel %vm10236_vm6, %v3495_v62, %v3499_v32  ;;  %vm2185_vm7 = vmpackc.low %vm1095_vm13, %vm1095_vm13  ;;  %v392_v52 = vadd.f32 %v7590_v26, %v8732_v14  ;;  %v423_v59 = vmax.f32 %v391_v4, 0.0  ;;  %vm10237_vm2 = vcmp.ne.s16.totalorder %v9026_v50, 0  ;;  %v9060_v62 = vpop.f32.mrb[3].mxu1  ;;  %v10240_v4 = vld [vmem:[#allocation19_spill] sm:$0xff] }
 0x137   : > { %5517 = vmatprep.mubr.bf16.mxu0 %v3500_v5  ;;  %v2217_v37 = vsel %vm2185_vm7, 65537, %v10107_v38  ;;  %v2570_v30 = vsel %vm10237_vm2, %v2087_v63, 0  ;;  %vm10239_vm9 = vcmp.ne.s16.totalorder %v10238_v40, 0  ;;  %v3348_v36 = vsel %vm8756_vm10, %v3315_v51, 0  ;;  %v3318_v55 = vld [vmem:[#allocation2 + $0x58] sm:$0xf] }
 0x138   : > { %v3347_v44 = vsel %vm10239_vm9, %v3314_v54, 0  ;;  %v2763_v14 = vshll.u32 %v9047_v39, 16  ;;  %v2483_v7 = vshrl.u32 %v2217_v37, 16  ;;  %v2486_v26 = vshll.u32 %v2217_v37, 16  ;;  %5518 = vmatmul.mubr.bf16.gmra.mrb[68].mxu0 %v7551_v20 }
 0x139   : > { %vm10241_vm6 = vnez %v10240_v4  ;;  %v424_v5 = vmax.f32 %v392_v52, 0.0  ;;  %v455_v53 = vmin.f32 %v423_v59, 6.0  ;;  %v6417_v31 = vcombine.low %v3347_v44, %v3348_v36  ;;  %v2088_v52 = vld [vmem:[#allocation2 + $0x7c] sm:$0xf] }
 0x13a   : > { %v3501_v63 = vshrl.u32 %v9010_v23, 16  ;;  %v2765_v40 = vrot.slane %v2763_v14, 1  ;;  %v2485_v54 = vrot.slane %v2483_v7, 7  ;;  %v649_v51 = vadd.s32 248, %v7656_v6  ;;  %v2089_v14 = vld [vmem:[#allocation2 + $0x80] sm:$0xf] }
 0x13b   : > { %vm10242_vm9 = vcmp.ne.s16.totalorder %v8763_v58, 0  ;;  %v456_v56 = vmin.f32 %v424_v5, 6.0  ;;  %v3505_v37 = vshll.u32 %v6417_v31, 16  ;;  %v3350_v16 = vsel %vm8795_vm8, %v3317_v24, 0  ;;  %v3319_v5 = vld [vmem:[#allocation2 + $0x5c] sm:$0xf] }
 0x13c   : > { %v3349_v17 = vsel %vm10242_vm9, %v3316_v2, 0  ;;  %v3503_v41 = vor.u32 %v3501_v63, %v3499_v32  ;;  %vm10243_vm7 = vsmask.f32 7424  ;;  %v2488_v44 = vor.u32 %v2486_v26, %v2485_v54  ;;  %v7554_v32 = vld [vmem:[#allocation2 + $0x40] sm:$0xff]   ;;  %v3618_v58 = vld [vmem:[#allocation2 + $0x28] sm:$0xf] }
 0x13d   : > { %v2766_v59 = vsel %vm10243_vm7, %v2761_v10, %v2765_v40  ;;  %v2767_v23 = vshrl.u32 %v9047_v39, 16  ;;  %v871_v36 = vand.u32 15, %v649_v51  ;;  %v6791_v20 = vpack.c.bf16 %v456_v56, %v455_v53 }
 0x13e   : > { %5413 = vmatmul.mubr.bf16.gmra.mrb[64].mxu1 %v2766_v59  ;;  %v3507_v6 = vrot.slane %v3505_v37, 1  ;;  %v2490_v7 = vrot.slane %v2485_v54, 4  ;;  %v6418_v2 = vcombine.low %v3349_v17, %v3350_v16  ;;  %v2489_v24 = vsel %vm8239_vm4, %v8208_v25, %v2488_v44  ;;  %v3613_v17 = vld [vmem:[#allocation2 + $0x14] sm:$0x8] }
 0x13f   : > { %5420 = vmatprep.mubr.bf16.mxu1 %v3105_v45  ;;  %vm1097_vm13 = vcmp.ne.s32.totalorder %v871_v36, 15  ;;  %v3509_v10 = vshrl.u32 %v6417_v31, 16  ;;  %vm10244_vm2 = vcmp.ne.s16.totalorder %v8804_v13, 0  ;;  %vm9079_vm9 = vcmp.ne.s16.totalorder %v2489_v24, 0  ;;  %6903 = vst [vmem:[#allocation2 + $0x88] sm:$0xff] %v6791_v20   ;;  %v9089_v45 = vpop.f32.mrb[4].mxu0 }
 0x140   : > { %v3351_v26 = vsel %vm10244_vm2, %v3318_v55, 0  ;;  %v10245_v39 = vmov 0  ;;  %v3508_v56 = vsel %vm10243_vm7, %v3503_v41, %v3507_v6  ;;  %vm2187_vm8 = vmpackc.low %vm1097_vm13, %vm1097_vm13  ;;  %v9087_v16 = vsel %vm8239_vm4, %v2490_v7, %v8206_v18  ;;  %v3614_v41 = vld [vmem:[#allocation2 + $0x18] sm:$0xf]  ;;  %v9095_v54 = vpop.f32.mrb[5].mxu0 }
 0x141   : > { %v10246_v39 = vsel %vm9079_vm9, 4294967295, %v10245_v39  ;;  %10248 = vst [vmem:[#allocation59_spill] sm:$0xff] %v9087_v16  ;;  %v3513_v53 = vshll.u32 %v6418_v2, 16  ;;  %v2571_v31 = vsel %vm9079_vm9, %v2088_v52, 0  ;;  %5525 = vmatprep.mubr.bf16.mxu0 %v3508_v56  ;;  %v2219_v55 = vsel %vm2187_vm8, 65537, %v10107_v38  ;;  %v9101_v20 = vpop.f32.mrb[6].mxu0  ;;  %vm10251_vm13 = vmmov %vm10243_vm7 }
 0x142   : > { %10247 = vst [vmem:[#allocation41_spill] sm:$0xff] %v10246_v39  ;;  %vm9987_vm2 = vcmp.ne.s16.totalorder %v9087_v16, 0  ;;  %v3511_v63 = vor.u32 %v3509_v10, %v3507_v6  ;;  %v9097_v51 = vcombine.low %v2570_v30, %v2571_v31  ;;  %v2769_v37 = vor.u32 %v2767_v23, %v2765_v40  ;;  %v9099_v36 = vld [vmem:[#allocation2 + $0x1c] sm:$0xf]  ;;  %5526 = vmatmul.mubr.bf16.gmra.mrb[72].mxu0 %v7554_v32  ;;  %v9107_v24 = vpop.f32.mrb[7].mxu0  ;;  %v10252_v32 = vld [vmem:[#allocation6_spill] sm:$0xff] }
 0x143   : > { %v2501_v59 = vshrl.u32 %v2219_v55, 16  ;;  %v2504_v44 = vshll.u32 %v2219_v55, 16  ;;  %v2572_v52 = vsel %vm9987_vm2, %v2089_v14, 0  ;;  %v3515_v38 = vrot.slane %v3513_v53, 1  ;;  %v10249_v10 = vld [vmem:[#allocation4_spill] sm:$0xff] }
 0x144   : > { %v3352_v6 = vsel %vm8841_vm11, %v3319_v5, 0  ;;  %v3517_v7 = vshrl.u32 %v6418_v2, 16  ;;  %v2771_v30 = vshll.u32 %v9097_v51, 16  ;;  %vm10250_vm8 = vcmp.ne.s16.totalorder %v10249_v10, 0  ;;  %v2090_v31 = vld [vmem:[#allocation2 + $0x84] sm:$0xf] }
 0x145   : > { %v2503_v40 = vrot.slane %v2501_v59, 7  ;;  %v9110_v23 = vcombine.low %v3351_v26, %v3352_v6  ;;  %v3646_v56 = vsel %vm10250_vm8, %v3613_v17, 0  ;;  %v2775_v55 = vshrl.u32 %v9097_v51, 16  ;;  %v10254_v2 = vld [vmem:[#allocation7_spill] sm:$0xff]  ;;  %v7556_v59 = vld [vmem:[#allocation2 + $0x48] sm:$0xff]  }
 0x146   : > { %v3516_v14 = vsel %vm10251_vm13, %v3511_v63, %v3515_v38  ;;  %vm10253_vm7 = vnez %v10252_v32  ;;  %vm10255_vm2 = vnez %v10254_v2  ;;  %v2773_v0 = vrot.slane %v2771_v30, 1  ;;  %v2854_v17 = vld [vmem:[#allocation2 + $0x88] sm:$0xf]  ;;  %v2855_v10 = vld [vmem:[#allocation2 + $0x8c] sm:$0xf]  ;;  %v10258_v30 = vld [vmem:[#allocation20_spill] sm:$0xff] }
 0x147   : > { %v3647_v53 = vsel %vm10253_vm7, %v3614_v41, 0  ;;  %v3648_v5 = vsel %vm10255_vm2, %v9099_v36, 0  ;;  %v2506_v13 = vor.u32 %v2504_v44, %v2503_v40  ;;  %5533 = vmatprep.mubr.bf16.mxu0 %v3516_v14  ;;  %v2508_v26 = vrot.slane %v2503_v40, 4  ;;  %v2091_v43 = vld [vmem:[#allocation2 + $0x88] sm:$0x1]  ;;  %vm10257_vm2 = vmmov %vm10251_vm13 }
 0x148   : > { %v3521_v6 = vshll.u32 %v9110_v23, 16  ;;  %v3519_v51 = vor.u32 %v3517_v7, %v3515_v38  ;;  %v9124_v63 = vadd.f32 %v8982_v19, %v8974_v47  ;;  %v9128_v41 = vadd.f32 %v9045_v21, %v9039_v61  ;;  %v3616_v7 = vld [vmem:[#allocation2 + $0x20] sm:$0xf] }
 0x149   : > { %v9132_v44 = vadd.f32 %v8999_v27, %v8988_v57  ;;  %v2774_v36 = vsel %vm10257_vm2, %v2769_v37, %v2773_v0  ;;  %vm10259_vm8 = vnez %v10258_v30  ;;  %v2507_v38 = vsel %vm8239_vm4, %v8208_v25, %v2506_v13  ;;  %v9156_v25 = vpop.f32.mrb[4].mxu1  ;;  %v3320_v30 = vld [vmem:[#allocation2 + $0x60] sm:$0xf] }
 0x14a   : > { %10256 = vst [vmem:[#allocation4_spill] sm:$0xff] %v9128_v41  ;;  %v2887_v40 = vsel %vm10259_vm8, %v2854_v17, 0  ;;  %v9140_v47 = vcombine.low %v3646_v56, %v3647_v53  ;;  %5421 = vmatmul.mubr.bf16.gmra.mrb[68].mxu1 %v2774_v36  ;;  %v10260_v19 = vsel %vm10241_vm6, %v9028_v35, 0  ;;  %vm9146_vm13 = vcmp.ne.s16.totalorder %v2507_v38, 0  ;;  %v9162_v56 = vpop.f32.mrb[5].mxu1  ;;  %5534 = vmatmul.mubr.bf16.gmra.mrb[76].mxu0 %v7556_v59  ;;  %v7559_v59 = vld [vmem:[#allocation2 + $0x50] sm:$0xff]  }
 0x14b   : > { %v6392_v61 = vcombine.low %v10260_v19, %v2887_v40  ;;  %vm10263_vm7 = vcmp.ne.s16.totalorder %v7795_v34, 0  ;;  %vm9152_vm2 = vcmp.ne.s16.totalorder %v2508_v26, 0  ;;  %v2573_v29 = vsel %vm9146_vm13, %v2090_v31, 0  ;;  %v9164_v26 = vpop.f32.mrb[6].mxu1  ;;  %v10267_v40 = vld [vmem:[#allocation8_spill] sm:$0xff] }
 0x14c   : > { %v2888_v27 = vsel %vm10263_vm7, %v2855_v10, 0  ;;  %v2574_v35 = vsel %vm9152_vm2, %v2091_v43, 0  ;;  %v3523_v37 = vrot.slane %v3521_v6, 1  ;;  %v6375_v53 = vcombine.low %v2572_v52, %v2573_v29  ;;  %v9169_v38 = vpop.f32.mrb[7].mxu1 }
 0x14d   : > { %v6393_v13 = vcombine.low %v2888_v27, %v2888_v27  ;;  %v3107_v14 = vshrl.u32 %v6392_v61, 16  ;;  %v3110_v32 = vshll.u32 %v6392_v61, 16  ;;  %v6376_v2 = vcombine.low %v2574_v35, %v2574_v35 }
 0x14e   : > { %vm10266_vm4 = vsmask.f32 7424  ;;  %vm10268_vm7 = vnez %v10267_v40  ;;  %v2777_v19 = vor.u32 %v2775_v55, %v2773_v0  ;;  %v2779_v27 = vshll.u32 %v6375_v53, 16  ;;  %v3617_v40 = vld [vmem:[#allocation2 + $0x24] sm:$0xf] }
 0x14f   : > { %v3116_v17 = vshrl.u32 %v6393_v13, 16  ;;  %v3119_v10 = vshll.u32 %v6393_v13, 16  ;;  %v3524_v36 = vsel %vm10266_vm4, %v3519_v51, %v3523_v37  ;;  %v3649_v31 = vsel %vm10268_vm7, %v3616_v7, 0  ;;  %v3321_v51 = vld [vmem:[#allocation2 + $0x64] sm:$0xf] }
 0x150   : > { %v3109_v43 = vrot.slane %v3107_v14, 3  ;;  %v3112_v6 = vrot.slane %v3110_v32, 4  ;;  %5541 = vmatprep.mubr.bf16.mxu0 %v3524_v36  ;;  %v2787_v29 = vshll.u32 %v6376_v2, 16  ;;  %v6428_v35 = vcombine.low %v3648_v5, %v3649_v31  ;;  %v3322_v14 = vld [vmem:[#allocation2 + $0x68] sm:$0xf]  ;;  %v9177_v36 = vpop.f32.mrb[8].mxu0 }
 0x151   : > { %v3118_v61 = vrot.slane %v3116_v17, 3  ;;  %v3121_v52 = vrot.slane %v3119_v10, 4  ;;  %v2781_v34 = vrot.slane %v2779_v27, 1  ;;  %v2783_v13 = vshrl.u32 %v6375_v53, 16  ;;  %v3323_v2 = vld [vmem:[#allocation2 + $0x6c] sm:$0xf] }
 0x152   : > { %v3113_v41 = vor.u32 %v3112_v6, %v3109_v43  ;;  %v3763_v7 = vshrl.u32 %v9140_v47, 16  ;;  %vm10269_vm4 = vsmask.f32 4352  ;;  %vm10270_vm7 = vsmask.f32 7424  ;;  %5542 = vmatmul.mubr.bf16.gmra.mrb[80].mxu0 %v7559_v59  ;;  %v9184_v6 = vpop.f32.mrb[9].mxu0 }
 0x153   : > { %v3122_v4 = vor.u32 %v3121_v52, %v3118_v61  ;;  %v2782_v55 = vsel %vm10270_vm7, %v2777_v19, %v2781_v34  ;;  %v3766_v32 = vshll.u32 %v9140_v47, 16  ;;  %vm10271_vm8 = vmmov %vm10269_vm4  ;;  %v2789_v53 = vrot.slane %v2787_v29, 1  ;;  %v3324_v19 = vld [vmem:[#allocation2 + $0x70] sm:$0xf]  ;;  %v9186_v27 = vpop.f32.mrb[10].mxu0  ;;  %v10273_v61 = vld [vmem:[#allocation13_spill] sm:$0xff] }
 0x154   : > { %v3114_v0 = vsel %vm10269_vm4, %v9021_v60, %v3113_v41  ;;  %v3771_v17 = vshrl.u32 %v6428_v35, 16  ;;  %v3774_v10 = vshll.u32 %v6428_v35, 16  ;;  %v2785_v31 = vor.u32 %v2783_v13, %v2781_v34  ;;  %v10275_v52 = vld [vmem:[#allocation14_spill] sm:$0xff]  ;;  %v9196_v59 = vpop.f32.mrb[11].mxu0 }
 0x155   : > { %5428 = vmatprep.mubr.bf16.mxu1 %v3114_v0  ;;  %v3123_v5 = vsel %vm10271_vm8, %v3113_v41, %v3122_v4  ;;  %vm10272_vm6 = vcmp.ne.s16.totalorder %v8837_v11, 0  ;;  %v3354_v60 = vsel %vm8874_vm0, %v3321_v51, 0  ;;  %v3525_v47 = vshrl.u32 %v9110_v23, 16  ;;  %v3325_v0 = vld [vmem:[#allocation2 + $0x74] sm:$0xf] }
 0x156   : > { %5429 = vmatmul.mubr.bf16.gmra.mrb[72].mxu1 %v2782_v55  ;;  %v3353_v43 = vsel %vm10272_vm6, %v3320_v30, 0  ;;  %v3765_v4 = vrot.slane %v3763_v7, 3  ;;  %vm10274_vm8 = vnez %v10273_v61  ;;  %vm10276_vm4 = vnez %v10275_v52  ;;  %v7561_v61 = vld [vmem:[#allocation2 + $0x58] sm:$0xff]  }
 0x157   : > { %5436 = vmatprep.mubr.bf16.mxu1 %v3123_v5  ;;  %v6420_v41 = vcombine.low %v3353_v43, %v3354_v60  ;;  %v3650_v34 = vsel %vm10274_vm8, %v3617_v40, 0  ;;  %v3651_v29 = vsel %vm10276_vm4, %v3618_v58, 0  ;;  %vm10277_vm6 = vcmp.ne.s16.totalorder %v8885_v46, 0  ;;  %v7557_v5 = vld [vmem:[#allocation2 + $0x18] sm:$0xff]   ;;  %vm10279_vm4 = vmmov %vm10270_vm7 }
 0x158   : > { %v3355_v30 = vsel %vm10277_vm6, %v3322_v14, 0  ;;  %v3356_v23 = vsel %vm8936_vm15, %v3323_v2, 0  ;;  %v3768_v35 = vrot.slane %v3766_v32, 4  ;;  %v3527_v13 = vor.u32 %v3525_v47, %v3523_v37  ;;  %v3326_v37 = vld [vmem:[#allocation2 + $0x78] sm:$0xf]  ;;  %v10297_v46 = vld [vmem:[#allocation24_spill] sm:$0xff] }
 0x159   : > { %v3529_v51 = vshll.u32 %v6420_v41, 16  ;;  %v6421_v7 = vcombine.low %v3355_v30, %v3356_v23  ;;  %v2790_v55 = vsel %vm10270_vm7, %v2785_v31, %v2789_v53  ;;  %v3773_v40 = vrot.slane %v3771_v17, 3  ;;  %v3327_v47 = vld [vmem:[#allocation2 + $0x7c] sm:$0xf]  ;;  %v3619_v53 = vld [vmem:[#allocation2 + $0x2c] sm:$0xf]  ;;  %vm10281_vm7 = vmmov %vm10279_vm4 }
 0x15a   : > { %v3776_v43 = vrot.slane %v3774_v10, 4  ;;  %v3533_v60 = vshrl.u32 %v6420_v41, 16  ;;  %v6429_v52 = vcombine.low %v3650_v34, %v3651_v29  ;;  %vm10278_vm8 = vcmp.ne.s16.totalorder %v8931_v9, 0  ;;  %v3620_v31 = vld [vmem:[#allocation2 + $0x30] sm:$0xf]  ;;  %v7566_v9 = vld [vmem:[#allocation2 + $0x68] sm:$0xff]  }
 0x15b   : > { %v3531_v58 = vrot.slane %v3529_v51, 1  ;;  %v3537_v14 = vshll.u32 %v6421_v7, 16  ;;  %v3357_v2 = vsel %vm10278_vm8, %v3324_v19, 0  ;;  %v3358_v32 = vsel %vm8984_vm5, %v3325_v0, 0 }
 0x15c   : > { %v3541_v17 = vshrl.u32 %v6421_v7, 16  ;;  %v3769_v10 = vor.u32 %v3768_v35, %v3765_v4  ;;  %v3777_v41 = vor.u32 %v3776_v43, %v3773_v40  ;;  %v6422_v29 = vcombine.low %v3357_v2, %v3358_v32  ;;  %v10284_v35 = vld [vmem:[#allocation18_spill] sm:$0xff]  ;;  %v7560_v2 = vld [vmem:[#allocation2 + $0x20] sm:$0xff]   ;;  %v3621_v32 = vld [vmem:[#allocation2 + $0x34] sm:$0xf] }
 0x15d   : > { %v3532_v30 = vsel %vm10279_vm4, %v3527_v13, %v3531_v58  ;;  %v3535_v23 = vor.u32 %v3533_v60, %v3531_v58  ;;  %v3539_v34 = vrot.slane %v3537_v14, 1  ;;  %v3780_v19 = vshrl.u32 %v6429_v52, 16  ;;  %v9208_v60 = vpop.f32.mrb[8].mxu1 }
 0x15e   : > { %5437 = vmatmul.mubr.bf16.gmra.mrb[76].mxu1 %v2790_v55  ;;  %5549 = vmatprep.mubr.bf16.mxu0 %v3532_v30  ;;  %v3783_v51 = vshll.u32 %v6429_v52, 16  ;;  %vm10280_vm6 = vcmp.ne.s16.totalorder %v8995_v22, 0  ;;  %v3360_v13 = vsel %vm9030_vm3, %v3327_v47, 0  ;;  %v10282_v55 = vld [vmem:[#allocation17_spill] sm:$0xff]  ;;  %vm10285_vm4 = vnez %v10284_v35 }
 0x15f   : > { %5638 = vmatprep.mubr.bf16.mxu1 %v7557_v5  ;;  %5550 = vmatmul.mubr.bf16.gmra.mrb[84].mxu0 %v7561_v61  ;;  %v3359_v0 = vsel %vm10280_vm6, %v3326_v37, 0  ;;  %v3540_v7 = vsel %vm10281_vm7, %v3535_v23, %v3539_v34  ;;  %vm10283_vm8 = vnez %v10282_v55  ;;  %v3653_v40 = vsel %vm10285_vm4, %v3620_v31, 0  ;;  %v9215_v5 = vpop.f32.mrb[9].mxu1  ;;  %v3328_v37 = vld [vmem:[#allocation2 + $0x80] sm:$0xf] }
 0x160   : > { %v3652_v4 = vsel %vm10283_vm8, %v3619_v53, 0  ;;  %5557 = vmatprep.mubr.bf16.mxu0 %v3540_v7  ;;  %v3543_v43 = vor.u32 %v3541_v17, %v3539_v34  ;;  %v3545_v58 = vshll.u32 %v6422_v29, 16  ;;  %v9217_v61 = vcombine.low %v3359_v0, %v3360_v13  ;;  %v9219_v52 = vpop.f32.mrb[10].mxu1  ;;  %v7564_v53 = vld [vmem:[#allocation2 + $0x60] sm:$0xff]   ;;  %v3622_v7 = vld [vmem:[#allocation2 + $0x38] sm:$0xf] }
 0x161   : > { %vm10286_vm6 = vsmask.f32 4352  ;;  %v9222_v47 = vpop.f32.mrb[11].mxu1  ;;  %v3782_v30 = vrot.slane %v3780_v19, 3  ;;  %v3785_v23 = vrot.slane %v3783_v51, 4  ;;  %v6430_v31 = vcombine.low %v3652_v4, %v3653_v40  ;;  %v10287_v13 = vld [vmem:[#allocation21_spill] sm:$0xff] }
 0x162   : > { %v3778_v14 = vsel %vm10286_vm6, %v3769_v10, %v3777_v41  ;;  %v3547_v55 = vrot.slane %v3545_v58, 1  ;;  %v3329_v35 = vld [vmem:[#allocation2 + $0x84] sm:$0xf]  ;;  %v3549_v34 = vshrl.u32 %v6422_v29, 16  ;;  %v3553_v0 = vshll.u32 %v9217_v61, 16  ;;  %v9232_v51 = vpop.f32.mrb[12].mxu0 }
 0x163   : > { %vm10288_vm8 = vnez %v10287_v13  ;;  %vm10289_vm4 = vcmp.ne.s16.totalorder %v9026_v50, 0  ;;  %v3362_v19 = vsel %vm9079_vm9, %v3329_v35, 0  ;;  %v3786_v4 = vor.u32 %v3785_v23, %v3782_v30  ;;  %v10290_v29 = vld [vmem:[#allocation22_spill] sm:$0xff]  ;;  %v9238_v13 = vpop.f32.mrb[13].mxu0 }
 0x164   : > { %v3548_v17 = vsel %vm10281_vm7, %v3543_v43, %v3547_v55  ;;  %v3654_v10 = vsel %vm10288_vm8, %v3621_v32, 0  ;;  %v3361_v8 = vsel %vm10289_vm4, %v3328_v37, 0  ;;  %v3789_v40 = vshrl.u32 %v6430_v31, 16  ;;  %v9242_v37 = vpop.f32.mrb[14].mxu0 }
 0x165   : > { %v3792_v43 = vshll.u32 %v6430_v31, 16  ;;  %vm10291_vm6 = vnez %v10290_v29  ;;  %v3551_v35 = vor.u32 %v3549_v34, %v3547_v55  ;;  %v3555_v39 = vrot.slane %v3553_v0, 1  ;;  %v9248_v30 = vpop.f32.mrb[15].mxu0  ;;  %v3331_v31 = vld [vmem:[#allocation2 + $0x8c] sm:$0xf] }
 0x166   : > { %5639 = vmatmul.mubr.bf16.vlgmr.msra.gmra.mrb[80].mxu1 %v3778_v14  ;;  %v3655_v58 = vsel %vm10291_vm6, %v3622_v7, 0  ;;  %v9236_v14 = vpop.f32.mrb[12].mxu1  ;;  %v9244_v50 = vcombine.low %v3361_v8, %v3362_v19  ;;  %vm10292_vm7 = vsmask.f32 4352  ;;  %v3791_v22 = vrot.slane %v3789_v40, 3 }
 0x167   : > { %5646 = vmatprep.mubr.bf16.mxu1 %v7560_v2  ;;  %5558 = vmatmul.mubr.bf16.gmra.mrb[88].mxu0 %v7564_v53  ;;  %v9240_v32 = vpop.f32.mrb[13].mxu1  ;;  %v6431_v23 = vcombine.low %v3654_v10, %v3655_v58  ;;  %v3330_v53 = vld [vmem:[#allocation2 + $0x88] sm:$0xf]  ;;  %v3787_v29 = vsel %vm10292_vm7, %v3777_v41, %v3786_v4  ;;  %v3794_v15 = vrot.slane %v3792_v43, 4  ;;  %v3624_v55 = vld [vmem:[#allocation2 + $0x40] sm:$0xf]  ;;  %v9262_v40 = vadd.f32 %v9060_v62, %v9051_v1 }
 0x168   : > { %5565 = vmatprep.mubr.bf16.mxu0 %v3548_v17  ;;  %v9246_v2 = vpop.f32.mrb[14].mxu1  ;;  %v7562_v17 = vld [vmem:[#allocation2 + $0x28] sm:$0xff]   ;;  %v3557_v8 = vshrl.u32 %v9217_v61, 16  ;;  %vm10293_vm8 = vsmask.f32 7424  ;;  %v3561_v0 = vshll.u32 %v9244_v50, 16  ;;  %vm10298_vm7 = vnez %v10297_v46 }
 0x169   : > { %v9250_v7 = vpop.f32.mrb[15].mxu1  ;;  %v3556_v34 = vsel %vm10293_vm8, %v3551_v35, %v3555_v39  ;;  %vm10294_vm4 = vcmp.ne.s16.totalorder %v9087_v16, 0  ;;  %v3364_v19 = vsel %vm9146_vm13, %v3331_v31, 0  ;;  %v3798_v41 = vshrl.u32 %v6431_v23, 16  ;;  %v10295_v61 = vld [vmem:[#allocation23_spill] sm:$0xff] }
 0x16a   : > { %v3363_v10 = vsel %vm10294_vm4, %v3330_v53, 0  ;;  %v3801_v58 = vshll.u32 %v6431_v23, 16  ;;  %v3795_v43 = vor.u32 %v3794_v15, %v3791_v22  ;;  %vm10296_vm6 = vnez %v10295_v61  ;;  %v3626_v22 = vld [vmem:[#allocation2 + $0x48] sm:$0xf]  ;;  %v3332_v46 = vld [vmem:[#allocation2 + $0x90] sm:$0x1] }
 0x16b   : > { %v3656_v35 = vsel %vm10296_vm6, %v3623_v3, 0  ;;  %v3657_v16 = vsel %vm10298_vm7, %v3624_v55, 0  ;;  %v9268_v53 = vcombine.low %v3363_v10, %v3364_v19  ;;  %v9272_v31 = vadd.f32 %v9095_v54, %v9089_v45  ;;  %v7565_v45 = vld [vmem:[#allocation2 + $0x30] sm:$0xff]  }
 0x16c   : > { %v9276_v1 = vadd.f32 %v9162_v56, %v9156_v25  ;;  %v3559_v62 = vor.u32 %v3557_v8, %v3555_v39  ;;  %v3563_v15 = vrot.slane %v3561_v0, 1  ;;  %v3800_v23 = vrot.slane %v3798_v41, 3  ;;  %v7569_v54 = vld [vmem:[#allocation2 + $0x70] sm:$0xff]   ;;  %v10302_v8 = vld [vmem:[#allocation28_spill] sm:$0xff]  ;;  %v4090_v41 = vld [vmem:[#allocation2 + $0x18] sm:$0xf] }
 0x16d   : > { %v3803_v3 = vrot.slane %v3801_v58, 4  ;;  %vm10299_vm8 = vsmask.f32 4352  ;;  %v9285_v25 = vadd.f32 %v9169_v38, %v9164_v26  ;;  %v10300_v39 = vld [vmem:[#allocation26_spill] sm:$0xff]  ;;  %vm10303_vm6 = vnez %v10302_v8  ;;  %v4091_v58 = vld [vmem:[#allocation2 + $0x1c] sm:$0xf] }
 0x16e   : > { %5647 = vmatmul.mubr.bf16.gmra.mrb[84].mxu1 %v3787_v29  ;;  %v6432_v29 = vcombine.low %v3656_v35, %v3657_v16  ;;  %v3796_v55 = vsel %vm10299_vm8, %v3786_v4, %v3795_v43  ;;  %vm10301_vm4 = vnez %v10300_v39  ;;  %v3565_v16 = vshrl.u32 %v9244_v50, 16  ;;  %v3628_v4 = vld [vmem:[#allocation2 + $0x50] sm:$0xf]  ;;  %v10305_v50 = vld [vmem:[#allocation29_spill] sm:$0xff] }
 0x16f   : > { %5654 = vmatprep.mubr.bf16.mxu1 %v7562_v17  ;;  %5566 = vmatmul.mubr.bf16.gmra.mrb[92].mxu0 %v7566_v9  ;;  %v3625_v9 = vld [vmem:[#allocation2 + $0x44] sm:$0xf]  ;;  %v9280_v17 = vadd.f32 %v9107_v24, %v9101_v20  ;;  %v3569_v0 = vshll.u32 %v9268_v53, 16  ;;  %v3627_v20 = vld [vmem:[#allocation2 + $0x4c] sm:$0xf]  ;;  %v3365_v10 = vsel %vm9152_vm2, %v3332_v46, 0  ;;  %v9296_v26 = vor.u32 %v3803_v3, %v3800_v23 }
 0x170   : > { %5573 = vmatprep.mubr.bf16.mxu0 %v3556_v34  ;;  %v3658_v56 = vsel %vm10301_vm4, %v3625_v9, 0  ;;  %v3659_v34 = vsel %vm10303_vm6, %v3626_v22, 0  ;;  %vm10304_vm7 = vsmask.f32 7424  ;;  %v3807_v38 = vshrl.u32 %v6432_v29, 16  ;;  %v10307_v22 = vld [vmem:[#allocation30_spill] sm:$0xff] }
 0x171   : > { %v3564_v24 = vsel %vm10304_vm7, %v3559_v62, %v3563_v15  ;;  %v3810_v19 = vshll.u32 %v6432_v29, 16  ;;  %v6433_v61 = vcombine.low %v3658_v56, %v3659_v34  ;;  %vm10306_vm8 = vnez %v10305_v50  ;;  %v4092_v23 = vld [vmem:[#allocation2 + $0x20] sm:$0xf] }
 0x172   : > { %v3660_v35 = vsel %vm10306_vm8, %v3627_v20, 0  ;;  %v3567_v9 = vor.u32 %v3565_v16, %v3563_v15  ;;  %v3571_v62 = vrot.slane %v3569_v0, 1  ;;  %vm10308_vm4 = vnez %v10307_v22  ;;  %v4093_v16 = vld [vmem:[#allocation2 + $0x24] sm:$0xf] }
 0x173   : > { %v3661_v39 = vsel %vm10308_vm4, %v3628_v4, 0  ;;  %v6426_v46 = vcombine.low %v3365_v10, %v3365_v10  ;;  %vm10309_vm6 = vcmp.ne.s16.totalorder %v8206_v18, 0  ;;  %v4124_v29 = vsel %vm8271_vm12, %v4091_v58, 0  ;;  %v10313_v22 = vld [vmem:[#allocation33_spill] sm:$0xff] }
 0x174   : > { %v4123_v3 = vsel %vm10309_vm6, %v4090_v41, 0  ;;  %v9314_v15 = vadd.f32 %v9215_v5, %v9208_v60  ;;  %vm10310_vm7 = vsmask.f32 4352  ;;  %v3809_v18 = vrot.slane %v3807_v38, 3  ;;  %v3630_v41 = vld [vmem:[#allocation2 + $0x58] sm:$0xf] }
 0x175   : > { %v3805_v8 = vsel %vm10310_vm7, %v3795_v43, %v9296_v26  ;;  %v3812_v34 = vrot.slane %v3810_v19, 4  ;;  %v3816_v20 = vshrl.u32 %v6433_v61, 16  ;;  %v9328_v60 = vadd.f32 %v9196_v59, %v9186_v27  ;;  %v3629_v19 = vld [vmem:[#allocation2 + $0x54] sm:$0xf] }
 0x176   : > { %5655 = vmatmul.mubr.bf16.gmra.mrb[88].mxu1 %v3796_v55  ;;  %v9302_v55 = vpop.f32.mrb[16].mxu0  ;;  %v9332_v5 = vadd.f32 %v9222_v47, %v9219_v52  ;;  %v6434_v10 = vcombine.low %v3660_v35, %v3661_v39  ;;  %v3573_v38 = vshrl.u32 %v9268_v53, 16  ;;  %v6460_v58 = vcombine.low %v4123_v3, %v4124_v29 }
 0x177   : > { %5662 = vmatprep.mubr.bf16.mxu1 %v7565_v45  ;;  %5574 = vmatmul.mubr.bf16.gmra.mrb[96].mxu0 %v7569_v54  ;;  %v9310_v45 = vadd.f32 %v9184_v6, %v9177_v36  ;;  %v9316_v54 = vpop.f32.mrb[16].mxu1  ;;  %v9318_v56 = vpop.f32.mrb[17].mxu0  ;;  %v7567_v36 = vld [vmem:[#allocation2 + $0x38] sm:$0xff]   ;;  %vm10311_vm12 = vsmask.f32 7424  ;;  %v3577_v27 = vshll.u32 %v6426_v46, 16  ;;  %v3813_v47 = vor.u32 %v3812_v34, %v3809_v18 }
 0x178   : > { %5581 = vmatprep.mubr.bf16.mxu0 %v3564_v24  ;;  %v9322_v33 = vpop.f32.mrb[17].mxu1  ;;  %v9324_v0 = vpop.f32.mrb[18].mxu0  ;;  %v7571_v6 = vld [vmem:[#allocation2 + $0x78] sm:$0xff]   ;;  %v3819_v24 = vshll.u32 %v6433_v61, 16  ;;  %v3572_v61 = vsel %vm10311_vm12, %v3567_v9, %v3571_v62  ;;  %vm10312_vm8 = vcmp.ne.s16.totalorder %v8264_v28, 0  ;;  %v4126_v52 = vsel %vm8279_vm1, %v4093_v16, 0  ;;  %vm10315_vm1 = vmmov %vm10310_vm7 }
 0x179   : > { %v9334_v43 = vpop.f32.mrb[18].mxu1  ;;  %v9336_v4 = vpop.f32.mrb[19].mxu0  ;;  %v4125_v59 = vsel %vm10312_vm8, %v4092_v23, 0  ;;  %v3818_v35 = vrot.slane %v3816_v20, 3  ;;  %vm10314_vm4 = vnez %v10313_v22  ;;  %v3663_v3 = vsel %vm8530_vm14, %v3630_v41, 0  ;;  %v7570_v16 = vld [vmem:[#allocation2 + $0x40] sm:$0xff]   ;;  %vm10320_vm7 = vmmov %vm10311_vm12 }
 0x17a   : > { %v9339_v50 = vpop.f32.mrb[19].mxu1  ;;  %v3821_v53 = vrot.slane %v3819_v24, 4  ;;  %v3662_v39 = vsel %vm10314_vm4, %v3629_v19, 0  ;;  %v9350_v9 = vcombine.low %v4125_v59, %v4126_v52  ;;  %v4242_v28 = vshll.u32 %v6460_v58, 16  ;;  %v4094_v46 = vld [vmem:[#allocation2 + $0x28] sm:$0xf]  ;;  %vm10324_vm4 = vmmov %vm10315_vm1 }
 0x17b   : > { %v3825_v23 = vshrl.u32 %v6434_v10, 16  ;;  %v3828_v42 = vshll.u32 %v6434_v10, 16  ;;  %v3575_v29 = vor.u32 %v3573_v38, %v3571_v62  ;;  %v4095_v18 = vld [vmem:[#allocation2 + $0x2c] sm:$0xf]  ;;  %v3814_v34 = vsel %vm10315_vm1, %v9296_v26, %v3813_v47  ;;  %v7574_v24 = vld [vmem:[#allocation2 + $0x80] sm:$0xff]  }
 0x17c   : > { %v9360_v12 = vadd.f32 %v9240_v32, %v9236_v14  ;;  %v3822_v20 = vor.u32 %v3821_v53, %v3818_v35  ;;  %v4240_v19 = vshrl.u32 %v6460_v58, 16  ;;  %v4096_v10 = vld [vmem:[#allocation2 + $0x30] sm:$0xf]  ;;  %v4097_v62 = vld [vmem:[#allocation2 + $0x34] sm:$0xf]  ;;  %v9364_v38 = vadd.f32 %v9248_v30, %v9242_v37 }
 0x17d   : > { %v9368_v26 = vadd.f32 %v9250_v7, %v9246_v2  ;;  %v4244_v41 = vrot.slane %v4242_v28, 1  ;;  %v10318_v32 = vld [vmem:[#allocation27_spill] sm:$0xff]  ;;  %v3827_v58 = vrot.slane %v3825_v23, 3  ;;  %vm10321_vm12 = vcmp.ne.s16.totalorder %v8419_v48, 0  ;;  %v4099_v28 = vld [vmem:[#allocation2 + $0x3c] sm:$0xf] }
 0x17e   : > { %5663 = vmatmul.mubr.bf16.gmra.mrb[92].mxu1 %v3805_v8  ;;  %v3579_v8 = vrot.slane %v3577_v27, 1  ;;  %vm10319_vm6 = vnez %v10318_v32  ;;  %v3830_v27 = vrot.slane %v3828_v42, 4  ;;  %v4129_v2 = vsel %vm10321_vm12, %v4096_v10, 0  ;;  %v10322_v7 = vld [vmem:[#allocation31_spill] sm:$0xff]  ;;  %v3631_v48 = vld [vmem:[#allocation2 + $0x5c] sm:$0xf] }
 0x17f   : > { %5670 = vmatprep.mubr.bf16.mxu1 %v7567_v36  ;;  %5582 = vmatmul.mubr.bf16.gmra.mrb[100].mxu0 %v7571_v6  ;;  %v6435_v36 = vcombine.low %v3662_v39, %v3663_v3  ;;  %v9356_v6 = vadd.f32 %v9238_v13, %v9232_v51  ;;  %v4247_v51 = vshll.u32 %v9350_v9, 16  ;;  %v10316_v13 = vld [vmem:[#allocation25_spill] sm:$0xff]  ;;  %vm10323_vm8 = vnez %v10322_v7  ;;  %v4098_v3 = vld [vmem:[#allocation2 + $0x38] sm:$0xf]  ;;  %v3632_v42 = vld [vmem:[#allocation2 + $0x60] sm:$0xf] }
 0x180   : > { %5589 = vmatprep.mubr.bf16.mxu0 %v3572_v61  ;;  %vm10317_vm14 = vcmp.ne.s16.totalorder %v10316_v13, 0  ;;  %v4128_v61 = vsel %vm10319_vm6, %v4095_v18, 0  ;;  %v3580_v59 = vsel %vm10320_vm7, %v3575_v29, %v3579_v8  ;;  %v4130_v52 = vsel %vm10323_vm8, %v4097_v62, 0  ;;  %v4100_v8 = vld [vmem:[#allocation2 + $0x40] sm:$0xf]  ;;  %vm10329_vm6 = vmmov %vm10320_vm7  ;;  %v10332_v13 = vld [vmem:[#allocation38_spill] sm:$0xff] }
 0x181   : > { %v4127_v14 = vsel %vm10317_vm14, %v4094_v46, 0  ;;  %v3834_v37 = vshrl.u32 %v6435_v36, 16  ;;  %v3837_v30 = vshll.u32 %v6435_v36, 16  ;;  %v3823_v53 = vsel %vm10324_vm4, %v3813_v47, %v3822_v20  ;;  %v10325_v62 = vld [vmem:[#allocation32_spill] sm:$0xff]  ;;  %v7053_v32 = vpop.f32.mrb[20].mxu1 }
 0x182   : > { %v6462_v35 = vcombine.low %v4127_v14, %v4128_v61  ;;  %v4245_v22 = vor.u32 %v4244_v41, %v4240_v19  ;;  %v4249_v39 = vrot.slane %v4247_v51, 1  ;;  %v9383_v46 = vadd.f32 %v9318_v56, %v9302_v55  ;;  %v4101_v55 = vld [vmem:[#allocation2 + $0x44] sm:$0xf]  ;;  %v7576_v19 = vld [vmem:[#allocation2 + $0x88] sm:$0xff]  }
 0x183   : > { %v9385_v23 = vor.u32 %v3830_v27, %v3827_v58  ;;  %v9387_v29 = vcombine.low %v4129_v2, %v4130_v52  ;;  %v7049_v18 = vadd.f32 %v9322_v33, %v9316_v54  ;;  %v9393_v47 = vadd.f32 %v9336_v4, %v9324_v0  ;;  %v10327_v51 = vld [vmem:[#allocation34_spill] sm:$0xff]  ;;  %v10330_v4 = vld [vmem:[#allocation36_spill] sm:$0xff]  ;;  %v10334_v27 = vld [vmem:[#allocation35_spill] sm:$0xff] }
 0x184   : > { %v4251_v36 = vshrl.u32 %v9350_v9, 16  ;;  %v7052_v56 = vadd.f32 %v9339_v50, %v9334_v43  ;;  %v4255_v10 = vshll.u32 %v6462_v35, 16  ;;  %vm10326_vm1 = vcmp.ne.s16.totalorder %v10325_v62, 0  ;;  %v3633_v50 = vld [vmem:[#allocation2 + $0x64] sm:$0xf] }
 0x185   : > { %v4131_v41 = vsel %vm10326_vm1, %v4098_v3, 0  ;;  %vm10328_vm14 = vnez %v10327_v51  ;;  %v9403_v33 = vadd.f32 %v7049_v18, %v9124_v63  ;;  %v4250_v0 = vsel %vm10329_vm6, %v4245_v22, %v4249_v39  ;;  %v3634_v7 = vld [vmem:[#allocation2 + $0x68] sm:$0xf] }
 0x186   : > { %5671 = vmatmul.mubr.bf16.gmra.mrb[96].mxu1 %v3814_v34  ;;  %v3836_v34 = vrot.slane %v3834_v37, 3  ;;  %v4132_v54 = vsel %vm10328_vm14, %v4099_v28, 0  ;;  %vm10331_vm7 = vnez %v10330_v4  ;;  %vm10333_vm12 = vnez %v10332_v13 }
 0x187   : > { %5678 = vmatprep.mubr.bf16.mxu1 %v7570_v16  ;;  %5590 = vmatmul.mubr.bf16.gmra.mrb[104].mxu0 %v7574_v24  ;;  %v3839_v16 = vrot.slane %v3837_v30, 4  ;;  %v7572_v24 = vld [vmem:[#allocation2 + $0x48] sm:$0xff]   ;;  %v3664_v9 = vsel %vm10331_vm7, %v3631_v48, 0  ;;  %v3665_v43 = vsel %vm10333_vm12, %v3632_v42, 0  ;;  %v9411_v14 = vadd.f32 %v7052_v56, %v9132_v44  ;;  %v7054_v30 = vpop.f32.mrb[21].mxu1  ;;  %v6965_v48 = vpop.f32.mrb[20].mxu0 }
 0x188   : > { %5597 = vmatprep.mubr.bf16.mxu0 %v3580_v59  ;;  %v4259_v61 = vshrl.u32 %v6462_v35, 16  ;;  %v4263_v58 = vshll.u32 %v9387_v29, 16  ;;  %vm10335_vm8 = vcmp.ne.s16.totalorder %v10334_v27, 0  ;;  %v10336_v59 = vld [vmem:[#allocation37_spill] sm:$0xff]  ;;  %vm10338_vm1 = vsmask.f32 4352 }
 0x189   : > { %v4133_v63 = vsel %vm10335_vm8, %v4100_v8, 0  ;;  %vm10337_vm4 = vnez %v10336_v59  ;;  %v3832_v2 = vsel %vm10338_vm1, %v3822_v20, %v9385_v23  ;;  %v6464_v52 = vcombine.low %v4131_v41, %v4132_v54  ;;  %v7056_v22 = vpop.f32.mrb[22].mxu1  ;;  %v10339_v8 = vld [vmem:[#allocation40_spill] sm:$0xff]  ;;  %v4103_v20 = vld [vmem:[#allocation2 + $0x4c] sm:$0xf]  ;;  %v6966_v56 = vpop.f32.mrb[21].mxu0 }
 0x18a   : > { %v4134_v37 = vsel %vm10337_vm4, %v4101_v55, 0  ;;  %v9420_v44 = vor.u32 %v3839_v16, %v3836_v34  ;;  %v4253_v35 = vor.u32 %v4251_v36, %v4249_v39  ;;  %v6436_v3 = vcombine.low %v3664_v9, %v3665_v43  ;;  %v7057_v42 = vpop.f32.mrb[23].mxu1  ;;  %v4102_v55 = vld [vmem:[#allocation2 + $0x48] sm:$0xf]  ;;  %v10341_v34 = vld [vmem:[#allocation42_spill] sm:$0xff]  ;;  %v10345_v27 = vld [vmem:[#allocation43_spill] sm:$0xff] }
 0x18b   : > { %v4257_v28 = vrot.slane %v4255_v10, 1  ;;  %vm10340_vm14 = vnez %v10339_v8  ;;  %v7055_v62 = vadd.f32 %v7054_v30, %v7053_v32  ;;  %v7058_v41 = vadd.f32 %v7057_v42, %v7056_v22  ;;  %v4104_v16 = vld [vmem:[#allocation2 + $0x50] sm:$0xf]  ;;  %v6968_v10 = vpop.f32.mrb[22].mxu0 }
 0x18c   : > { %v3666_v18 = vsel %vm10340_vm14, %v3633_v50, 0  ;;  %vm10342_vm6 = vnez %v10341_v34  ;;  %v9428_v36 = vadd.f32 %v6966_v56, %v6965_v48  ;;  %v4267_v51 = vshrl.u32 %v9387_v29, 16  ;;  %v6969_v9 = vpop.f32.mrb[23].mxu0  ;;  %v7575_v43 = vld [vmem:[#allocation2 + $0x50] sm:$0xff]   ;;  %v10349_v48 = vld [vmem:[#allocation44_spill] sm:$0xff] }
 0x18d   : > { %v3667_v39 = vsel %vm10342_vm6, %v3634_v7, 0  ;;  %v4271_v54 = vshll.u32 %v6464_v52, 16  ;;  %v9432_v4 = vadd.f32 %v7055_v62, %v9272_v31  ;;  %v9435_v13 = vadd.f32 %v7058_v41, %v9280_v17  ;;  %v3635_v31 = vld [vmem:[#allocation2 + $0x6c] sm:$0xf]  ;;  %v3636_v30 = vld [vmem:[#allocation2 + $0x70] sm:$0xf] }
 0x18e   : > { %5679 = vmatmul.mubr.bf16.gmra.mrb[100].mxu1 %v3823_v53  ;;  %v9424_v53 = vcombine.low %v4133_v63, %v4134_v37  ;;  %v3843_v50 = vshrl.u32 %v6436_v3, 16  ;;  %v3846_v32 = vshll.u32 %v6436_v3, 16  ;;  %vm10346_vm12 = vnez %v10345_v27  ;;  %v10354_v56 = vld [vmem:[#allocation46_spill] sm:$0xff]  ;;  %v4106_v41 = vld [vmem:[#allocation2 + $0x58] sm:$0xf] }
 0x18f   : > { %5686 = vmatprep.mubr.bf16.mxu1 %v7572_v24  ;;  %5598 = vmatmul.mubr.bf16.gmra.mrb[108].mxu0 %v7576_v19  ;;  %v4261_v24 = vor.u32 %v4259_v61, %v4257_v28  ;;  %v4265_v19 = vrot.slane %v4263_v58, 1  ;;  %v10343_v61 = vld [vmem:[#allocation39_spill] sm:$0xff]  ;;  %v4136_v63 = vsel %vm10346_vm12, %v4103_v20, 0  ;;  %vm10347_vm8 = vsmask.f32 7424 }
 0x190   : > { %7407 = vmatprep.mubr.bf16.mxu0 %v4250_v0  ;;  %v4105_v0 = vld [vmem:[#allocation2 + $0x54] sm:$0xf]  ;;  %vm10344_vm7 = vcmp.ne.s16.totalorder %v10343_v61, 0  ;;  %v4258_v29 = vsel %vm10347_vm8, %v4253_v35, %v4257_v28  ;;  %v4275_v59 = vshrl.u32 %v6464_v52, 16  ;;  %v4279_v37 = vshll.u32 %v9424_v53, 16  ;;  %vm10348_vm4 = vmmov %vm10347_vm8  ;;  %v10352_v52 = vld [vmem:[#allocation45_spill] sm:$0xff] }
 0x191   : > { %v4135_v58 = vsel %vm10344_vm7, %v4102_v55, 0  ;;  %v9443_v7 = vadd.f32 %v6969_v9, %v6968_v10  ;;  %v4266_v17 = vsel %vm10348_vm4, %v4261_v24, %v4265_v19  ;;  %v6437_v22 = vcombine.low %v3666_v18, %v3667_v39  ;;  %v4108_v39 = vld [vmem:[#allocation2 + $0x60] sm:$0xf]  ;;  %v7059_v9 = vpop.f32.mrb[24].mxu1 }
 0x192   : > { %vm10350_vm1 = vcmp.ne.s16.totalorder %v10349_v48, 0  ;;  %v4138_v8 = vsel %vm8756_vm10, %v4105_v0, 0  ;;  %v4269_v55 = vor.u32 %v4267_v51, %v4265_v19  ;;  %v4273_v20 = vrot.slane %v4271_v54, 1  ;;  %v4107_v19 = vld [vmem:[#allocation2 + $0x5c] sm:$0xf]  ;;  %v6971_v0 = vpop.f32.mrb[24].mxu0  ;;  %vm10357_vm10 = vmmov %vm10348_vm4 }
 0x193   : > { %v4137_v3 = vsel %vm10350_vm1, %v4104_v16, 0  ;;  %v6466_v35 = vcombine.low %v4135_v58, %v4136_v63  ;;  %vm10353_vm14 = vnez %v10352_v52  ;;  %vm10355_vm6 = vnez %v10354_v56  ;;  %v6972_v63 = vpop.f32.mrb[25].mxu0 }
 0x194   : > { %v3668_v28 = vsel %vm10353_vm14, %v3635_v31, 0  ;;  %v3669_v62 = vsel %vm10355_vm6, %v3636_v30, 0  ;;  %vm10356_vm7 = vsmask.f32 4352  ;;  %v4277_v24 = vor.u32 %v4275_v59, %v4273_v20  ;;  %v7577_v59 = vld [vmem:[#allocation2 + $0x58] sm:$0xff]   ;;  %v10360_v30 = vld [vmem:[#allocation49_spill] sm:$0xff]  ;;  %vm10366_vm14 = vmmov %vm10348_vm4 }
 0x195   : > { %v3841_v18 = vsel %vm10356_vm7, %v9385_v23, %v9420_v44  ;;  %v4281_v34 = vrot.slane %v4279_v37, 1  ;;  %v3845_v16 = vrot.slane %v3843_v50, 3  ;;  %v3848_v10 = vrot.slane %v3846_v32, 4  ;;  %v4109_v23 = vld [vmem:[#allocation2 + $0x64] sm:$0xf]  ;;  %v10358_v37 = vld [vmem:[#allocation48_spill] sm:$0xff] }
 0x196   : > { %5687 = vmatmul.mubr.bf16.gmra.mrb[104].mxu1 %v3832_v2  ;;  %v9457_v2 = vcombine.low %v4137_v3, %v4138_v8  ;;  %v3852_v51 = vshrl.u32 %v6437_v22, 16  ;;  %v3855_v54 = vshll.u32 %v6437_v22, 16  ;;  %v6438_v61 = vcombine.low %v3668_v28, %v3669_v62  ;;  %v6974_v22 = vpop.f32.mrb[26].mxu0  ;;  %v10362_v8 = vld [vmem:[#allocation50_spill] sm:$0xff] }
 0x197   : > { %5694 = vmatprep.mubr.bf16.mxu1 %v7575_v43  ;;  %7408 = vmatmul.mubr.bf16.vlgmr.msra.gmra.mrb[112].mxu0 %v4258_v29  ;;  %v4274_v43 = vsel %vm10357_vm10, %v4269_v55, %v4273_v20  ;;  %v4283_v58 = vshrl.u32 %v9424_v53, 16  ;;  %v4287_v27 = vshll.u32 %v6466_v35, 16  ;;  %v7060_v29 = vpop.f32.mrb[25].mxu1  ;;  %vm10359_vm12 = vcmp.ne.s16.totalorder %v10358_v37, 0  ;;  %v6975_v20 = vpop.f32.mrb[27].mxu0 }
 0x198   : > { %7411 = vmatprep.mubr.bf16.mxu0 %v4266_v17  ;;  %v4139_v31 = vsel %vm10359_vm12, %v4106_v41, 0  ;;  %vm10361_vm8 = vnez %v10360_v30  ;;  %v9465_v32 = vadd.f32 %v6972_v63, %v6971_v0  ;;  %v7061_v17 = vadd.f32 %v7060_v29, %v7059_v9  ;;  %v7062_v48 = vpop.f32.mrb[26].mxu1 }
 0x199   : > { %v4140_v50 = vsel %vm10361_vm8, %v4107_v19, 0  ;;  %v4282_v3 = vsel %vm10348_vm4, %v4277_v24, %v4281_v34  ;;  %v4291_v42 = vshrl.u32 %v6466_v35, 16  ;;  %v4295_v53 = vshll.u32 %v9457_v2, 16  ;;  %v7063_v52 = vpop.f32.mrb[27].mxu1 }
 0x19a   : > { %vm10363_vm1 = vcmp.ne.s16.totalorder %v10362_v8, 0  ;;  %v4142_v56 = vsel %vm8841_vm11, %v4109_v23, 0  ;;  %v9474_v62 = vadd.f32 %v7061_v17, %v9310_v45  ;;  %v9476_v41 = vadd.f32 %v6975_v20, %v6974_v22  ;;  %v4110_v17 = vld [vmem:[#allocation2 + $0x68] sm:$0xf]  ;;  %v4111_v22 = vld [vmem:[#allocation2 + $0x6c] sm:$0xf]  ;;  %vm10365_vm11 = vmmov %vm10356_vm7 }
 0x19b   : > { %v4141_v55 = vsel %vm10363_vm1, %v4108_v39, 0  ;;  %v7064_v19 = vadd.f32 %v7063_v52, %v7062_v48  ;;  %v3849_v0 = vor.u32 %v3848_v10, %v3845_v16  ;;  %v3854_v24 = vrot.slane %v3852_v51, 3  ;;  %v3637_v16 = vld [vmem:[#allocation2 + $0x74] sm:$0xf]  ;;  %v3638_v10 = vld [vmem:[#allocation2 + $0x78] sm:$0xf]  ;;  %vm10368_vm7 = vmmov %vm10348_vm4 }
 0x19c   : > { %v6468_v35 = vcombine.low %v4139_v31, %v4140_v50  ;;  %v3857_v9 = vrot.slane %v3855_v54, 4  ;;  %v4285_v63 = vor.u32 %v4283_v58, %v4281_v34  ;;  %v4289_v39 = vrot.slane %v4287_v27, 1  ;;  %v7578_v34 = vld [vmem:[#allocation2 + $0x60] sm:$0xff]   ;;  %v4112_v27 = vld [vmem:[#allocation2 + $0x70] sm:$0xf]  ;;  %v10371_v8 = vld [vmem:[#allocation11_spill] sm:$0xff] }
 0x19d   : > { %v9479_v29 = vadd.f32 %v7064_v19, %v9328_v60  ;;  %v9481_v23 = vcombine.low %v4141_v55, %v4142_v56  ;;  %v3861_v45 = vshrl.u32 %v6438_v61, 16  ;;  %v4297_v30 = vrot.slane %v4295_v53, 1  ;;  %v10373_v52 = vld [vmem:[#allocation52_spill] sm:$0xff]  ;;  %v4114_v19 = vld [vmem:[#allocation2 + $0x78] sm:$0xf]  ;;  %vm10376_vm4 = vmmov %vm10365_vm11 }
 0x19e   : > { %5695 = vmatmul.mubr.bf16.gmra.mrb[108].mxu1 %v3841_v18  ;;  %v4293_v37 = vor.u32 %v4291_v42, %v4289_v39  ;;  %v3864_v18 = vshll.u32 %v6438_v61, 16  ;;  %v4303_v51 = vshll.u32 %v6468_v35, 16  ;;  %v3850_v54 = vsel %vm10365_vm11, %v9420_v44, %v3849_v0  ;;  %v10369_v42 = vld [vmem:[#allocation9_spill] sm:$0xff] }
 0x19f   : > { %5702 = vmatprep.mubr.bf16.mxu1 %v7577_v59  ;;  %7412 = vmatmul.mubr.bf16.gmra.mrb[116].mxu0 %v4274_v43  ;;  %v9485_v43 = vor.u32 %v3857_v9, %v3854_v24  ;;  %v4290_v60 = vsel %vm10366_vm14, %v4285_v63, %v4289_v39  ;;  %v4299_v58 = vshrl.u32 %v9457_v2, 16  ;;  %v4113_v59 = vld [vmem:[#allocation2 + $0x74] sm:$0xf]  ;;  %v4307_v31 = vshrl.u32 %v6468_v35, 16  ;;  %v4115_v39 = vld [vmem:[#allocation2 + $0x7c] sm:$0xf]  ;;  %vm10381_vm14 = vmmov %vm10368_vm7 }
 0x1a0   : > { %7415 = vmatprep.mubr.bf16.mxu0 %v4282_v3  ;;  %v4311_v50 = vshll.u32 %v9481_v23, 16  ;;  %vm10367_vm6 = vcmp.ne.s16.totalorder %v8837_v11, 0  ;;  %v4144_v48 = vsel %vm8874_vm0, %v4111_v22, 0  ;;  %v3863_v3 = vrot.slane %v3861_v45, 3  ;;  %v248_v45 = vld [vmem:[#allocation2 + $0x98] sm:$0x1] }
 0x1a1   : > { %v4143_v61 = vsel %vm10367_vm6, %v4110_v17, 0  ;;  %v4298_v44 = vsel %vm10368_vm7, %v4293_v37, %v4297_v30  ;;  %vm10370_vm10 = vnez %v10369_v42  ;;  %vm10372_vm12 = vnez %v10371_v8  ;;  %v3639_v37 = vld [vmem:[#allocation2 + $0x7c] sm:$0xf]  ;;  %v3640_v17 = vld [vmem:[#allocation2 + $0x80] sm:$0xf]  ;;  %vm10382_vm6 = vmmov %vm10368_vm7 }
 0x1a2   : > { %v3670_v53 = vsel %vm10370_vm10, %v3637_v16, 0  ;;  %v3671_v2 = vsel %vm10372_vm12, %v3638_v10, 0  ;;  %v3866_v55 = vrot.slane %v3864_v18, 4  ;;  %v4305_v20 = vrot.slane %v4303_v51, 1  ;;  %v4116_v51 = vld [vmem:[#allocation2 + $0x80] sm:$0xf]  ;;  %vm10391_vm12 = vmmov %vm10382_vm6 }
 0x1a3   : > { %vm10374_vm8 = vcmp.ne.s16.totalorder %v10373_v52, 0  ;;  %v4146_v56 = vsel %vm8936_vm15, %v4113_v59, 0  ;;  %v6470_v49 = vcombine.low %v4143_v61, %v4144_v48  ;;  %v9503_v24 = vcombine.low %v3670_v53, %v3671_v2 }
 0x1a4   : > { %v4145_v28 = vsel %vm10374_vm8, %v4112_v27, 0  ;;  %v4301_v35 = vor.u32 %v4299_v58, %v4297_v30  ;;  %v4309_v9 = vor.u32 %v4307_v31, %v4305_v20  ;;  %v4313_v63 = vrot.slane %v4311_v50, 1  ;;  %v7579_v30 = vld [vmem:[#allocation2 + $0x68] sm:$0xff]   ;;  %v6977_v31 = vpop.f32.mrb[28].mxu0 }
 0x1a5   : > { %v9505_v22 = vcombine.low %v4145_v28, %v4146_v56  ;;  %vm245_vm0 = vcmask 1040384   ;;  %v3859_v18 = vsel %vm10376_vm4, %v3849_v0, %v9485_v43  ;;  %v9509_v16 = vor.u32 %v3866_v55, %v3863_v3  ;;  %v7065_v3 = vpop.f32.mrb[28].mxu1  ;;  %v10383_v55 = vld [vmem:[#allocation56_spill] sm:$0xff]  ;;  %v10392_v28 = vld [vmem:[#allocation57_spill] sm:$0xff] }
 0x1a6   : > { %5703 = vmatmul.mubr.bf16.gmra.mrb[112].mxu1 %v3850_v54  ;;  %v4315_v10 = vshrl.u32 %v9481_v23, 16  ;;  %v4117_v54 = vld [vmem:[#allocation2 + $0x84] sm:$0xf]  ;;  %vm10377_vm15 = vsmask.f32 256  ;;  %v4148_v59 = vsel %vm8984_vm5, %v4115_v39, 0  ;;  %v4306_v61 = vsel %vm10381_vm14, %v4301_v35, %v4305_v20 }
 0x1a7   : > { %5710 = vmatprep.mubr.bf16.mxu1 %v7578_v34  ;;  %7416 = vmatmul.mubr.bf16.gmra.mrb[120].mxu0 %v4290_v60  ;;  %vm247_vm1 = vmand %vm245_vm0, %vm10377_vm15  ;;  %v4319_v34 = vshll.u32 %v6470_v49, 16  ;;  %v10378_v60 = vld [vmem:[#allocation53_spill] sm:$0xff]  ;;  %v3870_v0 = vshrl.u32 %v9503_v24, 16  ;;  %v4314_v23 = vsel %vm10382_vm6, %v4309_v9, %v4313_v63  ;;  %v4323_v48 = vshrl.u32 %v6470_v49, 16  ;;  %v7066_v8 = vpop.f32.mrb[29].mxu1  ;;  %v10386_v20 = vld [vmem:[#allocation10_spill] sm:$0xff] }
 0x1a8   : > { %7419 = vmatprep.mubr.bf16.mxu0 %v4298_v44  ;;  %vm10379_vm11 = vcmp.ne.s16.totalorder %v10378_v60, 0  ;;  %v249_v50 = vsel %vm247_vm1, 0, %v248_v45  ;;  %v6978_v44 = vpop.f32.mrb[29].mxu0  ;;  %v4327_v42 = vshll.u32 %v9505_v22, 16  ;;  %vm10384_vm5 = vcmp.ne.s16.totalorder %v10383_v55, 0  ;;  %v10388_v49 = vld [vmem:[#allocation12_spill] sm:$0xff] }
 0x1a9   : > { %v4147_v58 = vsel %vm10379_vm11, %v4114_v19, 0  ;;  %250 = vst [vmem:[#allocation2 + $0x98] sm:$0x1] %v249_v50  ;;  %v9522_v53 = vadd.f32 %v6978_v44, %v6977_v31  ;;  %v6980_v2 = vpop.f32.mrb[30].mxu0  ;;  %v4149_v52 = vsel %vm10384_vm5, %v4116_v51, 0  ;;  %v4150_v11 = vsel %vm9030_vm3, %v4117_v54, 0  ;;  %vm10390_vm3 = vmmov %vm10376_vm4 }
 0x1aa   : > { %vm10387_vm7 = vnez %v10386_v20  ;;  %vm10389_vm10 = vnez %v10388_v49  ;;  %v6472_v35 = vcombine.low %v4147_v58, %v4148_v59  ;;  %v7067_v9 = vadd.f32 %v7066_v8, %v7065_v3  ;;  %v7068_v39 = vpop.f32.mrb[30].mxu1  ;;  %v6981_v45 = vpop.f32.mrb[31].mxu0  ;;  %v4118_v3 = vld [vmem:[#allocation2 + $0x88] sm:$0xf]  ;;  %vm10395_vm4 = vmmov %vm10382_vm6 }
 0x1ab   : > { %v3672_v56 = vsel %vm10387_vm7, %v3639_v37, 0  ;;  %v3673_v19 = vsel %vm10389_vm10, %v3640_v17, 0  ;;  %v3873_v60 = vshll.u32 %v9503_v24, 16  ;;  %v4317_v27 = vor.u32 %v4315_v10, %v4313_v63  ;;  %v7069_v54 = vpop.f32.mrb[31].mxu1  ;;  %v3641_v63 = vld [vmem:[#allocation2 + $0x84] sm:$0xf]  ;;  %vm10403_vm11 = vmmov %vm10395_vm4 }
 0x1ac   : > { %v4321_v51 = vrot.slane %v4319_v34, 1  ;;  %v9533_v31 = vadd.f32 %v6981_v45, %v6980_v2  ;;  %v7070_v37 = vadd.f32 %v7069_v54, %v7068_v39  ;;  %v9538_v50 = vcombine.low %v4149_v52, %v4150_v11  ;;  %v3642_v2 = vld [vmem:[#allocation2 + $0x88] sm:$0xf]  ;;  %v10398_v39 = vld [vmem:[#allocation15_spill] sm:$0xff]  ;;  %vm10404_vm14 = vmmov %vm10395_vm4 }
 0x1ad   : > { %v6440_v17 = vcombine.low %v3672_v56, %v3673_v19  ;;  %v4329_v59 = vrot.slane %v4327_v42, 1  ;;  %v3868_v24 = vsel %vm10390_vm3, %v9485_v43, %v9509_v16  ;;  %v4335_v10 = vshll.u32 %v6472_v35, 16  ;;  %v4121_v42 = vld [vmem:[#allocation2 + $0x94] sm:$0xf]  ;;  %vm10410_vm7 = vmmov %vm10395_vm4 }
 0x1ae   : > { %5711 = vmatmul.mubr.bf16.gmra.mrb[116].mxu1 %v3859_v18  ;;  %v9536_v18 = vadd.f32 %v7067_v9, %v9356_v6  ;;  %v4325_v58 = vor.u32 %v4323_v48, %v4321_v51  ;;  %v9544_v34 = vadd.f32 %v7070_v37, %v9364_v38  ;;  %v7580_v6 = vld [vmem:[#allocation2 + $0x70] sm:$0xff]   ;;  %v3875_v44 = vrot.slane %v3873_v60, 4  ;;  %v10400_v60 = vld [vmem:[#allocation16_spill] sm:$0xff]  ;;  %vm10411_vm10 = vmmov %vm10395_vm4 }
 0x1af   : > { %5718 = vmatprep.mubr.bf16.mxu1 %v7579_v30  ;;  %7420 = vmatmul.mubr.bf16.gmra.mrb[124].mxu0 %v4306_v61  ;;  %v4119_v30 = vld [vmem:[#allocation2 + $0x8c] sm:$0xf]  ;;  %v4120_v61 = vld [vmem:[#allocation2 + $0x90] sm:$0xf]  ;;  %v4322_v8 = vsel %vm10391_vm12, %v4317_v27, %v4321_v51  ;;  %v4331_v48 = vshrl.u32 %v9505_v22, 16  ;;  %v4339_v55 = vshrl.u32 %v6472_v35, 16  ;;  %vm10399_vm1 = vnez %v10398_v39 }
 0x1b0   : > { %7423 = vmatprep.mubr.bf16.mxu0 %v4314_v23  ;;  %v3872_v23 = vrot.slane %v3870_v0, 3  ;;  %v4343_v52 = vshll.u32 %v9538_v50, 16  ;;  %vm10393_vm8 = vcmp.ne.s16.totalorder %v10392_v28, 0  ;;  %v4152_v38 = vsel %vm9079_vm9, %v4119_v30, 0  ;;  %v10396_v19 = vld [vmem:[#allocation59_spill] sm:$0xff] }
 0x1b1   : > { %v4151_v43 = vsel %vm10393_vm8, %v4118_v3, 0  ;;  %v3879_v20 = vshrl.u32 %v6440_v17, 16  ;;  %v4330_v56 = vsel %vm10395_vm4, %v4325_v58, %v4329_v59  ;;  %v3882_v0 = vshll.u32 %v6440_v17, 16  ;;  %v7071_v58 = vpop.f32.mrb[32].mxu1  ;;  %vm10415_vm8 = vmmov %vm10395_vm4 }
 0x1b2   : > { %v4337_v49 = vrot.slane %v4335_v10, 1  ;;  %vm10397_vm15 = vcmp.ne.s16.totalorder %v10396_v19, 0  ;;  %v4154_v35 = vsel %vm9146_vm13, %v4121_v42, 0  ;;  %v3876_v9 = vor.u32 %v3875_v44, %v3872_v23  ;;  %v7072_v10 = vpop.f32.mrb[33].mxu1  ;;  %vm10402_vm13 = vmmov %vm10390_vm3  ;;  %v7581_v23 = vld [vmem:[#allocation2 + $0x78] sm:$0xff]  }
 0x1b3   : > { %v4153_v22 = vsel %vm10397_vm15, %v4120_v61, 0  ;;  %v3674_v45 = vsel %vm10399_vm1, %v3641_v63, 0  ;;  %vm10401_vm9 = vnez %v10400_v60  ;;  %v6474_v51 = vcombine.low %v4151_v43, %v4152_v38  ;;  %v4122_v61 = vld [vmem:[#allocation2 + $0x98] sm:$0x1]  ;;  %v3643_v63 = vld [vmem:[#allocation2 + $0x8c] sm:$0xf] }
 0x1b4   : > { %v3675_v27 = vsel %vm10401_vm9, %v3642_v2, 0  ;;  %v4333_v54 = vor.u32 %v4331_v48, %v4329_v59  ;;  %v4341_v37 = vor.u32 %v4339_v55, %v4337_v49  ;;  %v4345_v17 = vrot.slane %v4343_v52, 1  ;;  %v7074_v42 = vpop.f32.mrb[34].mxu1  ;;  %v3644_v48 = vld [vmem:[#allocation2 + $0x90] sm:$0xf]  ;;  %v6983_v52 = vpop.f32.mrb[32].mxu0 }
 0x1b5   : > { %v6475_v3 = vcombine.low %v4153_v22, %v4154_v35  ;;  %v3881_v30 = vrot.slane %v3879_v20, 3  ;;  %v6441_v57 = vcombine.low %v3674_v45, %v3675_v27  ;;  %v4351_v44 = vshll.u32 %v6474_v51, 16  ;;  %v7075_v28 = vpop.f32.mrb[35].mxu1  ;;  %v6984_v11 = vpop.f32.mrb[33].mxu0  ;;  %v10407_v45 = vld [vmem:[#allocation20_spill] sm:$0xff] }
 0x1b6   : > { %5719 = vmatmul.mubr.bf16.gmra.mrb[120].mxu1 %v3868_v24  ;;  %v3884_v24 = vrot.slane %v3882_v0, 4  ;;  %v4338_v2 = vsel %vm10403_vm11, %v4333_v54, %v4337_v49  ;;  %v4346_v59 = vsel %vm10404_vm14, %v4341_v37, %v4345_v17  ;;  %v4347_v55 = vshrl.u32 %v9538_v50, 16  ;;  %v6986_v35 = vpop.f32.mrb[34].mxu0  ;;  %v10405_v50 = vld [vmem:[#allocation19_spill] sm:$0xff] }
 0x1b7   : > { %5726 = vmatprep.mubr.bf16.mxu1 %v7580_v6  ;;  %7424 = vmatmul.mubr.bf16.gmra.mrb[128].mxu0 %v4322_v8  ;;  %v3877_v6 = vsel %vm10402_vm13, %v9509_v16, %v3876_v9  ;;  %v7073_v8 = vadd.f32 %v7072_v10, %v7071_v58  ;;  %v4355_v43 = vshrl.u32 %v6474_v51, 16  ;;  %v7076_v16 = vadd.f32 %v7075_v28, %v7074_v42  ;;  %v6987_v27 = vpop.f32.mrb[35].mxu0  ;;  %v7582_v10 = vld [vmem:[#allocation2 + $0x80] sm:$0xff]  }
 0x1b8   : > { %7427 = vmatprep.mubr.bf16.mxu0 %v4330_v56  ;;  %v4359_v20 = vshll.u32 %v6475_v3, 16  ;;  %v4155_v56 = vsel %vm9152_vm2, %v4122_v61, 0  ;;  %v3885_v0 = vor.u32 %v3884_v24, %v3881_v30  ;;  %v3888_v49 = vshrl.u32 %v6441_v57, 16  ;;  %vm10409_vm2 = vmmov %vm10390_vm3 }
 0x1b9   : > { %v9568_v38 = vadd.f32 %v7073_v8, %v9383_v46  ;;  %v3891_v19 = vshll.u32 %v6441_v57, 16  ;;  %v9572_v22 = vadd.f32 %v6984_v11, %v6983_v52  ;;  %vm10406_vm6 = vnez %v10405_v50  ;;  %v3645_v8 = vld [vmem:[#allocation2 + $0x94] sm:$0xf]  ;;  %vm10414_vm12 = vmmov %vm10409_vm2 }
 0x1ba   : > { %v3676_v39 = vsel %vm10406_vm6, %v3643_v63, 0  ;;  %vm10408_vm5 = vnez %v10407_v45  ;;  %v4353_v60 = vrot.slane %v4351_v44, 1  ;;  %v9579_v21 = vadd.f32 %v7076_v16, %v9393_v47  ;;  %vm10416_vm4 = vmmov %vm10409_vm2 }
 0x1bb   : > { %v3677_v46 = vsel %vm10408_vm5, %v3644_v48, 0  ;;  %v4349_v51 = vor.u32 %v4347_v55, %v4345_v17  ;;  %v9581_v54 = vadd.f32 %v6987_v27, %v6986_v35  ;;  %v6476_v37 = vcombine.low %v4155_v56, %v4155_v56  ;;  %v7077_v16 = vpop.f32.mrb[36].mxu1  ;;  %vm10417_vm15 = vmmov %vm10409_vm2 }
 0x1bc   : > { %v4357_v58 = vor.u32 %v4355_v43, %v4353_v60  ;;  %v4361_v30 = vrot.slane %v4359_v20, 1  ;;  %v6442_v24 = vcombine.low %v3676_v39, %v3677_v46  ;;  %v3886_v57 = vsel %vm10409_vm2, %v3876_v9, %v3885_v0  ;;  %v7583_v43 = vld [vmem:[#allocation2 + $0x88] sm:$0xff]   ;;  %v6989_v56 = vpop.f32.mrb[36].mxu0 }
 0x1bd   : > { %v3890_v61 = vrot.slane %v3888_v49, 3  ;;  %v4363_v63 = vshrl.u32 %v6475_v3, 16  ;;  %v4367_v44 = vshll.u32 %v6476_v37, 16  ;;  %v7078_v49 = vpop.f32.mrb[37].mxu1 }
 0x1be   : > { %5727 = vmatmul.mubr.bf16.gmra.mrb[124].mxu1 %v3877_v6  ;;  %v3893_v6 = vrot.slane %v3891_v19, 4  ;;  %v4362_v47 = vsel %vm10411_vm10, %v4357_v58, %v4361_v30  ;;  %v3897_v17 = vshrl.u32 %v6442_v24, 16  ;;  %v3900_v42 = vshll.u32 %v6442_v24, 16  ;;  %v6990_v19 = vpop.f32.mrb[37].mxu0  ;;  %v7080_v50 = vpop.f32.mrb[38].mxu1 }
 0x1bf   : > { %5734 = vmatprep.mubr.bf16.mxu1 %v7581_v23  ;;  %7428 = vmatmul.mubr.bf16.gmra.mrb[132].mxu0 %v4338_v2  ;;  %v4354_v23 = vsel %vm10410_vm7, %v4349_v51, %v4353_v60  ;;  %v4365_v48 = vor.u32 %v4363_v63, %v4361_v30  ;;  %v4369_v55 = vrot.slane %v4367_v44, 1  ;;  %v7079_v35 = vadd.f32 %v7078_v49, %v7077_v16  ;;  %v6992_v46 = vpop.f32.mrb[38].mxu0  ;;  %v7081_v60 = vpop.f32.mrb[39].mxu1 }
 0x1c0   : > { %7431 = vmatprep.mubr.bf16.mxu0 %v4346_v59  ;;  %v3894_v2 = vor.u32 %v3893_v6, %v3890_v61  ;;  %v10412_v59 = vld [vmem:[#allocation5_spill] sm:$0xff]  ;;  %v3899_v52 = vrot.slane %v3897_v17, 3  ;;  %v3902_v28 = vrot.slane %v3900_v42, 4  ;;  %v9590_v45 = vadd.f32 %v6990_v19, %v6989_v56  ;;  %v6993_v37 = vpop.f32.mrb[39].mxu0 }
 0x1c1   : > { %vm10413_vm3 = vcmp.ne.s16.totalorder %v10412_v59, 0  ;;  %v4370_v20 = vsel %vm10415_vm8, %v4365_v48, %v4369_v55  ;;  %v7082_v58 = vadd.f32 %v7081_v60, %v7080_v50  ;;  %v9595_v30 = vadd.f32 %v6993_v37, %v6992_v46 }
 0x1c2   : > { %v3678_v9 = vsel %vm10413_vm3, %v3645_v8, 0  ;;  %v3895_v3 = vsel %vm10414_vm12, %v3885_v0, %v3894_v2  ;;  %v3903_v39 = vor.u32 %v3902_v28, %v3899_v52  ;;  %v9593_v0 = vadd.f32 %v7079_v35, %v9428_v36 }
 0x1c3   : > { %v6443_v11 = vcombine.low %v3678_v9, %v3678_v9  ;;  %v9598_v24 = vadd.f32 %v7082_v58, %v9443_v7 }
 0x1c5   : > { %v3906_v27 = vshrl.u32 %v6443_v11, 16  ;;  %v3909_v51 = vshll.u32 %v6443_v11, 16 }
 0x1c6   : > { %5735 = vmatmul.mubr.bf16.gmra.mrb[128].mxu1 %v3886_v57  ;;  %v3904_v57 = vsel %vm10416_vm4, %v3894_v2, %v3903_v39 }
 0x1c7   : > { %5742 = vmatprep.mubr.bf16.mxu1 %v7582_v10  ;;  %7432 = vmatmul.mubr.bf16.gmra.mrb[136].mxu0 %v4354_v23  ;;  %v7584_v10 = vld [vmem:[#allocation2 + $0x90] sm:$0xff]   ;;  %v3908_v61 = vrot.slane %v3906_v27, 3  ;;  %v3911_v6 = vrot.slane %v3909_v51, 4 }
 0x1c8   : > { %7435 = vmatprep.mubr.bf16.mxu0 %v4362_v47 }
 0x1c9   : > { %v3912_v23 = vor.u32 %v3911_v6, %v3908_v61 }
 0x1cb   : > { %v7083_v63 = vpop.f32.mrb[40].mxu1  ;;  %v3913_v42 = vsel %vm10417_vm15, %v3903_v39, %v3912_v23 }
 0x1cc   : > { %v6995_v44 = vpop.f32.mrb[40].mxu0  ;;  %v7084_v47 = vpop.f32.mrb[41].mxu1 }
 0x1cd   : > { %v6996_v36 = vpop.f32.mrb[41].mxu0  ;;  %v7085_v8 = vadd.f32 %v7084_v47, %v7083_v63  ;;  %v7086_v17 = vpop.f32.mrb[42].mxu1 }
 0x1ce   : > { %5743 = vmatmul.mubr.bf16.gmra.mrb[132].mxu1 %v3895_v3  ;;  %v9602_v59 = vadd.f32 %v6996_v36, %v6995_v44  ;;  %v6998_v7 = vpop.f32.mrb[42].mxu0  ;;  %v7087_v9 = vpop.f32.mrb[43].mxu1 }
 0x1cf   : > { %5750 = vmatprep.mubr.bf16.mxu1 %v7583_v43  ;;  %7436 = vmatmul.mubr.bf16.gmra.mrb[140].mxu0 %v4370_v20  ;;  %v9605_v2 = vadd.f32 %v7085_v8, %v9465_v32  ;;  %v6999_v48 = vpop.f32.mrb[43].mxu0  ;;  %v7088_v55 = vadd.f32 %v7087_v9, %v7086_v17 }
 0x1d0   : > { %v9607_v52 = vadd.f32 %v6999_v48, %v6998_v7 }
 0x1d1   : > { %v9610_v28 = vadd.f32 %v7088_v55, %v9476_v41 }
 0x1d4   : > { %v7001_v3 = vpop.f32.mrb[44].mxu0 }
 0x1d5   : > { %v7002_v43 = vpop.f32.mrb[45].mxu0 }
 0x1d6   : > { %5751 = vmatmul.mubr.bf16.gmra.mrb[136].mxu1 %v3904_v57  ;;  %v7089_v11 = vpop.f32.mrb[44].mxu1  ;;  %v9612_v16 = vadd.f32 %v7002_v43, %v7001_v3  ;;  %v7004_v20 = vpop.f32.mrb[46].mxu0 }
 0x1d7   : > { %5758 = vmatprep.mubr.bf16.mxu1 %v7584_v10  ;;  %v7090_v56 = vpop.f32.mrb[45].mxu1  ;;  %v7005_v49 = vpop.f32.mrb[47].mxu0 }
 0x1d8   : > { %v7091_v19 = vadd.f32 %v7090_v56, %v7089_v11  ;;  %v7092_v35 = vpop.f32.mrb[46].mxu1  ;;  %v9614_v32 = vadd.f32 %v7005_v49, %v7004_v20 }
 0x1d9   : > { %v7093_v50 = vpop.f32.mrb[47].mxu1 }
 0x1da   : > { %v9617_v39 = vadd.f32 %v7091_v19, %v9522_v53  ;;  %v7094_v46 = vadd.f32 %v7093_v50, %v7092_v35 }
 0x1dc   : > { %v9620_v41 = vadd.f32 %v7094_v46, %v9533_v31  ;;  %v7159_v60 = vpop.f32.mrb[48].mxu0 }
 0x1dd   : > { %v7160_v27 = vpop.f32.mrb[49].mxu0 }
 0x1de   : > { %5759 = vmatmul.mubr.bf16.gmra.mrb[140].mxu1 %v3913_v42  ;;  %v7161_v51 = vadd.f32 %v7160_v27, %v7159_v60  ;;  %v7162_v37 = vpop.f32.mrb[50].mxu0 }
 0x1df   : > { %v7163_v58 = vpop.f32.mrb[51].mxu0 }
 0x1e0   : > { %v9623_v57 = vadd.f32 %v7161_v51, %v9403_v33  ;;  %v7164_v10 = vadd.f32 %v7163_v58, %v7162_v37 }
 0x1e2   : > { %v9626_v61 = vadd.f32 %v7164_v10, %v9411_v14 }
 0x1e4   : > { %v7165_v53 = vpop.f32.mrb[52].mxu0 }
 0x1e5   : > { %v7166_v47 = vpop.f32.mrb[53].mxu0 }
 0x1e6   : > { %v7095_v6 = vpop.f32.mrb[48].mxu1  ;;  %v7167_v36 = vadd.f32 %v7166_v47, %v7165_v53  ;;  %v7168_v8 = vpop.f32.mrb[54].mxu0 }
 0x1e7   : > { %v7096_v23 = vpop.f32.mrb[49].mxu1  ;;  %v7169_v7 = vpop.f32.mrb[55].mxu0 }
 0x1e8   : > { %v7097_v63 = vadd.f32 %v7096_v23, %v7095_v6  ;;  %v7098_v44 = vpop.f32.mrb[50].mxu1  ;;  %v9632_v33 = vadd.f32 %v7167_v36, %v9432_v4  ;;  %v7170_v9 = vadd.f32 %v7169_v7, %v7168_v8 }
 0x1e9   : > { %v7099_v31 = vpop.f32.mrb[51].mxu1 }
 0x1ea   : > { %v9629_v17 = vadd.f32 %v7097_v63, %v9572_v22  ;;  %v7100_v42 = vadd.f32 %v7099_v31, %v7098_v44  ;;  %v9638_v48 = vadd.f32 %v7170_v9, %v9435_v13 }
 0x1ec   : > { %v9635_v14 = vadd.f32 %v7100_v42, %v9581_v54  ;;  %v7171_v43 = vpop.f32.mrb[56].mxu0 }
 0x1ed   : > { %v7172_v56 = vpop.f32.mrb[57].mxu0 }
 0x1ee   : > { %v7173_v49 = vadd.f32 %v7172_v56, %v7171_v43  ;;  %v7174_v19 = vpop.f32.mrb[58].mxu0 }
 0x1ef   : > { %v7101_v55 = vpop.f32.mrb[52].mxu1  ;;  %v7175_v50 = vpop.f32.mrb[59].mxu0 }
 0x1f0   : > { %v7102_v3 = vpop.f32.mrb[53].mxu1  ;;  %v9644_v54 = vadd.f32 %v7173_v49, %v9474_v62  ;;  %v7176_v46 = vadd.f32 %v7175_v50, %v7174_v19 }
 0x1f1   : > { %v7103_v11 = vadd.f32 %v7102_v3, %v7101_v55  ;;  %v7104_v20 = vpop.f32.mrb[54].mxu1 }
 0x1f2   : > { %v7105_v22 = vpop.f32.mrb[55].mxu1  ;;  %v9650_v60 = vadd.f32 %v7176_v46, %v9479_v29 }
 0x1f3   : > { %v9641_v35 = vadd.f32 %v7103_v11, %v9590_v45  ;;  %v7106_v4 = vadd.f32 %v7105_v22, %v7104_v20 }
 0x1f5   : > { %v9647_v13 = vadd.f32 %v7106_v4, %v9595_v30 }
 0x1f6   : > { %v7177_v51 = vpop.f32.mrb[60].mxu0 }
 0x1f7   : > { %v7178_v58 = vpop.f32.mrb[61].mxu0 }
 0x1f8   : > { %v7179_v45 = vadd.f32 %v7178_v58, %v7177_v51  ;;  %v7180_v23 = vpop.f32.mrb[62].mxu0 }
 0x1f9   : > { %v7181_v63 = vpop.f32.mrb[63].mxu0 }
 0x1fa   : > { %v7107_v27 = vpop.f32.mrb[56].mxu1  ;;  %v9656_v30 = vadd.f32 %v7179_v45, %v9536_v18  ;;  %v7182_v47 = vadd.f32 %v7181_v63, %v7180_v23 }
 0x1fb   : > { %v7108_v37 = vpop.f32.mrb[57].mxu1 }
 0x1fc   : > { %v7109_v10 = vadd.f32 %v7108_v37, %v7107_v27  ;;  %v7110_v6 = vpop.f32.mrb[58].mxu1  ;;  %v9662_v31 = vadd.f32 %v7182_v47, %v9544_v34 }
 0x1fd   : > { %v7111_v53 = vpop.f32.mrb[59].mxu1 }
 0x1fe   : > { %v9653_v62 = vadd.f32 %v7109_v10, %v9602_v59  ;;  %v7112_v44 = vadd.f32 %v7111_v53, %v7110_v6  ;;  %v10418_v6 = vld [vmem:[#allocation4_spill] sm:$0xff] }
 0x200   : > { %v9659_v29 = vadd.f32 %v7112_v44, %v9607_v52  ;;  %v7183_v36 = vpop.f32.mrb[64].mxu0 }
 0x201   : > { %v7184_v42 = vpop.f32.mrb[65].mxu0 }
 0x202   : > { %v7185_v9 = vadd.f32 %v7184_v42, %v7183_v36  ;;  %v7186_v55 = vpop.f32.mrb[66].mxu0 }
 0x203   : > { %v7187_v43 = vpop.f32.mrb[67].mxu0 }
 0x204   : > { %v9665_v18 = vadd.f32 %v7185_v9, %v9568_v38  ;;  %v7188_v20 = vadd.f32 %v7187_v43, %v7186_v55 }
 0x205   : > { %v7113_v8 = vpop.f32.mrb[60].mxu1 }
 0x206   : > { %v7114_v7 = vpop.f32.mrb[61].mxu1  ;;  %v9671_v34 = vadd.f32 %v7188_v20, %v9579_v21 }
 0x207   : > { %v7115_v3 = vadd.f32 %v7114_v7, %v7113_v8  ;;  %v7116_v59 = vpop.f32.mrb[62].mxu1 }
 0x208   : > { %v7117_v11 = vpop.f32.mrb[63].mxu1 }
 0x209   : > { %v9668_v52 = vadd.f32 %v7115_v3, %v9612_v16  ;;  %v7118_v56 = vadd.f32 %v7117_v11, %v7116_v59 }
 0x20b   : > { %v9674_v22 = vadd.f32 %v7118_v56, %v9614_v32  ;;  %v7189_v49 = vpop.f32.mrb[68].mxu0 }
 0x20c   : > { %v7190_v19 = vpop.f32.mrb[69].mxu0 }
 0x20d   : > { %v7191_v4 = vadd.f32 %v7190_v19, %v7189_v49  ;;  %v7192_v50 = vpop.f32.mrb[70].mxu0 }
 0x20e   : > { %v7193_v27 = vpop.f32.mrb[71].mxu0 }
 0x20f   : > { %v9677_v38 = vadd.f32 %v7191_v4, %v9593_v0  ;;  %v7194_v37 = vadd.f32 %v7193_v27, %v7192_v50 }
 0x211   : > { %v7119_v46 = vpop.f32.mrb[64].mxu1  ;;  %v9680_v21 = vadd.f32 %v7194_v37, %v9598_v24 }
 0x212   : > { %v7120_v51 = vpop.f32.mrb[65].mxu1 }
 0x213   : > { %v7121_v16 = vadd.f32 %v7120_v51, %v7119_v46  ;;  %v7122_v58 = vpop.f32.mrb[66].mxu1 }
 0x214   : > { %v7123_v10 = vpop.f32.mrb[67].mxu1 }
 0x215   : > { %v9683_v32 = vadd.f32 %v7121_v16, %v10418_v6  ;;  %v7124_v45 = vadd.f32 %v7123_v10, %v7122_v58  ;;  %v7195_v23 = vpop.f32.mrb[72].mxu0 }
 0x216   : > { %v7196_v63 = vpop.f32.mrb[73].mxu0 }
 0x217   : > { %v9686_v53 = vadd.f32 %v7124_v45, %v9262_v40  ;;  %v7197_v44 = vadd.f32 %v7196_v63, %v7195_v23  ;;  %v7198_v47 = vpop.f32.mrb[74].mxu0 }
 0x218   : > { %v7199_v0 = vpop.f32.mrb[75].mxu0 }
 0x219   : > { %v9689_v36 = vadd.f32 %v7197_v44, %v9605_v2  ;;  %v7200_v8 = vadd.f32 %v7199_v0, %v7198_v47 }
 0x21b   : > { %v9692_v24 = vadd.f32 %v7200_v8, %v9610_v28 }
 0x21d   : > { %v7125_v42 = vpop.f32.mrb[68].mxu1  ;;  %v7201_v3 = vpop.f32.mrb[76].mxu0 }
 0x21e   : > { %v7126_v7 = vpop.f32.mrb[69].mxu1  ;;  %v7202_v43 = vpop.f32.mrb[77].mxu0 }
 0x21f   : > { %v7127_v9 = vadd.f32 %v7126_v7, %v7125_v42  ;;  %v7128_v55 = vpop.f32.mrb[70].mxu1  ;;  %v7203_v20 = vadd.f32 %v7202_v43, %v7201_v3  ;;  %v7204_v56 = vpop.f32.mrb[78].mxu0 }
 0x220   : > { %v7129_v59 = vpop.f32.mrb[71].mxu1  ;;  %v7205_v49 = vpop.f32.mrb[79].mxu0 }
 0x221   : > { %v9695_v40 = vadd.f32 %v7127_v9, %v9276_v1  ;;  %v7130_v11 = vadd.f32 %v7129_v59, %v7128_v55  ;;  %v9701_v19 = vadd.f32 %v7203_v20, %v9617_v39  ;;  %v7206_v28 = vadd.f32 %v7205_v49, %v7204_v56 }
 0x223   : > { %v9698_v2 = vadd.f32 %v7130_v11, %v9285_v25  ;;  %v9704_v4 = vadd.f32 %v7206_v28, %v9620_v41 }
 0x225   : > { %v7207_v46 = vpop.f32.mrb[80].mxu0 }
 0x226   : > { %v7208_v51 = vpop.f32.mrb[81].mxu0 }
 0x227   : > { %v7209_v16 = vadd.f32 %v7208_v51, %v7207_v46  ;;  %v7210_v58 = vpop.f32.mrb[82].mxu0 }
 0x228   : > { %v7211_v6 = vpop.f32.mrb[83].mxu0 }
 0x229   : > { %v7131_v50 = vpop.f32.mrb[72].mxu1  ;;  %v9710_v39 = vadd.f32 %v7209_v16, %v9629_v17  ;;  %v7212_v23 = vadd.f32 %v7211_v6, %v7210_v58 }
 0x22a   : > { %v7132_v27 = vpop.f32.mrb[73].mxu1 }
 0x22b   : > { %v7133_v1 = vadd.f32 %v7132_v27, %v7131_v50  ;;  %v7134_v37 = vpop.f32.mrb[74].mxu1  ;;  %v9716_v63 = vadd.f32 %v7212_v23, %v9635_v14 }
 0x22c   : > { %v7135_v10 = vpop.f32.mrb[75].mxu1 }
 0x22d   : > { %v9707_v25 = vadd.f32 %v7133_v1, %v9314_v15  ;;  %v7136_v45 = vadd.f32 %v7135_v10, %v7134_v37 }
 0x22f   : > { %v9713_v41 = vadd.f32 %v7136_v45, %v9332_v5 }
 0x231   : > { %v7137_v44 = vpop.f32.mrb[76].mxu1 }
 0x232   : > { %v7138_v47 = vpop.f32.mrb[77].mxu1  ;;  %v7213_v0 = vpop.f32.mrb[84].mxu0 }
 0x233   : > { %v7139_v8 = vadd.f32 %v7138_v47, %v7137_v44  ;;  %v7140_v42 = vpop.f32.mrb[78].mxu1  ;;  %v7214_v7 = vpop.f32.mrb[85].mxu0 }
 0x234   : > { %v7141_v9 = vpop.f32.mrb[79].mxu1  ;;  %v7215_v15 = vadd.f32 %v7214_v7, %v7213_v0  ;;  %v7216_v55 = vpop.f32.mrb[86].mxu0 }
 0x235   : > { %v9719_v3 = vadd.f32 %v7139_v8, %v9360_v12  ;;  %v7142_v17 = vadd.f32 %v7141_v9, %v7140_v42  ;;  %v7217_v59 = vpop.f32.mrb[87].mxu0 }
 0x236   : > { %v9722_v5 = vadd.f32 %v7215_v15, %v9641_v35  ;;  %v7218_v43 = vadd.f32 %v7217_v59, %v7216_v55 }
 0x237   : > { %v9725_v14 = vadd.f32 %v7142_v17, %v9368_v26 }
 0x238   : > { %v9728_v11 = vadd.f32 %v7218_v43, %v9647_v13 }
 0x239   : > { %v7271_v20 = vpop.f32.mrb[80].mxu1 }
 0x23a   : > { %v7272_v56 = vpop.f32.mrb[81].mxu1  ;;  %v7219_v49 = vpop.f32.mrb[88].mxu0 }
 0x23b   : > { %v7273_v28 = vadd.f32 %v7272_v56, %v7271_v20  ;;  %v7274_v50 = vpop.f32.mrb[82].mxu1  ;;  %v7220_v46 = vpop.f32.mrb[89].mxu0 }
 0x23c   : > { %v7275_v12 = vpop.f32.mrb[83].mxu1  ;;  %v7221_v27 = vadd.f32 %v7220_v46, %v7219_v49  ;;  %v7222_v51 = vpop.f32.mrb[90].mxu0 }
 0x23d   : > { %v7276_v1 = vadd.f32 %v7275_v12, %v7274_v50  ;;  %v7223_v37 = vpop.f32.mrb[91].mxu0  ;;  %v9731_v35 = vadd.f32 %v7273_v28, %v9623_v57 }
 0x23e   : > { %v9734_v26 = vadd.f32 %v7221_v27, %v9653_v62  ;;  %v7224_v16 = vadd.f32 %v7223_v37, %v7222_v51 }
 0x23f   : > { %v9737_v13 = vadd.f32 %v7276_v1, %v9626_v61 }
 0x240   : > { %v9740_v58 = vadd.f32 %v7224_v16, %v9659_v29 }
 0x241   : > { %v7277_v10 = vpop.f32.mrb[84].mxu1 }
 0x242   : > { %v7278_v6 = vpop.f32.mrb[85].mxu1  ;;  %v7225_v45 = vpop.f32.mrb[92].mxu0 }
 0x243   : > { %v7279_v23 = vadd.f32 %v7278_v6, %v7277_v10  ;;  %v7280_v44 = vpop.f32.mrb[86].mxu1  ;;  %v7226_v47 = vpop.f32.mrb[93].mxu0 }
 0x244   : > { %v7281_v0 = vpop.f32.mrb[87].mxu1  ;;  %v7227_v8 = vadd.f32 %v7226_v47, %v7225_v45  ;;  %v7228_v57 = vpop.f32.mrb[94].mxu0 }
 0x245   : > { %v7282_v42 = vadd.f32 %v7281_v0, %v7280_v44  ;;  %v7229_v7 = vpop.f32.mrb[95].mxu0  ;;  %v9743_v62 = vadd.f32 %v7279_v23, %v9632_v33 }
 0x246   : > { %v9746_v61 = vadd.f32 %v7227_v8, %v9668_v52  ;;  %v7230_v9 = vadd.f32 %v7229_v7, %v7228_v57 }
 0x247   : > { %v9749_v29 = vadd.f32 %v7282_v42, %v9638_v48 }
 0x248   : > { %v9752_v15 = vadd.f32 %v7230_v9, %v9674_v22 }
 0x249   : > { %v7283_v55 = vpop.f32.mrb[88].mxu1 }
 0x24a   : > { %v7284_v17 = vpop.f32.mrb[89].mxu1  ;;  %v7231_v59 = vpop.f32.mrb[96].mxu0 }
 0x24b   : > { %v7285_v43 = vadd.f32 %v7284_v17, %v7283_v55  ;;  %v7286_v20 = vpop.f32.mrb[90].mxu1  ;;  %v7232_v56 = vpop.f32.mrb[97].mxu0 }
 0x24c   : > { %v7287_v49 = vpop.f32.mrb[91].mxu1  ;;  %v7233_v28 = vadd.f32 %v7232_v56, %v7231_v59  ;;  %v7234_v33 = vpop.f32.mrb[98].mxu0 }
 0x24d   : > { %v7288_v50 = vadd.f32 %v7287_v49, %v7286_v20  ;;  %v7235_v46 = vpop.f32.mrb[99].mxu0  ;;  %v9755_v52 = vadd.f32 %v7285_v43, %v9644_v54 }
 0x24e   : > { %v9758_v48 = vadd.f32 %v7233_v28, %v9683_v32  ;;  %v7236_v12 = vadd.f32 %v7235_v46, %v7234_v33 }
 0x24f   : > { %v9761_v22 = vadd.f32 %v7288_v50, %v9650_v60 }
 0x250   : > { %v9764_v27 = vadd.f32 %v7236_v12, %v9686_v53 }
 0x251   : > { %v7289_v51 = vpop.f32.mrb[92].mxu1 }
 0x252   : > { %v7290_v1 = vpop.f32.mrb[93].mxu1  ;;  %v7237_v37 = vpop.f32.mrb[100].mxu0 }
 0x253   : > { %v7291_v16 = vadd.f32 %v7290_v1, %v7289_v51  ;;  %v7292_v10 = vpop.f32.mrb[94].mxu1  ;;  %v7238_v6 = vpop.f32.mrb[101].mxu0 }
 0x254   : > { %v7293_v45 = vpop.f32.mrb[95].mxu1  ;;  %v7239_v23 = vadd.f32 %v7238_v6, %v7237_v37  ;;  %v7240_v54 = vpop.f32.mrb[102].mxu0 }
 0x255   : > { %v7294_v44 = vadd.f32 %v7293_v45, %v7292_v10  ;;  %v7241_v47 = vpop.f32.mrb[103].mxu0  ;;  %v9767_v32 = vadd.f32 %v7291_v16, %v9656_v30 }
 0x256   : > { %v9770_v60 = vadd.f32 %v7239_v23, %v9695_v40  ;;  %v7242_v0 = vadd.f32 %v7241_v47, %v7240_v54 }
 0x257   : > { %v9773_v53 = vadd.f32 %v7294_v44, %v9662_v31 }
 0x258   : > { %v9776_v8 = vadd.f32 %v7242_v0, %v9698_v2 }
 0x259   : > { %v7295_v57 = vpop.f32.mrb[96].mxu1 }
 0x25a   : > { %v7296_v42 = vpop.f32.mrb[97].mxu1  ;;  %v7243_v7 = vpop.f32.mrb[104].mxu0 }
 0x25b   : > { %v7297_v9 = vadd.f32 %v7296_v42, %v7295_v57  ;;  %v7298_v55 = vpop.f32.mrb[98].mxu1  ;;  %v7244_v17 = vpop.f32.mrb[105].mxu0 }
 0x25c   : > { %v7299_v59 = vpop.f32.mrb[99].mxu1  ;;  %v7245_v43 = vadd.f32 %v7244_v17, %v7243_v7  ;;  %v7246_v30 = vpop.f32.mrb[106].mxu0 }
 0x25d   : > { %v7300_v20 = vadd.f32 %v7299_v59, %v7298_v55  ;;  %v7247_v56 = vpop.f32.mrb[107].mxu0  ;;  %v9779_v40 = vadd.f32 %v7297_v9, %v9665_v18 }
 0x25e   : > { %v9782_v31 = vadd.f32 %v7245_v43, %v9707_v25  ;;  %v7248_v49 = vadd.f32 %v7247_v56, %v7246_v30 }
 0x25f   : > { %v9785_v2 = vadd.f32 %v7300_v20, %v9671_v34 }
 0x260   : > { %v9788_v28 = vadd.f32 %v7248_v49, %v9713_v41 }
 0x261   : > { %v7301_v33 = vpop.f32.mrb[100].mxu1 }
 0x262   : > { %v7302_v50 = vpop.f32.mrb[101].mxu1  ;;  %v7249_v46 = vpop.f32.mrb[108].mxu0 }
 0x263   : > { %v7303_v12 = vadd.f32 %v7302_v50, %v7301_v33  ;;  %v7304_v51 = vpop.f32.mrb[102].mxu1  ;;  %v7250_v1 = vpop.f32.mrb[109].mxu0 }
 0x264   : > { %v7305_v37 = vpop.f32.mrb[103].mxu1  ;;  %v7251_v16 = vadd.f32 %v7250_v1, %v7249_v46  ;;  %v7252_v18 = vpop.f32.mrb[110].mxu0 }
 0x265   : > { %v7306_v10 = vadd.f32 %v7305_v37, %v7304_v51  ;;  %v7253_v6 = vpop.f32.mrb[111].mxu0  ;;  %v9791_v25 = vadd.f32 %v7303_v12, %v9677_v38 }
 0x266   : > { %v9794_v34 = vadd.f32 %v7251_v16, %v9719_v3  ;;  %v7254_v45 = vadd.f32 %v7253_v6, %v7252_v18 }
 0x267   : > { %v9797_v41 = vadd.f32 %v7306_v10, %v9680_v21 }
 0x268   : > { %v9800_v23 = vadd.f32 %v7254_v45, %v9725_v14 }
 0x269   : > { %v7307_v54 = vpop.f32.mrb[104].mxu1 }
 0x26a   : > { %v7308_v44 = vpop.f32.mrb[105].mxu1  ;;  %v7409_v47 = vpop.f32.mrb[112].mxu0 }
 0x26b   : > { %v7309_v0 = vadd.f32 %v7308_v44, %v7307_v54  ;;  %v7310_v57 = vpop.f32.mrb[106].mxu1  ;;  %v5810_v42 = vadd.f32 %v7409_v47, %v9743_v62  ;;  %v5801_v38 = vpop.f32.mrb[113].mxu0 }
 0x26c   : > { %v7311_v7 = vpop.f32.mrb[107].mxu1  ;;  %v5802_v3 = vadd.f32 %v5801_v38, %v9731_v35  ;;  %v7410_v9 = vpop.f32.mrb[114].mxu0 }
 0x26d   : > { %v7312_v55 = vadd.f32 %v7311_v7, %v7310_v57  ;;  %v5813_v21 = vadd.f32 %v7410_v9, %v9749_v29  ;;  %v5804_v17 = vpop.f32.mrb[115].mxu0  ;;  %v9806_v59 = vadd.f32 %v7309_v0, %v9689_v36  ;;  %v6127_v49 = vmul.f32 %v5810_v42, %v5810_v42 }
 0x26e   : > { %v5805_v14 = vadd.f32 %v5804_v17, %v9737_v13  ;;  %v6125_v43 = vmul.f32 %v5802_v3, %v5802_v3 }
 0x26f   : > { %v6801_v62 = vpack.c.bf16 %v5813_v21, %v5810_v42  ;;  %v9817_v35 = vadd.f32 %v7312_v55, %v9692_v24  ;;  %v6128_v24 = vmul.f32 %v5813_v21, %v5813_v21 }
 0x270   : > { %v6796_v29 = vpack.c.bf16 %v5805_v14, %v5802_v3  ;;  %v6088_v30 = vadd.f32 %v5805_v14, %v5802_v3  ;;  %v6126_v20 = vmul.f32 %v5805_v14, %v5805_v14 }
 0x271   : > { %v7313_v36 = vpop.f32.mrb[108].mxu1  ;;  %6904 = vst [vmem:[%s9813_s20 + $0x8] sm:$0xff] %v6801_v62  }
 0x272   : > { %v7314_v56 = vpop.f32.mrb[109].mxu1  ;;  %6797 = vst [vmem:[%s9813_s20] sm:$0xff] %v6796_v29   ;;  %v6089_v33 = vadd.f32 %v6088_v30, %v5810_v42  ;;  %v6157_v50 = vadd.f32 %v6126_v20, %v6125_v43  ;;  %v7413_v46 = vpop.f32.mrb[116].mxu0 }
 0x273   : > { %v7315_v12 = vadd.f32 %v7314_v56, %v7313_v36  ;;  %v7316_v51 = vpop.f32.mrb[110].mxu1  ;;  %v5826_v13 = vadd.f32 %v7413_v46, %v9767_v32  ;;  %v5817_v1 = vpop.f32.mrb[117].mxu0 }
 0x274   : > { %v7317_v37 = vpop.f32.mrb[111].mxu1  ;;  %v6158_v16 = vadd.f32 %v6157_v50, %v6127_v49  ;;  %v5818_v18 = vadd.f32 %v5817_v1, %v9755_v52  ;;  %v6090_v10 = vadd.f32 %v6089_v33, %v5813_v21  ;;  %v7414_v6 = vpop.f32.mrb[118].mxu0 }
 0x275   : > { %v7318_v45 = vadd.f32 %v7317_v37, %v7316_v51  ;;  %v5829_v54 = vadd.f32 %v7414_v6, %v9773_v53  ;;  %v5820_v44 = vpop.f32.mrb[119].mxu0  ;;  %v5697_v47 = vadd.f32 %v7315_v12, %v9701_v19  ;;  %v6131_v53 = vmul.f32 %v5826_v13, %v5826_v13 }
 0x276   : > { %v6091_v0 = vadd.f32 %v6090_v10, %v5818_v18  ;;  %v6129_v57 = vmul.f32 %v5818_v18, %v5818_v18  ;;  %v6159_v42 = vadd.f32 %v6158_v16, %v6128_v24  ;;  %v5821_v32 = vadd.f32 %v5820_v44, %v9761_v22 }
 0x277   : > { %v6811_v38 = vpack.c.bf16 %v5829_v54, %v5826_v13  ;;  %v5700_v7 = vadd.f32 %v7318_v45, %v9704_v4  ;;  %v6132_v36 = vmul.f32 %v5829_v54, %v5829_v54 }
 0x278   : > { %v6160_v3 = vadd.f32 %v6159_v42, %v6129_v57  ;;  %v6806_v52 = vpack.c.bf16 %v5821_v32, %v5818_v18  ;;  %v6092_v9 = vadd.f32 %v6091_v0, %v5821_v32  ;;  %v6130_v55 = vmul.f32 %v5821_v32, %v5821_v32 }
 0x279   : > { %v7319_v21 = vpop.f32.mrb[112].mxu1  ;;  %6906 = vst [vmem:[%s9813_s20 + $0x18] sm:$0xff] %v6811_v38  }
 0x27a   : > { %v7320_v17 = vpop.f32.mrb[113].mxu1  ;;  %6905 = vst [vmem:[%s9813_s20 + $0x10] sm:$0xff] %v6806_v52   ;;  %v6093_v14 = vadd.f32 %v6092_v9, %v5826_v13  ;;  %v6161_v62 = vadd.f32 %v6160_v3, %v6130_v55  ;;  %v7417_v19 = vpop.f32.mrb[120].mxu0 }
 0x27b   : > { %v7321_v43 = vadd.f32 %v7320_v17, %v7319_v21  ;;  %v7322_v29 = vpop.f32.mrb[114].mxu1  ;;  %v5842_v30 = vadd.f32 %v7417_v19, %v9791_v25  ;;  %v5833_v22 = vpop.f32.mrb[121].mxu0 }
 0x27c   : > { %v7323_v20 = vpop.f32.mrb[115].mxu1  ;;  %v6162_v4 = vadd.f32 %v6161_v62, %v6131_v53  ;;  %v5834_v56 = vadd.f32 %v5833_v22, %v9779_v40  ;;  %v6094_v49 = vadd.f32 %v6093_v14, %v5829_v54  ;;  %v7418_v33 = vpop.f32.mrb[122].mxu0 }
 0x27d   : > { %v7324_v50 = vadd.f32 %v7323_v20, %v7322_v29  ;;  %v5845_v46 = vadd.f32 %v7418_v33, %v9797_v41  ;;  %v5836_v12 = vpop.f32.mrb[123].mxu0  ;;  %v5705_v51 = vadd.f32 %v7321_v43, %v9710_v39  ;;  %v6135_v41 = vmul.f32 %v5842_v30, %v5842_v30 }
 0x27e   : > { %v6095_v13 = vadd.f32 %v6094_v49, %v5834_v56  ;;  %v6133_v1 = vmul.f32 %v5834_v56, %v5834_v56  ;;  %v6163_v37 = vadd.f32 %v6162_v4, %v6132_v36  ;;  %v5837_v25 = vadd.f32 %v5836_v12, %v9785_v2 }
 0x27f   : > { %v6821_v24 = vpack.c.bf16 %v5845_v46, %v5842_v30  ;;  %v5708_v16 = vadd.f32 %v7324_v50, %v9716_v63  ;;  %v6136_v3 = vmul.f32 %v5845_v46, %v5845_v46 }
 0x280   : > { %v6164_v18 = vadd.f32 %v6163_v37, %v6133_v1  ;;  %v6816_v40 = vpack.c.bf16 %v5837_v25, %v5834_v56  ;;  %v6096_v10 = vadd.f32 %v6095_v13, %v5837_v25  ;;  %v6134_v6 = vmul.f32 %v5837_v25, %v5837_v25 }
 0x281   : > { %v7325_v45 = vpop.f32.mrb[116].mxu1  ;;  %6908 = vst [vmem:[%s9813_s20 + $0x28] sm:$0xff] %v6821_v24  }
 0x282   : > { %v7326_v54 = vpop.f32.mrb[117].mxu1  ;;  %6907 = vst [vmem:[%s9813_s20 + $0x20] sm:$0xff] %v6816_v40   ;;  %v6097_v44 = vadd.f32 %v6096_v10, %v5842_v30  ;;  %v6165_v0 = vadd.f32 %v6164_v18, %v6134_v6  ;;  %v7421_v39 = vpop.f32.mrb[124].mxu0 }
 0x283   : > { %v7327_v57 = vadd.f32 %v7326_v54, %v7325_v45  ;;  %v7328_v42 = vpop.f32.mrb[118].mxu1  ;;  %v5858_v32 = vadd.f32 %v7421_v39, %v5697_v47  ;;  %v5849_v38 = vpop.f32.mrb[125].mxu0 }
 0x284   : > { %v7329_v2 = vpop.f32.mrb[119].mxu1  ;;  %v6166_v52 = vadd.f32 %v6165_v0, %v6135_v41  ;;  %v5850_v63 = vadd.f32 %v5849_v38, %v9806_v59  ;;  %v6098_v9 = vadd.f32 %v6097_v44, %v5845_v46  ;;  %v7422_v55 = vpop.f32.mrb[126].mxu0 }
 0x285   : > { %v7330_v21 = vadd.f32 %v7329_v2, %v7328_v42  ;;  %v5861_v17 = vadd.f32 %v7422_v55, %v5700_v7  ;;  %v5852_v53 = vpop.f32.mrb[127].mxu0  ;;  %v5713_v14 = vadd.f32 %v7327_v57, %v9722_v5  ;;  %v6139_v7 = vmul.f32 %v5858_v32, %v5858_v32 }
 0x286   : > { %v6099_v62 = vadd.f32 %v6098_v9, %v5850_v63  ;;  %v6137_v19 = vmul.f32 %v5850_v63, %v5850_v63  ;;  %v6167_v43 = vadd.f32 %v6166_v52, %v6136_v3  ;;  %v5853_v47 = vadd.f32 %v5852_v53, %v9817_v35 }
 0x287   : > { %v6831_v29 = vpack.c.bf16 %v5861_v17, %v5858_v32  ;;  %v5716_v30 = vadd.f32 %v7330_v21, %v9728_v11  ;;  %v6140_v1 = vmul.f32 %v5861_v17, %v5861_v17 }
 0x288   : > { %v6168_v22 = vadd.f32 %v6167_v43, %v6137_v19  ;;  %v6826_v20 = vpack.c.bf16 %v5853_v47, %v5850_v63  ;;  %v6100_v59 = vadd.f32 %v6099_v62, %v5853_v47  ;;  %v6138_v36 = vmul.f32 %v5853_v47, %v5853_v47 }
 0x289   : > { %v7331_v4 = vpop.f32.mrb[120].mxu1  ;;  %6910 = vst [vmem:[%s9813_s20 + $0x38] sm:$0xff] %v6831_v29  }
 0x28a   : > { %v7332_v56 = vpop.f32.mrb[121].mxu1  ;;  %6909 = vst [vmem:[%s9813_s20 + $0x30] sm:$0xff] %v6826_v20   ;;  %v6101_v49 = vadd.f32 %v6100_v59, %v5858_v32  ;;  %v6169_v33 = vadd.f32 %v6168_v22, %v6138_v36  ;;  %v7425_v5 = vpop.f32.mrb[128].mxu0 }
 0x28b   : > { %v7333_v50 = vadd.f32 %v7332_v56, %v7331_v4  ;;  %v7334_v46 = vpop.f32.mrb[122].mxu1  ;;  %v5874_v12 = vadd.f32 %v7425_v5, %v5713_v14  ;;  %v5865_v13 = vpop.f32.mrb[129].mxu0 }
 0x28c   : > { %v7335_v35 = vpop.f32.mrb[123].mxu1  ;;  %v6170_v37 = vadd.f32 %v6169_v33, %v6139_v7  ;;  %v5866_v11 = vadd.f32 %v5865_v13, %v5705_v51  ;;  %v6102_v25 = vadd.f32 %v6101_v49, %v5861_v17  ;;  %v7426_v24 = vpop.f32.mrb[130].mxu0 }
 0x28d   : > { %v7336_v18 = vadd.f32 %v7335_v35, %v7334_v46  ;;  %v5877_v40 = vadd.f32 %v7426_v24, %v5716_v30  ;;  %v5868_v10 = vpop.f32.mrb[131].mxu0  ;;  %v5721_v6 = vadd.f32 %v7333_v50, %v9734_v26  ;;  %v6143_v3 = vmul.f32 %v5874_v12, %v5874_v12 }
 0x28e   : > { %v6103_v45 = vadd.f32 %v6102_v25, %v5866_v11  ;;  %v6141_v54 = vmul.f32 %v5866_v11, %v5866_v11  ;;  %v6171_v41 = vadd.f32 %v6170_v37, %v6140_v1  ;;  %v5869_v44 = vadd.f32 %v5868_v10, %v5708_v16 }
 0x28f   : > { %v6841_v0 = vpack.c.bf16 %v5877_v40, %v5874_v12  ;;  %v5724_v39 = vadd.f32 %v7336_v18, %v9740_v58  ;;  %v6144_v16 = vmul.f32 %v5877_v40, %v5877_v40 }
 0x290   : > { %v6172_v57 = vadd.f32 %v6171_v41, %v6141_v54  ;;  %v6836_v42 = vpack.c.bf16 %v5869_v44, %v5866_v11  ;;  %v6104_v32 = vadd.f32 %v6103_v45, %v5869_v44  ;;  %v6142_v51 = vmul.f32 %v5869_v44, %v5869_v44 }
 0x291   : > { %v7337_v38 = vpop.f32.mrb[124].mxu1  ;;  %6912 = vst [vmem:[%s9813_s20 + $0x48] sm:$0xff] %v6841_v0  }
 0x292   : > { %v7338_v2 = vpop.f32.mrb[125].mxu1  ;;  %6911 = vst [vmem:[%s9813_s20 + $0x40] sm:$0xff] %v6836_v42   ;;  %v6105_v52 = vadd.f32 %v6104_v32, %v5874_v12  ;;  %v6173_v63 = vadd.f32 %v6172_v57, %v6142_v51  ;;  %v7429_v9 = vpop.f32.mrb[132].mxu0 }
 0x293   : > { %v7339_v26 = vadd.f32 %v7338_v2, %v7337_v38  ;;  %v7340_v55 = vpop.f32.mrb[126].mxu1  ;;  %v5881_v21 = vpop.f32.mrb[133].mxu0 }
 0x294   : > { %v7341_v17 = vpop.f32.mrb[127].mxu1  ;;  %v6174_v53 = vadd.f32 %v6173_v63, %v6143_v3  ;;  %v5882_v14 = vadd.f32 %v5881_v21, %v5721_v6  ;;  %v6106_v58 = vadd.f32 %v6105_v52, %v5877_v40  ;;  %v7430_v62 = vpop.f32.mrb[134].mxu0 }
 0x295   : > { %v7342_v19 = vadd.f32 %v7341_v17, %v7340_v55  ;;  %v5729_v43 = vadd.f32 %v7339_v26, %v9746_v61  ;;  %v5884_v47 = vpop.f32.mrb[135].mxu0 }
 0x296   : > { %v6107_v29 = vadd.f32 %v6106_v58, %v5882_v14  ;;  %v6145_v30 = vmul.f32 %v5882_v14, %v5882_v14  ;;  %v6175_v22 = vadd.f32 %v6174_v53, %v6144_v16  ;;  %v5885_v20 = vadd.f32 %v5884_v47, %v5724_v39 }
 0x297   : > { %v5890_v59 = vadd.f32 %v7429_v9, %v5729_v43  ;;  %v5732_v36 = vadd.f32 %v7342_v19, %v9752_v15 }
 0x298   : > { %v6176_v4 = vadd.f32 %v6175_v22, %v6145_v30  ;;  %v6846_v56 = vpack.c.bf16 %v5885_v20, %v5882_v14  ;;  %v6108_v7 = vadd.f32 %v6107_v29, %v5885_v20  ;;  %v6146_v49 = vmul.f32 %v5885_v20, %v5885_v20 }
 0x299   : > { %v7343_v33 = vpop.f32.mrb[128].mxu1  ;;  %v5893_v5 = vadd.f32 %v7430_v62, %v5732_v36  ;;  %v6147_v46 = vmul.f32 %v5890_v59, %v5890_v59 }
 0x29a   : > { %v7344_v50 = vpop.f32.mrb[129].mxu1  ;;  %6913 = vst [vmem:[%s9813_s20 + $0x50] sm:$0xff] %v6846_v56   ;;  %v6109_v61 = vadd.f32 %v6108_v7, %v5890_v59  ;;  %v6177_v12 = vadd.f32 %v6176_v4, %v6146_v49  ;;  %v7433_v13 = vpop.f32.mrb[136].mxu0 }
 0x29b   : > { %v7345_v35 = vadd.f32 %v7344_v50, %v7343_v33  ;;  %v7346_v1 = vpop.f32.mrb[130].mxu1  ;;  %v6851_v37 = vpack.c.bf16 %v5893_v5, %v5890_v59  ;;  %v5897_v11 = vpop.f32.mrb[137].mxu0  ;;  %v6148_v24 = vmul.f32 %v5893_v5, %v5893_v5 }
 0x29c   : > { %v7347_v25 = vpop.f32.mrb[131].mxu1  ;;  %v6178_v15 = vadd.f32 %v6177_v12, %v6147_v46  ;;  %v6110_v18 = vadd.f32 %v6109_v61, %v5893_v5  ;;  %v7434_v40 = vpop.f32.mrb[138].mxu0 }
 0x29d   : > { %v7348_v10 = vadd.f32 %v7347_v25, %v7346_v1  ;;  %6914 = vst [vmem:[%s9813_s20 + $0x58] sm:$0xff] %v6851_v37   ;;  %v5737_v6 = vadd.f32 %v7345_v35, %v9758_v48  ;;  %v5900_v45 = vpop.f32.mrb[139].mxu0 }
 0x29e   : > { %v6179_v54 = vadd.f32 %v6178_v15, %v6148_v24 }
 0x29f   : > { %v5898_v41 = vadd.f32 %v5897_v11, %v5737_v6  ;;  %v5740_v44 = vadd.f32 %v7348_v10, %v9764_v27 }
 0x2a1   : > { %v7349_v0 = vpop.f32.mrb[132].mxu1  ;;  %v6111_v39 = vadd.f32 %v6110_v18, %v5898_v41  ;;  %v6149_v57 = vmul.f32 %v5898_v41, %v5898_v41  ;;  %v5901_v42 = vadd.f32 %v5900_v45, %v5740_v44 }
 0x2a2   : > { %v7350_v32 = vpop.f32.mrb[133].mxu1  ;;  %v7437_v51 = vpop.f32.mrb[140].mxu0 }
 0x2a3   : > { %v7351_v38 = vadd.f32 %v7350_v32, %v7349_v0  ;;  %v7352_v2 = vpop.f32.mrb[134].mxu1  ;;  %v6180_v3 = vadd.f32 %v6179_v54, %v6149_v57  ;;  %v6856_v52 = vpack.c.bf16 %v5901_v42, %v5898_v41  ;;  %v6112_v63 = vadd.f32 %v6111_v39, %v5901_v42  ;;  %v5913_v9 = vpop.f32.mrb[141].mxu0 }
 0x2a4   : > { %v7353_v26 = vpop.f32.mrb[135].mxu1  ;;  %v6150_v48 = vmul.f32 %v5901_v42, %v5901_v42  ;;  %v7438_v55 = vpop.f32.mrb[142].mxu0 }
 0x2a5   : > { %v7354_v21 = vadd.f32 %v7353_v26, %v7352_v2  ;;  %v5745_v17 = vadd.f32 %v7351_v38, %v9770_v60  ;;  %6915 = vst [vmem:[%s9813_s20 + $0x60] sm:$0xff] %v6856_v52   ;;  %v5916_v27 = vpop.f32.mrb[143].mxu0 }
 0x2a6   : > { %v6181_v16 = vadd.f32 %v6180_v3, %v6150_v48 }
 0x2a7   : > { %v5906_v53 = vadd.f32 %v7433_v13, %v5745_v17  ;;  %v5748_v14 = vadd.f32 %v7354_v21, %v9776_v8 }
 0x2a9   : > { %v7355_v58 = vpop.f32.mrb[136].mxu1  ;;  %v6151_v62 = vmul.f32 %v5906_v53, %v5906_v53  ;;  %v5909_v19 = vadd.f32 %v7434_v40, %v5748_v14  ;;  %v6113_v43 = vadd.f32 %v6112_v63, %v5906_v53 }
 0x2aa   : > { %v7356_v47 = vpop.f32.mrb[137].mxu1 }
 0x2ab   : > { %v7357_v29 = vadd.f32 %v7356_v47, %v7355_v58  ;;  %v7358_v30 = vpop.f32.mrb[138].mxu1  ;;  %v6861_v22 = vpack.c.bf16 %v5909_v19, %v5906_v53  ;;  %v6152_v20 = vmul.f32 %v5909_v19, %v5909_v19  ;;  %v6182_v59 = vadd.f32 %v6181_v16, %v6151_v62 }
 0x2ac   : > { %v7359_v36 = vpop.f32.mrb[139].mxu1  ;;  %v6114_v4 = vadd.f32 %v6113_v43, %v5909_v19 }
 0x2ad   : > { %6916 = vst [vmem:[%s9813_s20 + $0x68] sm:$0xff] %v6861_v22   ;;  %v7360_v60 = vadd.f32 %v7359_v36, %v7358_v30  ;;  %v5753_v56 = vadd.f32 %v7357_v29, %v9782_v31  ;;  %v6183_v7 = vadd.f32 %v6182_v59, %v6152_v20 }
 0x2af   : > { %v5914_v49 = vadd.f32 %v5913_v9, %v5753_v56  ;;  %v5756_v8 = vadd.f32 %v7360_v60, %v9788_v28 }
 0x2b1   : > { %v7361_v33 = vpop.f32.mrb[140].mxu1  ;;  %v6115_v5 = vadd.f32 %v6114_v4, %v5914_v49  ;;  %v6153_v50 = vmul.f32 %v5914_v49, %v5914_v49  ;;  %v5917_v46 = vadd.f32 %v5916_v27, %v5756_v8 }
 0x2b2   : > { %v7362_v61 = vpop.f32.mrb[141].mxu1 }
 0x2b3   : > { %v7363_v12 = vadd.f32 %v7362_v61, %v7361_v33  ;;  %v6184_v13 = vadd.f32 %v6183_v7, %v6153_v50  ;;  %v7364_v35 = vpop.f32.mrb[142].mxu1  ;;  %v6866_v1 = vpack.c.bf16 %v5917_v46, %v5914_v49  ;;  %v6116_v37 = vadd.f32 %v6115_v5, %v5917_v46 }
 0x2b4   : > { %v7365_v11 = vpop.f32.mrb[143].mxu1  ;;  %v6154_v25 = vmul.f32 %v5917_v46, %v5917_v46 }
 0x2b5   : > { %v5761_v31 = vadd.f32 %v7363_v12, %v9794_v34  ;;  %v7366_v24 = vadd.f32 %v7365_v11, %v7364_v35  ;;  %6917 = vst [vmem:[%s9813_s20 + $0x70] sm:$0xff] %v6866_v1  }
 0x2b6   : > { %v6185_v15 = vadd.f32 %v6184_v13, %v6154_v25 }
 0x2b7   : > { %v5922_v18 = vadd.f32 %v7437_v51, %v5761_v31  ;;  %v5764_v28 = vadd.f32 %v7366_v24, %v9800_v23 }
 0x2b9   : > { %v6155_v40 = vmul.f32 %v5922_v18, %v5922_v18  ;;  %v5925_v10 = vadd.f32 %v7438_v55, %v5764_v28  ;;  %v6117_v6 = vadd.f32 %v6116_v37, %v5922_v18 }
 0x2bb   : > { %v6871_v45 = vpack.c.bf16 %v5925_v10, %v5922_v18  ;;  %v6156_v54 = vmul.f32 %v5925_v10, %v5925_v10  ;;  %v6118_v41 = vadd.f32 %v6117_v6, %v5925_v10  ;;  %v6186_v44 = vadd.f32 %v6185_v15, %v6155_v40 }
 0x2bd   : > { %6918 = vst [vmem:[%s9813_s20 + $0x78] sm:$0xff] %v6871_v45   ;;  %v6119_v0 = vrot.slane %v6118_v41, 4  ;;  %v6187_v39 = vadd.f32 %v6186_v44, %v6156_v54 }
 0x2bf   : > { %v6120_v57 = vadd.f32 %v6119_v0, %v6118_v41  ;;  %v6188_v42 = vrot.slane %v6187_v39, 4 }
 0x2c1   : > { %v6121_v34 = vrot.slane %v6120_v57, 2  ;;  %v6189_v32 = vadd.f32 %v6188_v42, %v6187_v39 }
 0x2c3   : > { %v6122_v38 = vadd.f32 %v6121_v34, %v6120_v57  ;;  %v6190_v2 = vrot.slane %v6189_v32, 2 }
 0x2c5   : > { %v6123_v51 = vrot.slane %v6122_v38, 1  ;;  %v6191_v3 = vadd.f32 %v6190_v2, %v6189_v32 }
 0x2c7   : > { %v6192_v23 = vrot.slane %v6191_v3, 1  ;;  %v6124_v52 = vadd.f32 %v6123_v51, %v6122_v38 }
 0x2c9   : > { %v6193_v63 = vadd.f32 %v6192_v23, %v6191_v3 }
 0x2cb   : > { %v6195_v9 = vsel %vm245_vm0, %v6124_v52, %v6193_v63 }
 0x2cc   : > { %6196 = vst [vmem:[%s235_s14] sm:$0x3] %v6195_v9 }
 0x2cd PF: > { %s16_s18 = sadd.s32 1, %s7597_s18  }
 0x2ce   : > { %p13_p4 = scmp.ge.s32.totalorder %s16_s18, 4  }
 0x2d0   :  { %15 = sbr.rel (!%p13_p4) target bundleno = 1 (0x1), region = 78 }

</bundles_post_ra>
